<compile_context>
chip_gen: v7x
topology: tpu7x:2x2x1
jax: 0.10.0
libtpu: 0.0.40
codegen_flags: <defaults>
</compile_context>

<pallas_src>
import random

import jax
import jax.numpy as jnp
from jax.experimental import pallas as pl
from jax.experimental.pallas import tpu as pltpu


_LANE = 128
_SUBLANE = 8


# ---------------------------------------------------------------------------
# Padding / bias-folding helpers (lane/sublane alignment)
# ---------------------------------------------------------------------------

def _round_up(n, m):
    return ((n + m - 1) // m) * m


def _pad_axis(x, axis, new_size, value=0.0):
    pad = new_size - x.shape[axis]
    if pad == 0:
        return x
    widths = [(0, 0)] * x.ndim
    widths[axis] = (0, pad)
    return jnp.pad(x, widths, constant_values=value)


def _pad_gru_weight(w, in_p, h_p):
    """(in_dim, 3H) -> (in_p, 3*h_p); pad each r/z/n gate block separately."""
    h = w.shape[1] // 3
    parts = []
    for i in range(3):
        blk = w[:, i * h:(i + 1) * h]
        blk = _pad_axis(blk, 0, in_p)
        blk = _pad_axis(blk, 1, h_p)
        parts.append(blk)
    return jnp.concatenate(parts, axis=1)


def _pad_gru_bias(b, h_p):
    """(1, 3H) -> (1, 3*h_p)."""
    h = b.shape[1] // 3
    parts = [_pad_axis(b[:, i * h:(i + 1) * h], 1, h_p) for i in range(3)]
    return jnp.concatenate(parts, axis=1)


def _fold_biases(bih_p, bhh_p, h_p):
    """Fold b_hh into b_ih for the r/z gates (n gate must stay separate)."""
    b_gi = jnp.concatenate([
        bih_p[:, :h_p] + bhh_p[:, :h_p],
        bih_p[:, h_p:2 * h_p] + bhh_p[:, h_p:2 * h_p],
        bih_p[:, 2 * h_p:],
    ], axis=1)                                   # (1, 3*h_p), added to gi
    b_hn = bhh_p[:, 2 * h_p:]                    # (1, h_p),   added to gh_n
    return b_gi, b_hn


# ---------------------------------------------------------------------------
# Pallas kernels
# ---------------------------------------------------------------------------

def encoder_kernel(x_ref, wih_ref, whh_ref, bgi_ref, bhn_ref, h_ref, gi_scr):
    """Whole encoder in one kernel invocation (grid=(1,)).

    Non-recurrent input matmul is hoisted: one (S*Bp, Ep)x(Ep, 3Hp) matmul,
    then an unrolled recurrence with only gh = h @ W_hh on the serial chain.
    """
    Bp, Hp = h_ref.shape
    SB, _ = x_ref.shape
    S = SB // Bp

    gi_scr[...] = (jnp.dot(x_ref[...], wih_ref[...],
                           preferred_element_type=jnp.float32) + bgi_ref[...])

    whh = whh_ref[...]
    bhn = bhn_ref[...]

    def step(t, h):
        off = pl.multiple_of(t * Bp, Bp)
        gi = gi_scr[pl.ds(off, Bp), :]
        gh = jnp.dot(h, whh, preferred_element_type=jnp.float32)
        r = jax.nn.sigmoid(gi[:, :Hp] + gh[:, :Hp])
        z = jax.nn.sigmoid(gi[:, Hp:2 * Hp] + gh[:, Hp:2 * Hp])
        n = jnp.tanh(gi[:, 2 * Hp:] + r * (gh[:, 2 * Hp:] + bhn))
        return (1.0 - z) * n + z * h

    h0 = jnp.zeros((Bp, Hp), jnp.float32)
    h_ref[...] = jax.lax.fori_loop(0, S, step, h0, unroll=True)


def decoder_kernel(tf_ref, tfx_ref, h0_ref, wih_ref, whh_ref, bgi_ref, bhn_ref,
                   wfc_ref, bfc_ref, embf_ref, out_ref, gi_scr, ggi_scr):
    """Whole decoder loop in one kernel invocation (grid=(1,)).

    tf_ref: (T-1,) int32 teacher-forcing decisions in SMEM (scalar prefetch).
    tfx_ref: teacher-forced embeddings, flat ((T-1)*Bp, Ep).
    embf_ref: emb_fused = dec_emb @ W_ih, so the greedy gather is one matmul
    straight into gi space. Greedy work is gated with pl.when.
    """
    Tm1 = tf_ref.shape[0]
    Bp, Hp = h0_ref.shape
    Vp = wfc_ref.shape[1]

    # Hoisted non-recurrent input matmul for ALL teacher-forced steps.
    gi_scr[...] = (jnp.dot(tfx_ref[...], wih_ref[...],
                           preferred_element_type=jnp.float32) + bgi_ref[...])
    ggi_scr[...] = jnp.zeros_like(ggi_scr)

    whh = whh_ref[...]
    bhn = bhn_ref[...]
    wfc = wfc_ref[...]
    bfc = bfc_ref[...]
    bgi = bgi_ref[...]

    def step(g, h):
        off = pl.multiple_of(g * Bp, Bp)

        # Input gi: teacher-forced (precomputed) vs greedy (from previous step).
        use_tf = jnp.logical_or(g == 0, tf_ref[jnp.maximum(g - 1, 0)] != 0)
        gi = jnp.where(use_tf, gi_scr[pl.ds(off, Bp), :], ggi_scr[...])

        gh = jnp.dot(h, whh, preferred_element_type=jnp.float32)
        r = jax.nn.sigmoid(gi[:, :Hp] + gh[:, :Hp])
        z = jax.nn.sigmoid(gi[:, Hp:2 * Hp] + gh[:, Hp:2 * Hp])
        n = jnp.tanh(gi[:, 2 * Hp:] + r * (gh[:, 2 * Hp:] + bhn))
        h_new = (1.0 - z) * n + z * h

        logits = jnp.dot(h_new, wfc, preferred_element_type=jnp.float32) + bfc
        out_ref[pl.ds(off, Bp), :] = logits

        # Greedy feedback (first-max argmax -> one-hot -> onehot @ emb_fused),
        # only when the NEXT step actually consumes it. Padded vocab columns
        # carry a -1e9 bias so they can never win the argmax.
        @pl.when(jnp.logical_and(g + 1 < Tm1, tf_ref[g] == 0))
        def _():
            lane = jax.lax.broadcasted_iota(jnp.int32, logits.shape, 1)
            m = jnp.max(logits, axis=-1, keepdims=True)
            idx = jnp.min(jnp.where(logits == m, lane, Vp), axis=-1,
                          keepdims=True)
            onehot = (lane == idx).astype(jnp.float32)
            ggi_scr[...] = (jnp.dot(onehot, embf_ref[...],
                                    preferred_element_type=jnp.float32) + bgi)

        return h_new

    jax.lax.fori_loop(0, Tm1, step, h0_ref[...], unroll=True)


# ---------------------------------------------------------------------------
# pallas_call wrappers (grid=(1,), everything resident in VMEM)
# ---------------------------------------------------------------------------

_VMEM_LIMIT = 32 * 1024 * 1024


def gru_encoder(x_flat, wih, whh, bgi, bhn, Bp):
    SB, Ep = x_flat.shape
    Hp = whh.shape[0]
    return pl.pallas_call(
        encoder_kernel,
        out_shape=jax.ShapeDtypeStruct((Bp, Hp), jnp.float32),
        grid_spec=pltpu.PrefetchScalarGridSpec(
            num_scalar_prefetch=0,
            grid=(1,),
            in_specs=[
                pl.BlockSpec((SB, Ep), lambda i: (0, 0)),
                pl.BlockSpec((Ep, 3 * Hp), lambda i: (0, 0)),
                pl.BlockSpec((Hp, 3 * Hp), lambda i: (0, 0)),
                pl.BlockSpec((1, 3 * Hp), lambda i: (0, 0)),
                pl.BlockSpec((1, Hp), lambda i: (0, 0)),
            ],
            out_specs=pl.BlockSpec((Bp, Hp), lambda i: (0, 0)),
            scratch_shapes=[pltpu.VMEM((SB, 3 * Hp), jnp.float32)],
        ),
        compiler_params=pltpu.CompilerParams(
            dimension_semantics=("arbitrary",),
            vmem_limit_bytes=_VMEM_LIMIT),
    )(x_flat, wih, whh, bgi, bhn)


def gru_decoder(tf_mask, tfx_flat, h0, wih, whh, bgi, bhn, wfc, bfc, embf):
    TB, Ep = tfx_flat.shape
    Bp, Hp = h0.shape
    Vp = wfc.shape[1]
    return pl.pallas_call(
        decoder_kernel,
        out_shape=jax.ShapeDtypeStruct((TB, Vp), jnp.float32),
        grid_spec=pltpu.PrefetchScalarGridSpec(
            num_scalar_prefetch=1,   # teacher-forcing mask -> SMEM
            grid=(1,),
            in_specs=[
                pl.BlockSpec((TB, Ep), lambda i, tf: (0, 0)),
                pl.BlockSpec((Bp, Hp), lambda i, tf: (0, 0)),
                pl.BlockSpec((Ep, 3 * Hp), lambda i, tf: (0, 0)),
                pl.BlockSpec((Hp, 3 * Hp), lambda i, tf: (0, 0)),
                pl.BlockSpec((1, 3 * Hp), lambda i, tf: (0, 0)),
                pl.BlockSpec((1, Hp), lambda i, tf: (0, 0)),
                pl.BlockSpec((Hp, Vp), lambda i, tf: (0, 0)),
                pl.BlockSpec((1, Vp), lambda i, tf: (0, 0)),
                pl.BlockSpec((Vp, 3 * Hp), lambda i, tf: (0, 0)),
            ],
            out_specs=pl.BlockSpec((TB, Vp), lambda i, tf: (0, 0)),
            scratch_shapes=[
                pltpu.VMEM((TB, 3 * Hp), jnp.float32),   # teacher-forced gi
                pltpu.VMEM((Bp, 3 * Hp), jnp.float32),   # greedy gi carry
            ],
        ),
        compiler_params=pltpu.CompilerParams(
            dimension_semantics=("arbitrary",),
            vmem_limit_bytes=_VMEM_LIMIT),
    )(tf_mask, tfx_flat, h0, wih, whh, bgi, bhn, wfc, bfc, embf)


# ---------------------------------------------------------------------------
# Seq2Seq forward (mirrors the PyTorch module)
# ---------------------------------------------------------------------------

@jax.jit
def _seq2seq_forward_jit(params, src, tgt, tf_mask):
    B, S = src.shape
    _, T = tgt.shape
    E = params["enc_emb"].shape[1]
    V = params["dec_wfc"].shape[1]
    H = params["enc_whh"].shape[0]

    Bp = _round_up(max(B, _SUBLANE), _SUBLANE)
    Ep = _round_up(E, _LANE)
    Hp = _round_up(H, _LANE)
    Vp = _round_up(V, _LANE)

    # ---- pad parameters to tile-aligned shapes (zero pad keeps GRU math exact) ----
    enc_wih = _pad_gru_weight(params["enc_wih"], Ep, Hp)
    enc_whh = _pad_gru_weight(params["enc_whh"], Hp, Hp)
    enc_bgi, enc_bhn = _fold_biases(_pad_gru_bias(params["enc_bih"], Hp),
                                    _pad_gru_bias(params["enc_bhh"], Hp), Hp)

    dec_wih = _pad_gru_weight(params["dec_wih"], Ep, Hp)
    dec_whh = _pad_gru_weight(params["dec_whh"], Hp, Hp)
    dec_bgi, dec_bhn = _fold_biases(_pad_gru_bias(params["dec_bih"], Hp),
                                    _pad_gru_bias(params["dec_bhh"], Hp), Hp)

    dec_wfc = _pad_axis(_pad_axis(params["dec_wfc"], 0, Hp), 1, Vp)
    dec_bfc = _pad_axis(params["dec_bfc"], 1, Vp, value=-1e9)  # pad vocab never wins argmax
    dec_emb_p = _pad_axis(_pad_axis(params["dec_emb"], 0, Vp), 1, Ep)
    # Fused greedy path: one-hot @ (emb @ W_ih) lands straight in gi space.
    emb_fused = jnp.dot(dec_emb_p, dec_wih, preferred_element_type=jnp.float32)

    # ---- encoder: embed whole source, run full recurrence in one kernel ----
    enc_x = jnp.take(params["enc_emb"], src, axis=0)              # (B, S, E)
    enc_x = _pad_axis(_pad_axis(enc_x, 0, Bp), 2, Ep)
    enc_x = jnp.transpose(enc_x, (1, 0, 2)).reshape(S * Bp, Ep)   # (S*Bp, Ep)
    hidden = gru_encoder(enc_x, enc_wih, enc_whh, enc_bgi, enc_bhn, Bp)  # (Bp, Hp)

    # ---- decoder: teacher-forced embeddings for steps 0..T-2, time-major flat ----
    tf_x = jnp.take(params["dec_emb"], tgt[:, :T - 1], axis=0)    # (B, T-1, E)
    tf_x = _pad_axis(_pad_axis(tf_x, 0, Bp), 2, Ep)
    tf_x = jnp.transpose(tf_x, (1, 0, 2)).reshape((T - 1) * Bp, Ep)

    out_flat = gru_decoder(tf_mask, tf_x, hidden,
                           dec_wih, dec_whh, dec_bgi, dec_bhn,
                           dec_wfc, dec_bfc, emb_fused)           # ((T-1)*Bp, Vp)
    logits = out_flat.reshape(T - 1, Bp, Vp)
    logits = jnp.transpose(logits, (1, 0, 2))[:B, :, :V]          # (B, T-1, V)
    outputs = jnp.concatenate(
        [jnp.zeros((B, 1, V), jnp.float32), logits], axis=1)      # (B, T, V)
    return outputs


def seq2seq_forward(params, src, tgt, teacher_forcing_ratio=0.5, seed=0):
    # TODO(synk): PyTorch consults Python's global random.random() per step; here
    # the per-step teacher-forcing decisions are precomputed deterministically
    # (random.Random(seed)) and passed to the kernel as data.
    T = int(tgt.shape[1])
    rng = random.Random(seed)
    decisions = [1 if rng.random() < teacher_forcing_ratio else 0
                 for _ in range(max(T - 1, 1))]
    tf_mask = jnp.asarray(decisions, dtype=jnp.int32)
    return _seq2seq_forward_jit(params, src, tgt, tf_mask)


# ---------------------------------------------------------------------------
# Deterministic parameter init (shapes implied by the module __init__)
# ---------------------------------------------------------------------------

def init_params(key, eng_vocab, nl_vocab, emb_dim, hidden_dim):
    ks = jax.random.split(key, 12)
    scale = 0.1

    def nrm(k, shape):
        return (scale * jax.random.normal(k, shape)).astype(jnp.float32)

    enc_emb = nrm(ks[0], (eng_vocab, emb_dim)).at[0].set(0.0)   # padding_idx=0
    dec_emb = nrm(ks[1], (nl_vocab, emb_dim)).at[0].set(0.0)    # padding_idx=0
    return {
        "enc_emb": enc_emb,
        "enc_wih": nrm(ks[2], (emb_dim, 3 * hidden_dim)),
        "enc_whh": nrm(ks[3], (hidden_dim, 3 * hidden_dim)),
        "enc_bih": nrm(ks[4], (1, 3 * hidden_dim)),
        "enc_bhh": nrm(ks[5], (1, 3 * hidden_dim)),
        "dec_emb": dec_emb,
        "dec_wih": nrm(ks[6], (emb_dim, 3 * hidden_dim)),
        "dec_whh": nrm(ks[7], (hidden_dim, 3 * hidden_dim)),
        "dec_bih": nrm(ks[8], (1, 3 * hidden_dim)),
        "dec_bhh": nrm(ks[9], (1, 3 * hidden_dim)),
        "dec_wfc": nrm(ks[10], (hidden_dim, nl_vocab)),
        "dec_bfc": nrm(ks[11], (1, nl_vocab)),
    }


if __name__ == "__main__":
    # Small shapes consistent with the module's forward.
    batch = 2
    src_len = 8
    tgt_len = 8
    eng_vocab = 32     # encoder vocab
    nl_vocab = 40      # decoder vocab (fc.out_features)
    emb_dim = 32
    hidden_dim = 64

    key = jax.random.PRNGKey(0)
    k_par, k_src, k_tgt = jax.random.split(key, 3)

    params = init_params(k_par, eng_vocab, nl_vocab, emb_dim, hidden_dim)
    src = jax.random.randint(k_src, (batch, src_len), 0, eng_vocab, dtype=jnp.int32)
    tgt = jax.random.randint(k_tgt, (batch, tgt_len), 0, nl_vocab, dtype=jnp.int32)

    outputs = seq2seq_forward(params, src, tgt, teacher_forcing_ratio=0.5)
    outputs = jax.block_until_ready(outputs)

    assert outputs.shape == (batch, tgt_len, nl_vocab)
    assert outputs.dtype == jnp.float32
    assert bool(jnp.all(outputs[:, 0] == 0.0))          # t=0 row never written
    assert bool(jnp.all(jnp.isfinite(outputs)))
    print("KERNEL_OK")
</pallas_src>

<mosaic_0001>
module attributes {stable_mosaic.version = 11 : i64} {
  func.func @encoder_kernel(%arg0: i32, %arg1: memref<64x128xf32, #tpu.memory_space<vmem>>, %arg2: memref<128x384xf32, #tpu.memory_space<vmem>>, %arg3: memref<128x384xf32, #tpu.memory_space<vmem>>, %arg4: memref<1x384xf32, #tpu.memory_space<vmem>>, %arg5: memref<1x128xf32, #tpu.memory_space<vmem>>, %arg6: memref<8x128xf32, #tpu.memory_space<vmem>>, %arg7: memref<64x384xf32, #tpu.memory_space<vmem>>) attributes {dimension_semantics = [#tpu.dimension_semantics<arbitrary>], iteration_bounds = array<i64: 1>, scalar_prefetch = 0 : i64, scratch_operands = 1 : i64, tpu.core_type = #tpu.core_type<tc>, window_params = [{pipeline_mode = #tpu.pipeline_mode<synchronous>, transform_indices = @transform_0, window_bounds = array<i64: 64, 128>}, {pipeline_mode = #tpu.pipeline_mode<synchronous>, transform_indices = @transform_1, window_bounds = array<i64: 128, 384>}, {pipeline_mode = #tpu.pipeline_mode<synchronous>, transform_indices = @transform_2, window_bounds = array<i64: 128, 384>}, {pipeline_mode = #tpu.pipeline_mode<synchronous>, transform_indices = @transform_3, window_bounds = array<i64: 1, 384>}, {pipeline_mode = #tpu.pipeline_mode<synchronous>, transform_indices = @transform_4, window_bounds = array<i64: 1, 128>}, {pipeline_mode = #tpu.pipeline_mode<synchronous>, transform_indices = @transform_5, window_bounds = array<i64: 8, 128>}]} {
    %c0 = arith.constant 0 : index
    %c0_0 = arith.constant 0 : index
    %0 = vector.load %arg1[%c0, %c0_0] : memref<64x128xf32, #tpu.memory_space<vmem>>, vector<64x128xf32>
    %c0_1 = arith.constant 0 : index
    %c0_2 = arith.constant 0 : index
    %1 = vector.load %arg2[%c0_1, %c0_2] : memref<128x384xf32, #tpu.memory_space<vmem>>, vector<128x384xf32>
    %cst = arith.constant dense<0.000000e+00> : vector<64x384xf32>
    %2 = tpu.matmul %0, %1, %cst {dimension_numbers = #tpu.dot_dimension_numbers<[1], [0], [0], [1], [0, 0, 1, 1], [], []>} : vector<64x128xf32>, vector<128x384xf32>, vector<64x384xf32> -> vector<64x384xf32>
    %c0_3 = arith.constant 0 : index
    %c0_4 = arith.constant 0 : index
    %3 = vector.load %arg4[%c0_3, %c0_4] : memref<1x384xf32, #tpu.memory_space<vmem>>, vector<1x384xf32>
    %4 = vector.broadcast %3 : vector<1x384xf32> to vector<64x384xf32>
    %5 = arith.addf %2, %4 : vector<64x384xf32>
    %c0_5 = arith.constant 0 : index
    %c0_6 = arith.constant 0 : index
    %6 = vector.load %arg7[%c0_5, %c0_6] : memref<64x384xf32, #tpu.memory_space<vmem>>, vector<64x384xf32>
    tpu.vector_store %arg7[%c0_5, %c0_6], %5 {strides = array<i32>} : memref<64x384xf32, #tpu.memory_space<vmem>>, vector<64x384xf32>,
    %c0_7 = arith.constant 0 : index
    %c0_8 = arith.constant 0 : index
    %7 = vector.load %arg3[%c0_7, %c0_8] : memref<128x384xf32, #tpu.memory_space<vmem>>, vector<128x384xf32>
    %c0_9 = arith.constant 0 : index
    %c0_10 = arith.constant 0 : index
    %8 = vector.load %arg5[%c0_9, %c0_10] : memref<1x128xf32, #tpu.memory_space<vmem>>, vector<1x128xf32>
    %cst_11 = arith.constant 0.000000e+00 : f32
    %9 = vector.broadcast %cst_11 : f32 to vector<8x128xf32>
    %c0_i32 = arith.constant 0 : i32
    %c8_i32 = arith.constant 8 : i32
    %10 = arith.muli %c0_i32, %c8_i32 : i32
    %11 = tpu.assume_multiple %10, 8 : i32
    %12 = arith.index_cast %11 : i32 to index
    %c0_12 = arith.constant 0 : index
    %13 = vector.load %arg7[%12, %c0_12] : memref<64x384xf32, #tpu.memory_space<vmem>>, vector<8x384xf32>
    %cst_13 = arith.constant dense<0.000000e+00> : vector<8x384xf32>
    %14 = tpu.matmul %9, %7, %cst_13 {dimension_numbers = #tpu.dot_dimension_numbers<[1], [0], [0], [1], [0, 0, 1, 1], [], []>} : vector<8x128xf32>, vector<128x384xf32>, vector<8x384xf32> -> vector<8x384xf32>
    %15 = vector.extract_strided_slice %13 {offsets = [0, 0], sizes = [8, 128], strides = [1, 1]} : vector<8x384xf32> to vector<8x128xf32>
    %16 = vector.extract_strided_slice %14 {offsets = [0, 0], sizes = [8, 128], strides = [1, 1]} : vector<8x384xf32> to vector<8x128xf32>
    %17 = arith.addf %15, %16 : vector<8x128xf32>
    %18 = arith.negf %17 : vector<8x128xf32>
    %19 = math.exp %18 : vector<8x128xf32>
    %cst_14 = arith.constant 1.000000e+00 : f32
    %20 = vector.broadcast %cst_14 : f32 to vector<8x128xf32>
    %21 = arith.addf %20, %19 : vector<8x128xf32>
    %22 = arith.divf %20, %21 : vector<8x128xf32>
    %23 = vector.extract_strided_slice %13 {offsets = [0, 128], sizes = [8, 128], strides = [1, 1]} : vector<8x384xf32> to vector<8x128xf32>
    %24 = vector.extract_strided_slice %14 {offsets = [0, 128], sizes = [8, 128], strides = [1, 1]} : vector<8x384xf32> to vector<8x128xf32>
    %25 = arith.addf %23, %24 : vector<8x128xf32>
    %26 = arith.negf %25 : vector<8x128xf32>
    %27 = math.exp %26 : vector<8x128xf32>
    %cst_15 = arith.constant 1.000000e+00 : f32
    %28 = vector.broadcast %cst_15 : f32 to vector<8x128xf32>
    %29 = arith.addf %28, %27 : vector<8x128xf32>
    %30 = arith.divf %28, %29 : vector<8x128xf32>
    %31 = vector.extract_strided_slice %13 {offsets = [0, 256], sizes = [8, 128], strides = [1, 1]} : vector<8x384xf32> to vector<8x128xf32>
    %32 = vector.extract_strided_slice %14 {offsets = [0, 256], sizes = [8, 128], strides = [1, 1]} : vector<8x384xf32> to vector<8x128xf32>
    %33 = vector.broadcast %8 : vector<1x128xf32> to vector<8x128xf32>
    %34 = arith.addf %32, %33 : vector<8x128xf32>
    %35 = arith.mulf %22, %34 : vector<8x128xf32>
    %36 = arith.addf %31, %35 : vector<8x128xf32>
    %37 = math.tanh %36 : vector<8x128xf32>
    %cst_16 = arith.constant 1.000000e+00 : f32
    %38 = vector.broadcast %cst_16 : f32 to vector<8x128xf32>
    %39 = arith.subf %38, %30 : vector<8x128xf32>
    %40 = arith.mulf %39, %37 : vector<8x128xf32>
    %41 = arith.mulf %30, %9 : vector<8x128xf32>
    %42 = arith.addf %40, %41 : vector<8x128xf32>
    %c1_i32 = arith.constant 1 : i32
    %c8_i32_17 = arith.constant 8 : i32
    %43 = arith.muli %c1_i32, %c8_i32_17 : i32
    %44 = tpu.assume_multiple %43, 8 : i32
    %45 = arith.index_cast %44 : i32 to index
    %c0_18 = arith.constant 0 : index
    %46 = vector.load %arg7[%45, %c0_18] : memref<64x384xf32, #tpu.memory_space<vmem>>, vector<8x384xf32>
    %cst_19 = arith.constant dense<0.000000e+00> : vector<8x384xf32>
    %47 = tpu.matmul %42, %7, %cst_19 {dimension_numbers = #tpu.dot_dimension_numbers<[1], [0], [0], [1], [0, 0, 1, 1], [], []>} : vector<8x128xf32>, vector<128x384xf32>, vector<8x384xf32> -> vector<8x384xf32>
    %48 = vector.extract_strided_slice %46 {offsets = [0, 0], sizes = [8, 128], strides = [1, 1]} : vector<8x384xf32> to vector<8x128xf32>
    %49 = vector.extract_strided_slice %47 {offsets = [0, 0], sizes = [8, 128], strides = [1, 1]} : vector<8x384xf32> to vector<8x128xf32>
    %50 = arith.addf %48, %49 : vector<8x128xf32>
    %51 = arith.negf %50 : vector<8x128xf32>
    %52 = math.exp %51 : vector<8x128xf32>
    %cst_20 = arith.constant 1.000000e+00 : f32
    %53 = vector.broadcast %cst_20 : f32 to vector<8x128xf32>
    %54 = arith.addf %53, %52 : vector<8x128xf32>
    %55 = arith.divf %53, %54 : vector<8x128xf32>
    %56 = vector.extract_strided_slice %46 {offsets = [0, 128], sizes = [8, 128], strides = [1, 1]} : vector<8x384xf32> to vector<8x128xf32>
    %57 = vector.extract_strided_slice %47 {offsets = [0, 128], sizes = [8, 128], strides = [1, 1]} : vector<8x384xf32> to vector<8x128xf32>
    %58 = arith.addf %56, %57 : vector<8x128xf32>
    %59 = arith.negf %58 : vector<8x128xf32>
    %60 = math.exp %59 : vector<8x128xf32>
    %cst_21 = arith.constant 1.000000e+00 : f32
    %61 = vector.broadcast %cst_21 : f32 to vector<8x128xf32>
    %62 = arith.addf %61, %60 : vector<8x128xf32>
    %63 = arith.divf %61, %62 : vector<8x128xf32>
    %64 = vector.extract_strided_slice %46 {offsets = [0, 256], sizes = [8, 128], strides = [1, 1]} : vector<8x384xf32> to vector<8x128xf32>
    %65 = vector.extract_strided_slice %47 {offsets = [0, 256], sizes = [8, 128], strides = [1, 1]} : vector<8x384xf32> to vector<8x128xf32>
    %66 = vector.broadcast %8 : vector<1x128xf32> to vector<8x128xf32>
    %67 = arith.addf %65, %66 : vector<8x128xf32>
    %68 = arith.mulf %55, %67 : vector<8x128xf32>
    %69 = arith.addf %64, %68 : vector<8x128xf32>
    %70 = math.tanh %69 : vector<8x128xf32>
    %cst_22 = arith.constant 1.000000e+00 : f32
    %71 = vector.broadcast %cst_22 : f32 to vector<8x128xf32>
    %72 = arith.subf %71, %63 : vector<8x128xf32>
    %73 = arith.mulf %72, %70 : vector<8x128xf32>
    %74 = arith.mulf %63, %42 : vector<8x128xf32>
    %75 = arith.addf %73, %74 : vector<8x128xf32>
    %c2_i32 = arith.constant 2 : i32
    %c8_i32_23 = arith.constant 8 : i32
    %76 = arith.muli %c2_i32, %c8_i32_23 : i32
    %77 = tpu.assume_multiple %76, 8 : i32
    %78 = arith.index_cast %77 : i32 to index
    %c0_24 = arith.constant 0 : index
    %79 = vector.load %arg7[%78, %c0_24] : memref<64x384xf32, #tpu.memory_space<vmem>>, vector<8x384xf32>
    %cst_25 = arith.constant dense<0.000000e+00> : vector<8x384xf32>
    %80 = tpu.matmul %75, %7, %cst_25 {dimension_numbers = #tpu.dot_dimension_numbers<[1], [0], [0], [1], [0, 0, 1, 1], [], []>} : vector<8x128xf32>, vector<128x384xf32>, vector<8x384xf32> -> vector<8x384xf32>
    %81 = vector.extract_strided_slice %79 {offsets = [0, 0], sizes = [8, 128], strides = [1, 1]} : vector<8x384xf32> to vector<8x128xf32>
    %82 = vector.extract_strided_slice %80 {offsets = [0, 0], sizes = [8, 128], strides = [1, 1]} : vector<8x384xf32> to vector<8x128xf32>
    %83 = arith.addf %81, %82 : vector<8x128xf32>
    %84 = arith.negf %83 : vector<8x128xf32>
    %85 = math.exp %84 : vector<8x128xf32>
    %cst_26 = arith.constant 1.000000e+00 : f32
    %86 = vector.broadcast %cst_26 : f32 to vector<8x128xf32>
    %87 = arith.addf %86, %85 : vector<8x128xf32>
    %88 = arith.divf %86, %87 : vector<8x128xf32>
    %89 = vector.extract_strided_slice %79 {offsets = [0, 128], sizes = [8, 128], strides = [1, 1]} : vector<8x384xf32> to vector<8x128xf32>
    %90 = vector.extract_strided_slice %80 {offsets = [0, 128], sizes = [8, 128], strides = [1, 1]} : vector<8x384xf32> to vector<8x128xf32>
    %91 = arith.addf %89, %90 : vector<8x128xf32>
    %92 = arith.negf %91 : vector<8x128xf32>
    %93 = math.exp %92 : vector<8x128xf32>
    %cst_27 = arith.constant 1.000000e+00 : f32
    %94 = vector.broadcast %cst_27 : f32 to vector<8x128xf32>
    %95 = arith.addf %94, %93 : vector<8x128xf32>
    %96 = arith.divf %94, %95 : vector<8x128xf32>
    %97 = vector.extract_strided_slice %79 {offsets = [0, 256], sizes = [8, 128], strides = [1, 1]} : vector<8x384xf32> to vector<8x128xf32>
    %98 = vector.extract_strided_slice %80 {offsets = [0, 256], sizes = [8, 128], strides = [1, 1]} : vector<8x384xf32> to vector<8x128xf32>
    %99 = vector.broadcast %8 : vector<1x128xf32> to vector<8x128xf32>
    %100 = arith.addf %98, %99 : vector<8x128xf32>
    %101 = arith.mulf %88, %100 : vector<8x128xf32>
    %102 = arith.addf %97, %101 : vector<8x128xf32>
    %103 = math.tanh %102 : vector<8x128xf32>
    %cst_28 = arith.constant 1.000000e+00 : f32
    %104 = vector.broadcast %cst_28 : f32 to vector<8x128xf32>
    %105 = arith.subf %104, %96 : vector<8x128xf32>
    %106 = arith.mulf %105, %103 : vector<8x128xf32>
    %107 = arith.mulf %96, %75 : vector<8x128xf32>
    %108 = arith.addf %106, %107 : vector<8x128xf32>
    %c3_i32 = arith.constant 3 : i32
    %c8_i32_29 = arith.constant 8 : i32
    %109 = arith.muli %c3_i32, %c8_i32_29 : i32
    %110 = tpu.assume_multiple %109, 8 : i32
    %111 = arith.index_cast %110 : i32 to index
    %c0_30 = arith.constant 0 : index
    %112 = vector.load %arg7[%111, %c0_30] : memref<64x384xf32, #tpu.memory_space<vmem>>, vector<8x384xf32>
    %cst_31 = arith.constant dense<0.000000e+00> : vector<8x384xf32>
    %113 = tpu.matmul %108, %7, %cst_31 {dimension_numbers = #tpu.dot_dimension_numbers<[1], [0], [0], [1], [0, 0, 1, 1], [], []>} : vector<8x128xf32>, vector<128x384xf32>, vector<8x384xf32> -> vector<8x384xf32>
    %114 = vector.extract_strided_slice %112 {offsets = [0, 0], sizes = [8, 128], strides = [1, 1]} : vector<8x384xf32> to vector<8x128xf32>
    %115 = vector.extract_strided_slice %113 {offsets = [0, 0], sizes = [8, 128], strides = [1, 1]} : vector<8x384xf32> to vector<8x128xf32>
    %116 = arith.addf %114, %115 : vector<8x128xf32>
    %117 = arith.negf %116 : vector<8x128xf32>
    %118 = math.exp %117 : vector<8x128xf32>
    %cst_32 = arith.constant 1.000000e+00 : f32
    %119 = vector.broadcast %cst_32 : f32 to vector<8x128xf32>
    %120 = arith.addf %119, %118 : vector<8x128xf32>
    %121 = arith.divf %119, %120 : vector<8x128xf32>
    %122 = vector.extract_strided_slice %112 {offsets = [0, 128], sizes = [8, 128], strides = [1, 1]} : vector<8x384xf32> to vector<8x128xf32>
    %123 = vector.extract_strided_slice %113 {offsets = [0, 128], sizes = [8, 128], strides = [1, 1]} : vector<8x384xf32> to vector<8x128xf32>
    %124 = arith.addf %122, %123 : vector<8x128xf32>
    %125 = arith.negf %124 : vector<8x128xf32>
    %126 = math.exp %125 : vector<8x128xf32>
    %cst_33 = arith.constant 1.000000e+00 : f32
    %127 = vector.broadcast %cst_33 : f32 to vector<8x128xf32>
    %128 = arith.addf %127, %126 : vector<8x128xf32>
    %129 = arith.divf %127, %128 : vector<8x128xf32>
    %130 = vector.extract_strided_slice %112 {offsets = [0, 256], sizes = [8, 128], strides = [1, 1]} : vector<8x384xf32> to vector<8x128xf32>
    %131 = vector.extract_strided_slice %113 {offsets = [0, 256], sizes = [8, 128], strides = [1, 1]} : vector<8x384xf32> to vector<8x128xf32>
    %132 = vector.broadcast %8 : vector<1x128xf32> to vector<8x128xf32>
    %133 = arith.addf %131, %132 : vector<8x128xf32>
    %134 = arith.mulf %121, %133 : vector<8x128xf32>
    %135 = arith.addf %130, %134 : vector<8x128xf32>
    %136 = math.tanh %135 : vector<8x128xf32>
    %cst_34 = arith.constant 1.000000e+00 : f32
    %137 = vector.broadcast %cst_34 : f32 to vector<8x128xf32>
    %138 = arith.subf %137, %129 : vector<8x128xf32>
    %139 = arith.mulf %138, %136 : vector<8x128xf32>
    %140 = arith.mulf %129, %108 : vector<8x128xf32>
    %141 = arith.addf %139, %140 : vector<8x128xf32>
    %c4_i32 = arith.constant 4 : i32
    %c8_i32_35 = arith.constant 8 : i32
    %142 = arith.muli %c4_i32, %c8_i32_35 : i32
    %143 = tpu.assume_multiple %142, 8 : i32
    %144 = arith.index_cast %143 : i32 to index
    %c0_36 = arith.constant 0 : index
    %145 = vector.load %arg7[%144, %c0_36] : memref<64x384xf32, #tpu.memory_space<vmem>>, vector<8x384xf32>
    %cst_37 = arith.constant dense<0.000000e+00> : vector<8x384xf32>
    %146 = tpu.matmul %141, %7, %cst_37 {dimension_numbers = #tpu.dot_dimension_numbers<[1], [0], [0], [1], [0, 0, 1, 1], [], []>} : vector<8x128xf32>, vector<128x384xf32>, vector<8x384xf32> -> vector<8x384xf32>
    %147 = vector.extract_strided_slice %145 {offsets = [0, 0], sizes = [8, 128], strides = [1, 1]} : vector<8x384xf32> to vector<8x128xf32>
    %148 = vector.extract_strided_slice %146 {offsets = [0, 0], sizes = [8, 128], strides = [1, 1]} : vector<8x384xf32> to vector<8x128xf32>
    %149 = arith.addf %147, %148 : vector<8x128xf32>
    %150 = arith.negf %149 : vector<8x128xf32>
    %151 = math.exp %150 : vector<8x128xf32>
    %cst_38 = arith.constant 1.000000e+00 : f32
    %152 = vector.broadcast %cst_38 : f32 to vector<8x128xf32>
    %153 = arith.addf %152, %151 : vector<8x128xf32>
    %154 = arith.divf %152, %153 : vector<8x128xf32>
    %155 = vector.extract_strided_slice %145 {offsets = [0, 128], sizes = [8, 128], strides = [1, 1]} : vector<8x384xf32> to vector<8x128xf32>
    %156 = vector.extract_strided_slice %146 {offsets = [0, 128], sizes = [8, 128], strides = [1, 1]} : vector<8x384xf32> to vector<8x128xf32>
    %157 = arith.addf %155, %156 : vector<8x128xf32>
    %158 = arith.negf %157 : vector<8x128xf32>
    %159 = math.exp %158 : vector<8x128xf32>
    %cst_39 = arith.constant 1.000000e+00 : f32
    %160 = vector.broadcast %cst_39 : f32 to vector<8x128xf32>
    %161 = arith.addf %160, %159 : vector<8x128xf32>
    %162 = arith.divf %160, %161 : vector<8x128xf32>
    %163 = vector.extract_strided_slice %145 {offsets = [0, 256], sizes = [8, 128], strides = [1, 1]} : vector<8x384xf32> to vector<8x128xf32>
    %164 = vector.extract_strided_slice %146 {offsets = [0, 256], sizes = [8, 128], strides = [1, 1]} : vector<8x384xf32> to vector<8x128xf32>
    %165 = vector.broadcast %8 : vector<1x128xf32> to vector<8x128xf32>
    %166 = arith.addf %164, %165 : vector<8x128xf32>
    %167 = arith.mulf %154, %166 : vector<8x128xf32>
    %168 = arith.addf %163, %167 : vector<8x128xf32>
    %169 = math.tanh %168 : vector<8x128xf32>
    %cst_40 = arith.constant 1.000000e+00 : f32
    %170 = vector.broadcast %cst_40 : f32 to vector<8x128xf32>
    %171 = arith.subf %170, %162 : vector<8x128xf32>
    %172 = arith.mulf %171, %169 : vector<8x128xf32>
    %173 = arith.mulf %162, %141 : vector<8x128xf32>
    %174 = arith.addf %172, %173 : vector<8x128xf32>
    %c5_i32 = arith.constant 5 : i32
    %c8_i32_41 = arith.constant 8 : i32
    %175 = arith.muli %c5_i32, %c8_i32_41 : i32
    %176 = tpu.assume_multiple %175, 8 : i32
    %177 = arith.index_cast %176 : i32 to index
    %c0_42 = arith.constant 0 : index
    %178 = vector.load %arg7[%177, %c0_42] : memref<64x384xf32, #tpu.memory_space<vmem>>, vector<8x384xf32>
    %cst_43 = arith.constant dense<0.000000e+00> : vector<8x384xf32>
    %179 = tpu.matmul %174, %7, %cst_43 {dimension_numbers = #tpu.dot_dimension_numbers<[1], [0], [0], [1], [0, 0, 1, 1], [], []>} : vector<8x128xf32>, vector<128x384xf32>, vector<8x384xf32> -> vector<8x384xf32>
    %180 = vector.extract_strided_slice %178 {offsets = [0, 0], sizes = [8, 128], strides = [1, 1]} : vector<8x384xf32> to vector<8x128xf32>
    %181 = vector.extract_strided_slice %179 {offsets = [0, 0], sizes = [8, 128], strides = [1, 1]} : vector<8x384xf32> to vector<8x128xf32>
    %182 = arith.addf %180, %181 : vector<8x128xf32>
    %183 = arith.negf %182 : vector<8x128xf32>
    %184 = math.exp %183 : vector<8x128xf32>
    %cst_44 = arith.constant 1.000000e+00 : f32
    %185 = vector.broadcast %cst_44 : f32 to vector<8x128xf32>
    %186 = arith.addf %185, %184 : vector<8x128xf32>
    %187 = arith.divf %185, %186 : vector<8x128xf32>
    %188 = vector.extract_strided_slice %178 {offsets = [0, 128], sizes = [8, 128], strides = [1, 1]} : vector<8x384xf32> to vector<8x128xf32>
    %189 = vector.extract_strided_slice %179 {offsets = [0, 128], sizes = [8, 128], strides = [1, 1]} : vector<8x384xf32> to vector<8x128xf32>
    %190 = arith.addf %188, %189 : vector<8x128xf32>
    %191 = arith.negf %190 : vector<8x128xf32>
    %192 = math.exp %191 : vector<8x128xf32>
    %cst_45 = arith.constant 1.000000e+00 : f32
    %193 = vector.broadcast %cst_45 : f32 to vector<8x128xf32>
    %194 = arith.addf %193, %192 : vector<8x128xf32>
    %195 = arith.divf %193, %194 : vector<8x128xf32>
    %196 = vector.extract_strided_slice %178 {offsets = [0, 256], sizes = [8, 128], strides = [1, 1]} : vector<8x384xf32> to vector<8x128xf32>
    %197 = vector.extract_strided_slice %179 {offsets = [0, 256], sizes = [8, 128], strides = [1, 1]} : vector<8x384xf32> to vector<8x128xf32>
    %198 = vector.broadcast %8 : vector<1x128xf32> to vector<8x128xf32>
    %199 = arith.addf %197, %198 : vector<8x128xf32>
    %200 = arith.mulf %187, %199 : vector<8x128xf32>
    %201 = arith.addf %196, %200 : vector<8x128xf32>
    %202 = math.tanh %201 : vector<8x128xf32>
    %cst_46 = arith.constant 1.000000e+00 : f32
    %203 = vector.broadcast %cst_46 : f32 to vector<8x128xf32>
    %204 = arith.subf %203, %195 : vector<8x128xf32>
    %205 = arith.mulf %204, %202 : vector<8x128xf32>
    %206 = arith.mulf %195, %174 : vector<8x128xf32>
    %207 = arith.addf %205, %206 : vector<8x128xf32>
    %c6_i32 = arith.constant 6 : i32
    %c8_i32_47 = arith.constant 8 : i32
    %208 = arith.muli %c6_i32, %c8_i32_47 : i32
    %209 = tpu.assume_multiple %208, 8 : i32
    %210 = arith.index_cast %209 : i32 to index
    %c0_48 = arith.constant 0 : index
    %211 = vector.load %arg7[%210, %c0_48] : memref<64x384xf32, #tpu.memory_space<vmem>>, vector<8x384xf32>
    %cst_49 = arith.constant dense<0.000000e+00> : vector<8x384xf32>
    %212 = tpu.matmul %207, %7, %cst_49 {dimension_numbers = #tpu.dot_dimension_numbers<[1], [0], [0], [1], [0, 0, 1, 1], [], []>} : vector<8x128xf32>, vector<128x384xf32>, vector<8x384xf32> -> vector<8x384xf32>
    %213 = vector.extract_strided_slice %211 {offsets = [0, 0], sizes = [8, 128], strides = [1, 1]} : vector<8x384xf32> to vector<8x128xf32>
    %214 = vector.extract_strided_slice %212 {offsets = [0, 0], sizes = [8, 128], strides = [1, 1]} : vector<8x384xf32> to vector<8x128xf32>
    %215 = arith.addf %213, %214 : vector<8x128xf32>
    %216 = arith.negf %215 : vector<8x128xf32>
    %217 = math.exp %216 : vector<8x128xf32>
    %cst_50 = arith.constant 1.000000e+00 : f32
    %218 = vector.broadcast %cst_50 : f32 to vector<8x128xf32>
    %219 = arith.addf %218, %217 : vector<8x128xf32>
    %220 = arith.divf %218, %219 : vector<8x128xf32>
    %221 = vector.extract_strided_slice %211 {offsets = [0, 128], sizes = [8, 128], strides = [1, 1]} : vector<8x384xf32> to vector<8x128xf32>
    %222 = vector.extract_strided_slice %212 {offsets = [0, 128], sizes = [8, 128], strides = [1, 1]} : vector<8x384xf32> to vector<8x128xf32>
    %223 = arith.addf %221, %222 : vector<8x128xf32>
    %224 = arith.negf %223 : vector<8x128xf32>
    %225 = math.exp %224 : vector<8x128xf32>
    %cst_51 = arith.constant 1.000000e+00 : f32
    %226 = vector.broadcast %cst_51 : f32 to vector<8x128xf32>
    %227 = arith.addf %226, %225 : vector<8x128xf32>
    %228 = arith.divf %226, %227 : vector<8x128xf32>
    %229 = vector.extract_strided_slice %211 {offsets = [0, 256], sizes = [8, 128], strides = [1, 1]} : vector<8x384xf32> to vector<8x128xf32>
    %230 = vector.extract_strided_slice %212 {offsets = [0, 256], sizes = [8, 128], strides = [1, 1]} : vector<8x384xf32> to vector<8x128xf32>
    %231 = vector.broadcast %8 : vector<1x128xf32> to vector<8x128xf32>
    %232 = arith.addf %230, %231 : vector<8x128xf32>
    %233 = arith.mulf %220, %232 : vector<8x128xf32>
    %234 = arith.addf %229, %233 : vector<8x128xf32>
    %235 = math.tanh %234 : vector<8x128xf32>
    %cst_52 = arith.constant 1.000000e+00 : f32
    %236 = vector.broadcast %cst_52 : f32 to vector<8x128xf32>
    %237 = arith.subf %236, %228 : vector<8x128xf32>
    %238 = arith.mulf %237, %235 : vector<8x128xf32>
    %239 = arith.mulf %228, %207 : vector<8x128xf32>
    %240 = arith.addf %238, %239 : vector<8x128xf32>
    %c7_i32 = arith.constant 7 : i32
    %c8_i32_53 = arith.constant 8 : i32
    %241 = arith.muli %c7_i32, %c8_i32_53 : i32
    %242 = tpu.assume_multiple %241, 8 : i32
    %243 = arith.index_cast %242 : i32 to index
    %c0_54 = arith.constant 0 : index
    %244 = vector.load %arg7[%243, %c0_54] : memref<64x384xf32, #tpu.memory_space<vmem>>, vector<8x384xf32>
    %cst_55 = arith.constant dense<0.000000e+00> : vector<8x384xf32>
    %245 = tpu.matmul %240, %7, %cst_55 {dimension_numbers = #tpu.dot_dimension_numbers<[1], [0], [0], [1], [0, 0, 1, 1], [], []>} : vector<8x128xf32>, vector<128x384xf32>, vector<8x384xf32> -> vector<8x384xf32>
    %246 = vector.extract_strided_slice %244 {offsets = [0, 0], sizes = [8, 128], strides = [1, 1]} : vector<8x384xf32> to vector<8x128xf32>
    %247 = vector.extract_strided_slice %245 {offsets = [0, 0], sizes = [8, 128], strides = [1, 1]} : vector<8x384xf32> to vector<8x128xf32>
    %248 = arith.addf %246, %247 : vector<8x128xf32>
    %249 = arith.negf %248 : vector<8x128xf32>
    %250 = math.exp %249 : vector<8x128xf32>
    %cst_56 = arith.constant 1.000000e+00 : f32
    %251 = vector.broadcast %cst_56 : f32 to vector<8x128xf32>
    %252 = arith.addf %251, %250 : vector<8x128xf32>
    %253 = arith.divf %251, %252 : vector<8x128xf32>
    %254 = vector.extract_strided_slice %244 {offsets = [0, 128], sizes = [8, 128], strides = [1, 1]} : vector<8x384xf32> to vector<8x128xf32>
    %255 = vector.extract_strided_slice %245 {offsets = [0, 128], sizes = [8, 128], strides = [1, 1]} : vector<8x384xf32> to vector<8x128xf32>
    %256 = arith.addf %254, %255 : vector<8x128xf32>
    %257 = arith.negf %256 : vector<8x128xf32>
    %258 = math.exp %257 : vector<8x128xf32>
    %cst_57 = arith.constant 1.000000e+00 : f32
    %259 = vector.broadcast %cst_57 : f32 to vector<8x128xf32>
    %260 = arith.addf %259, %258 : vector<8x128xf32>
    %261 = arith.divf %259, %260 : vector<8x128xf32>
    %262 = vector.extract_strided_slice %244 {offsets = [0, 256], sizes = [8, 128], strides = [1, 1]} : vector<8x384xf32> to vector<8x128xf32>
    %263 = vector.extract_strided_slice %245 {offsets = [0, 256], sizes = [8, 128], strides = [1, 1]} : vector<8x384xf32> to vector<8x128xf32>
    %264 = vector.broadcast %8 : vector<1x128xf32> to vector<8x128xf32>
    %265 = arith.addf %263, %264 : vector<8x128xf32>
    %266 = arith.mulf %253, %265 : vector<8x128xf32>
    %267 = arith.addf %262, %266 : vector<8x128xf32>
    %268 = math.tanh %267 : vector<8x128xf32>
    %cst_58 = arith.constant 1.000000e+00 : f32
    %269 = vector.broadcast %cst_58 : f32 to vector<8x128xf32>
    %270 = arith.subf %269, %261 : vector<8x128xf32>
    %271 = arith.mulf %270, %268 : vector<8x128xf32>
    %272 = arith.mulf %261, %240 : vector<8x128xf32>
    %273 = arith.addf %271, %272 : vector<8x128xf32>
    %c8_i32_59 = arith.constant 8 : i32
    %c0_60 = arith.constant 0 : index
    %c0_61 = arith.constant 0 : index
    %274 = vector.load %arg6[%c0_60, %c0_61] : memref<8x128xf32, #tpu.memory_space<vmem>>, vector<8x128xf32>
    tpu.vector_store %arg6[%c0_60, %c0_61], %273 {strides = array<i32>} : memref<8x128xf32, #tpu.memory_space<vmem>>, vector<8x128xf32>,
    return
  }
  func.func @transform_0(%arg0: i32) -> (i32, i32) {
    %c0_i32 = arith.constant 0 : i32
    %c0_i32_0 = arith.constant 0 : i32
    %c0_i32_1 = arith.constant 0 : i32
    return %c0_i32, %c0_i32_0 : i32, i32
  }
  func.func @transform_1(%arg0: i32) -> (i32, i32) {
    %c0_i32 = arith.constant 0 : i32
    %c0_i32_0 = arith.constant 0 : i32
    %c0_i32_1 = arith.constant 0 : i32
    return %c0_i32, %c0_i32_0 : i32, i32
  }
  func.func @transform_2(%arg0: i32) -> (i32, i32) {
    %c0_i32 = arith.constant 0 : i32
    %c0_i32_0 = arith.constant 0 : i32
    %c0_i32_1 = arith.constant 0 : i32
    return %c0_i32, %c0_i32_0 : i32, i32
  }
  func.func @transform_3(%arg0: i32) -> (i32, i32) {
    %c0_i32 = arith.constant 0 : i32
    %c0_i32_0 = arith.constant 0 : i32
    %c0_i32_1 = arith.constant 0 : i32
    return %c0_i32, %c0_i32_0 : i32, i32
  }
  func.func @transform_4(%arg0: i32) -> (i32, i32) {
    %c0_i32 = arith.constant 0 : i32
    %c0_i32_0 = arith.constant 0 : i32
    %c0_i32_1 = arith.constant 0 : i32
    return %c0_i32, %c0_i32_0 : i32, i32
  }
  func.func @transform_5(%arg0: i32) -> (i32, i32) {
    %c0_i32 = arith.constant 0 : i32
    %c0_i32_0 = arith.constant 0 : i32
    %c0_i32_1 = arith.constant 0 : i32
    return %c0_i32, %c0_i32_0 : i32, i32
  }
}

module attributes {stable_mosaic.version = 11 : i64} {
  func.func @decoder_kernel(%arg0: i32, %arg1: memref<7xi32, #tpu.memory_space<smem>>, %arg2: memref<56x128xf32, #tpu.memory_space<vmem>>, %arg3: memref<8x128xf32, #tpu.memory_space<vmem>>, %arg4: memref<128x384xf32, #tpu.memory_space<vmem>>, %arg5: memref<128x384xf32, #tpu.memory_space<vmem>>, %arg6: memref<1x384xf32, #tpu.memory_space<vmem>>, %arg7: memref<1x128xf32, #tpu.memory_space<vmem>>, %arg8: memref<128x128xf32, #tpu.memory_space<vmem>>, %arg9: memref<1x128xf32, #tpu.memory_space<vmem>>, %arg10: memref<128x384xf32, #tpu.memory_space<vmem>>, %arg11: memref<56x128xf32, #tpu.memory_space<vmem>>, %arg12: memref<56x384xf32, #tpu.memory_space<vmem>>, %arg13: memref<8x384xf32, #tpu.memory_space<vmem>>) attributes {dimension_semantics = [#tpu.dimension_semantics<arbitrary>], iteration_bounds = array<i64: 1>, scalar_prefetch = 1 : i64, scratch_operands = 2 : i64, tpu.core_type = #tpu.core_type<tc>, window_params = [{pipeline_mode = #tpu.pipeline_mode<synchronous>, transform_indices = @transform_0, window_bounds = array<i64: 56, 128>}, {pipeline_mode = #tpu.pipeline_mode<synchronous>, transform_indices = @transform_1, window_bounds = array<i64: 8, 128>}, {pipeline_mode = #tpu.pipeline_mode<synchronous>, transform_indices = @transform_2, window_bounds = array<i64: 128, 384>}, {pipeline_mode = #tpu.pipeline_mode<synchronous>, transform_indices = @transform_3, window_bounds = array<i64: 128, 384>}, {pipeline_mode = #tpu.pipeline_mode<synchronous>, transform_indices = @transform_4, window_bounds = array<i64: 1, 384>}, {pipeline_mode = #tpu.pipeline_mode<synchronous>, transform_indices = @transform_5, window_bounds = array<i64: 1, 128>}, {pipeline_mode = #tpu.pipeline_mode<synchronous>, transform_indices = @transform_6, window_bounds = array<i64: 128, 128>}, {pipeline_mode = #tpu.pipeline_mode<synchronous>, transform_indices = @transform_7, window_bounds = array<i64: 1, 128>}, {pipeline_mode = #tpu.pipeline_mode<synchronous>, transform_indices = @transform_8, window_bounds = array<i64: 128, 384>}, {pipeline_mode = #tpu.pipeline_mode<synchronous>, transform_indices = @transform_9, window_bounds = array<i64: 56, 128>}]} {
    %c0 = arith.constant 0 : index
    %c0_0 = arith.constant 0 : index
    %0 = vector.load %arg2[%c0, %c0_0] : memref<56x128xf32, #tpu.memory_space<vmem>>, vector<56x128xf32>
    %c0_1 = arith.constant 0 : index
    %c0_2 = arith.constant 0 : index
    %1 = vector.load %arg4[%c0_1, %c0_2] : memref<128x384xf32, #tpu.memory_space<vmem>>, vector<128x384xf32>
    %cst = arith.constant dense<0.000000e+00> : vector<56x384xf32>
    %2 = tpu.matmul %0, %1, %cst {dimension_numbers = #tpu.dot_dimension_numbers<[1], [0], [0], [1], [0, 0, 1, 1], [], []>} : vector<56x128xf32>, vector<128x384xf32>, vector<56x384xf32> -> vector<56x384xf32>
    %c0_3 = arith.constant 0 : index
    %c0_4 = arith.constant 0 : index
    %3 = vector.load %arg6[%c0_3, %c0_4] : memref<1x384xf32, #tpu.memory_space<vmem>>, vector<1x384xf32>
    %4 = vector.broadcast %3 : vector<1x384xf32> to vector<56x384xf32>
    %5 = arith.addf %2, %4 : vector<56x384xf32>
    %c0_5 = arith.constant 0 : index
    %c0_6 = arith.constant 0 : index
    %6 = vector.load %arg12[%c0_5, %c0_6] : memref<56x384xf32, #tpu.memory_space<vmem>>, vector<56x384xf32>
    tpu.vector_store %arg12[%c0_5, %c0_6], %5 {strides = array<i32>} : memref<56x384xf32, #tpu.memory_space<vmem>>, vector<56x384xf32>,
    %cst_7 = arith.constant 0.000000e+00 : f32
    %7 = vector.broadcast %cst_7 : f32 to vector<8x384xf32>
    %c0_8 = arith.constant 0 : index
    %c0_9 = arith.constant 0 : index
    %8 = vector.load %arg13[%c0_8, %c0_9] : memref<8x384xf32, #tpu.memory_space<vmem>>, vector<8x384xf32>
    tpu.vector_store %arg13[%c0_8, %c0_9], %7 {strides = array<i32>} : memref<8x384xf32, #tpu.memory_space<vmem>>, vector<8x384xf32>,
    %c0_10 = arith.constant 0 : index
    %c0_11 = arith.constant 0 : index
    %9 = vector.load %arg5[%c0_10, %c0_11] : memref<128x384xf32, #tpu.memory_space<vmem>>, vector<128x384xf32>
    %c0_12 = arith.constant 0 : index
    %c0_13 = arith.constant 0 : index
    %10 = vector.load %arg7[%c0_12, %c0_13] : memref<1x128xf32, #tpu.memory_space<vmem>>, vector<1x128xf32>
    %c0_14 = arith.constant 0 : index
    %c0_15 = arith.constant 0 : index
    %11 = vector.load %arg8[%c0_14, %c0_15] : memref<128x128xf32, #tpu.memory_space<vmem>>, vector<128x128xf32>
    %c0_16 = arith.constant 0 : index
    %c0_17 = arith.constant 0 : index
    %12 = vector.load %arg9[%c0_16, %c0_17] : memref<1x128xf32, #tpu.memory_space<vmem>>, vector<1x128xf32>
    %c0_18 = arith.constant 0 : index
    %c0_19 = arith.constant 0 : index
    %13 = vector.load %arg6[%c0_18, %c0_19] : memref<1x384xf32, #tpu.memory_space<vmem>>, vector<1x384xf32>
    %c0_20 = arith.constant 0 : index
    %c0_21 = arith.constant 0 : index
    %14 = vector.load %arg3[%c0_20, %c0_21] : memref<8x128xf32, #tpu.memory_space<vmem>>, vector<8x128xf32>
    %c0_i32 = arith.constant 0 : i32
    %c8_i32 = arith.constant 8 : i32
    %15 = arith.muli %c0_i32, %c8_i32 : i32
    %16 = tpu.assume_multiple %15, 8 : i32
    %c0_i32_22 = arith.constant 0 : i32
    %17 = arith.cmpi eq, %c0_i32, %c0_i32_22 : i32
    %c1_i32 = arith.constant 1 : i32
    %18 = arith.subi %c0_i32, %c1_i32 : i32
    %c0_i32_23 = arith.constant 0 : i32
    %19 = arith.maxsi %18, %c0_i32_23 : i32
    %20 = arith.index_cast %19 : i32 to index
    %21 = memref.load %arg1[%20] : memref<7xi32, #tpu.memory_space<smem>>
    %c0_i32_24 = arith.constant 0 : i32
    %22 = arith.cmpi ne, %21, %c0_i32_24 : i32
    %23 = arith.ori %17, %22 : i1
    %24 = arith.index_cast %16 : i32 to index
    %c0_25 = arith.constant 0 : index
    %25 = vector.load %arg12[%24, %c0_25] : memref<56x384xf32, #tpu.memory_space<vmem>>, vector<8x384xf32>
    %c0_26 = arith.constant 0 : index
    %c0_27 = arith.constant 0 : index
    %26 = vector.load %arg13[%c0_26, %c0_27] : memref<8x384xf32, #tpu.memory_space<vmem>>, vector<8x384xf32>
    %27 = arith.select %23, %25, %26 : vector<8x384xf32>
    %cst_28 = arith.constant dense<0.000000e+00> : vector<8x384xf32>
    %28 = tpu.matmul %14, %9, %cst_28 {dimension_numbers = #tpu.dot_dimension_numbers<[1], [0], [0], [1], [0, 0, 1, 1], [], []>} : vector<8x128xf32>, vector<128x384xf32>, vector<8x384xf32> -> vector<8x384xf32>
    %29 = vector.extract_strided_slice %27 {offsets = [0, 0], sizes = [8, 128], strides = [1, 1]} : vector<8x384xf32> to vector<8x128xf32>
    %30 = vector.extract_strided_slice %28 {offsets = [0, 0], sizes = [8, 128], strides = [1, 1]} : vector<8x384xf32> to vector<8x128xf32>
    %31 = arith.addf %29, %30 : vector<8x128xf32>
    %32 = arith.negf %31 : vector<8x128xf32>
    %33 = math.exp %32 : vector<8x128xf32>
    %cst_29 = arith.constant 1.000000e+00 : f32
    %34 = vector.broadcast %cst_29 : f32 to vector<8x128xf32>
    %35 = arith.addf %34, %33 : vector<8x128xf32>
    %36 = arith.divf %34, %35 : vector<8x128xf32>
    %37 = vector.extract_strided_slice %27 {offsets = [0, 128], sizes = [8, 128], strides = [1, 1]} : vector<8x384xf32> to vector<8x128xf32>
    %38 = vector.extract_strided_slice %28 {offsets = [0, 128], sizes = [8, 128], strides = [1, 1]} : vector<8x384xf32> to vector<8x128xf32>
    %39 = arith.addf %37, %38 : vector<8x128xf32>
    %40 = arith.negf %39 : vector<8x128xf32>
    %41 = math.exp %40 : vector<8x128xf32>
    %cst_30 = arith.constant 1.000000e+00 : f32
    %42 = vector.broadcast %cst_30 : f32 to vector<8x128xf32>
    %43 = arith.addf %42, %41 : vector<8x128xf32>
    %44 = arith.divf %42, %43 : vector<8x128xf32>
    %45 = vector.extract_strided_slice %27 {offsets = [0, 256], sizes = [8, 128], strides = [1, 1]} : vector<8x384xf32> to vector<8x128xf32>
    %46 = vector.extract_strided_slice %28 {offsets = [0, 256], sizes = [8, 128], strides = [1, 1]} : vector<8x384xf32> to vector<8x128xf32>
    %47 = vector.broadcast %10 : vector<1x128xf32> to vector<8x128xf32>
    %48 = arith.addf %46, %47 : vector<8x128xf32>
    %49 = arith.mulf %36, %48 : vector<8x128xf32>
    %50 = arith.addf %45, %49 : vector<8x128xf32>
    %51 = math.tanh %50 : vector<8x128xf32>
    %cst_31 = arith.constant 1.000000e+00 : f32
    %52 = vector.broadcast %cst_31 : f32 to vector<8x128xf32>
    %53 = arith.subf %52, %44 : vector<8x128xf32>
    %54 = arith.mulf %53, %51 : vector<8x128xf32>
    %55 = arith.mulf %44, %14 : vector<8x128xf32>
    %56 = arith.addf %54, %55 : vector<8x128xf32>
    %cst_32 = arith.constant dense<0.000000e+00> : vector<8x128xf32>
    %57 = tpu.matmul %56, %11, %cst_32 {dimension_numbers = #tpu.dot_dimension_numbers<[1], [0], [0], [1], [0, 0, 1, 1], [], []>} : vector<8x128xf32>, vector<128x128xf32>, vector<8x128xf32> -> vector<8x128xf32>
    %58 = vector.broadcast %12 : vector<1x128xf32> to vector<8x128xf32>
    %59 = arith.addf %57, %58 : vector<8x128xf32>
    %60 = arith.index_cast %16 : i32 to index
    %c0_33 = arith.constant 0 : index
    %61 = vector.load %arg11[%60, %c0_33] : memref<56x128xf32, #tpu.memory_space<vmem>>, vector<8x128xf32>
    tpu.vector_store %arg11[%60, %c0_33], %59 {strides = array<i32>} : memref<56x128xf32, #tpu.memory_space<vmem>>, vector<8x128xf32>,
    %c1_i32_34 = arith.constant 1 : i32
    %62 = arith.addi %c0_i32, %c1_i32_34 : i32
    %c7_i32 = arith.constant 7 : i32
    %63 = arith.cmpi slt, %62, %c7_i32 : i32
    %64 = arith.index_cast %c0_i32 : i32 to index
    %65 = memref.load %arg1[%64] : memref<7xi32, #tpu.memory_space<smem>>
    %c0_i32_35 = arith.constant 0 : i32
    %66 = arith.cmpi eq, %65, %c0_i32_35 : i32
    %67 = arith.andi %63, %66 : i1
    %68 = arith.extui %67 : i1 to i32
    %c0_i32_36 = arith.constant 0 : i32
    %69 = arith.cmpi ne, %68, %c0_i32_36 : i32
    scf.if %69 {
      %400 = tpu.iota {dimensions = array<i32: 1>} : vector<8x128xi32>
      %cst_147 = arith.constant dense<0xFF800000> : vector<8xf32>
      %401 = vector.multi_reduction <maximumf>, %59, %cst_147 [1] : vector<8x128xf32> to vector<8xf32>
      %402 = vector.shape_cast %401 : vector<8xf32> to vector<8x1xf32>
      %403 = vector.broadcast %402 : vector<8x1xf32> to vector<8x128xf32>
      %404 = arith.cmpf oeq, %59, %403 : vector<8x128xf32>
      %c128_i32 = arith.constant 128 : i32
      %405 = vector.broadcast %c128_i32 : i32 to vector<8x128xi32>
      %406 = arith.select %404, %400, %405 : vector<8x128xi1>, vector<8x128xi32>
      %cst_148 = arith.constant dense<2147483647> : vector<8xi32>
      %407 = vector.multi_reduction <minsi>, %406, %cst_148 [1] : vector<8x128xi32> to vector<8xi32>
      %408 = vector.shape_cast %407 : vector<8xi32> to vector<8x1xi32>
      %409 = vector.broadcast %408 : vector<8x1xi32> to vector<8x128xi32>
      %410 = arith.cmpi eq, %400, %409 : vector<8x128xi32>
      %411 = arith.extui %410 : vector<8x128xi1> to vector<8x128xi32>
      %412 = arith.sitofp %411 : vector<8x128xi32> to vector<8x128xf32>
      %c0_149 = arith.constant 0 : index
      %c0_150 = arith.constant 0 : index
      %413 = vector.load %arg10[%c0_149, %c0_150] : memref<128x384xf32, #tpu.memory_space<vmem>>, vector<128x384xf32>
      %cst_151 = arith.constant dense<0.000000e+00> : vector<8x384xf32>
      %414 = tpu.matmul %412, %413, %cst_151 {dimension_numbers = #tpu.dot_dimension_numbers<[1], [0], [0], [1], [0, 0, 1, 1], [], []>} : vector<8x128xf32>, vector<128x384xf32>, vector<8x384xf32> -> vector<8x384xf32>
      %415 = vector.broadcast %13 : vector<1x384xf32> to vector<8x384xf32>
      %416 = arith.addf %414, %415 : vector<8x384xf32>
      %c0_152 = arith.constant 0 : index
      %c0_153 = arith.constant 0 : index
      %417 = vector.load %arg13[%c0_152, %c0_153] : memref<8x384xf32, #tpu.memory_space<vmem>>, vector<8x384xf32>
      tpu.vector_store %arg13[%c0_152, %c0_153], %416 {strides = array<i32>} : memref<8x384xf32, #tpu.memory_space<vmem>>, vector<8x384xf32>,
    } else {
    }
    %c1_i32_37 = arith.constant 1 : i32
    %c8_i32_38 = arith.constant 8 : i32
    %70 = arith.muli %c1_i32_37, %c8_i32_38 : i32
    %71 = tpu.assume_multiple %70, 8 : i32
    %c0_i32_39 = arith.constant 0 : i32
    %72 = arith.cmpi eq, %c1_i32_37, %c0_i32_39 : i32
    %c1_i32_40 = arith.constant 1 : i32
    %73 = arith.subi %c1_i32_37, %c1_i32_40 : i32
    %c0_i32_41 = arith.constant 0 : i32
    %74 = arith.maxsi %73, %c0_i32_41 : i32
    %75 = arith.index_cast %74 : i32 to index
    %76 = memref.load %arg1[%75] : memref<7xi32, #tpu.memory_space<smem>>
    %c0_i32_42 = arith.constant 0 : i32
    %77 = arith.cmpi ne, %76, %c0_i32_42 : i32
    %78 = arith.ori %72, %77 : i1
    %79 = arith.index_cast %71 : i32 to index
    %c0_43 = arith.constant 0 : index
    %80 = vector.load %arg12[%79, %c0_43] : memref<56x384xf32, #tpu.memory_space<vmem>>, vector<8x384xf32>
    %c0_44 = arith.constant 0 : index
    %c0_45 = arith.constant 0 : index
    %81 = vector.load %arg13[%c0_44, %c0_45] : memref<8x384xf32, #tpu.memory_space<vmem>>, vector<8x384xf32>
    %82 = arith.select %78, %80, %81 : vector<8x384xf32>
    %cst_46 = arith.constant dense<0.000000e+00> : vector<8x384xf32>
    %83 = tpu.matmul %56, %9, %cst_46 {dimension_numbers = #tpu.dot_dimension_numbers<[1], [0], [0], [1], [0, 0, 1, 1], [], []>} : vector<8x128xf32>, vector<128x384xf32>, vector<8x384xf32> -> vector<8x384xf32>
    %84 = vector.extract_strided_slice %82 {offsets = [0, 0], sizes = [8, 128], strides = [1, 1]} : vector<8x384xf32> to vector<8x128xf32>
    %85 = vector.extract_strided_slice %83 {offsets = [0, 0], sizes = [8, 128], strides = [1, 1]} : vector<8x384xf32> to vector<8x128xf32>
    %86 = arith.addf %84, %85 : vector<8x128xf32>
    %87 = arith.negf %86 : vector<8x128xf32>
    %88 = math.exp %87 : vector<8x128xf32>
    %cst_47 = arith.constant 1.000000e+00 : f32
    %89 = vector.broadcast %cst_47 : f32 to vector<8x128xf32>
    %90 = arith.addf %89, %88 : vector<8x128xf32>
    %91 = arith.divf %89, %90 : vector<8x128xf32>
    %92 = vector.extract_strided_slice %82 {offsets = [0, 128], sizes = [8, 128], strides = [1, 1]} : vector<8x384xf32> to vector<8x128xf32>
    %93 = vector.extract_strided_slice %83 {offsets = [0, 128], sizes = [8, 128], strides = [1, 1]} : vector<8x384xf32> to vector<8x128xf32>
    %94 = arith.addf %92, %93 : vector<8x128xf32>
    %95 = arith.negf %94 : vector<8x128xf32>
    %96 = math.exp %95 : vector<8x128xf32>
    %cst_48 = arith.constant 1.000000e+00 : f32
    %97 = vector.broadcast %cst_48 : f32 to vector<8x128xf32>
    %98 = arith.addf %97, %96 : vector<8x128xf32>
    %99 = arith.divf %97, %98 : vector<8x128xf32>
    %100 = vector.extract_strided_slice %82 {offsets = [0, 256], sizes = [8, 128], strides = [1, 1]} : vector<8x384xf32> to vector<8x128xf32>
    %101 = vector.extract_strided_slice %83 {offsets = [0, 256], sizes = [8, 128], strides = [1, 1]} : vector<8x384xf32> to vector<8x128xf32>
    %102 = vector.broadcast %10 : vector<1x128xf32> to vector<8x128xf32>
    %103 = arith.addf %101, %102 : vector<8x128xf32>
    %104 = arith.mulf %91, %103 : vector<8x128xf32>
    %105 = arith.addf %100, %104 : vector<8x128xf32>
    %106 = math.tanh %105 : vector<8x128xf32>
    %cst_49 = arith.constant 1.000000e+00 : f32
    %107 = vector.broadcast %cst_49 : f32 to vector<8x128xf32>
    %108 = arith.subf %107, %99 : vector<8x128xf32>
    %109 = arith.mulf %108, %106 : vector<8x128xf32>
    %110 = arith.mulf %99, %56 : vector<8x128xf32>
    %111 = arith.addf %109, %110 : vector<8x128xf32>
    %cst_50 = arith.constant dense<0.000000e+00> : vector<8x128xf32>
    %112 = tpu.matmul %111, %11, %cst_50 {dimension_numbers = #tpu.dot_dimension_numbers<[1], [0], [0], [1], [0, 0, 1, 1], [], []>} : vector<8x128xf32>, vector<128x128xf32>, vector<8x128xf32> -> vector<8x128xf32>
    %113 = vector.broadcast %12 : vector<1x128xf32> to vector<8x128xf32>
    %114 = arith.addf %112, %113 : vector<8x128xf32>
    %115 = arith.index_cast %71 : i32 to index
    %c0_51 = arith.constant 0 : index
    %116 = vector.load %arg11[%115, %c0_51] : memref<56x128xf32, #tpu.memory_space<vmem>>, vector<8x128xf32>
    tpu.vector_store %arg11[%115, %c0_51], %114 {strides = array<i32>} : memref<56x128xf32, #tpu.memory_space<vmem>>, vector<8x128xf32>,
    %c1_i32_52 = arith.constant 1 : i32
    %117 = arith.addi %c1_i32_37, %c1_i32_52 : i32
    %c7_i32_53 = arith.constant 7 : i32
    %118 = arith.cmpi slt, %117, %c7_i32_53 : i32
    %119 = arith.index_cast %c1_i32_37 : i32 to index
    %120 = memref.load %arg1[%119] : memref<7xi32, #tpu.memory_space<smem>>
    %c0_i32_54 = arith.constant 0 : i32
    %121 = arith.cmpi eq, %120, %c0_i32_54 : i32
    %122 = arith.andi %118, %121 : i1
    %123 = arith.extui %122 : i1 to i32
    %c0_i32_55 = arith.constant 0 : i32
    %124 = arith.cmpi ne, %123, %c0_i32_55 : i32
    scf.if %124 {
      %400 = tpu.iota {dimensions = array<i32: 1>} : vector<8x128xi32>
      %cst_147 = arith.constant dense<0xFF800000> : vector<8xf32>
      %401 = vector.multi_reduction <maximumf>, %114, %cst_147 [1] : vector<8x128xf32> to vector<8xf32>
      %402 = vector.shape_cast %401 : vector<8xf32> to vector<8x1xf32>
      %403 = vector.broadcast %402 : vector<8x1xf32> to vector<8x128xf32>
      %404 = arith.cmpf oeq, %114, %403 : vector<8x128xf32>
      %c128_i32 = arith.constant 128 : i32
      %405 = vector.broadcast %c128_i32 : i32 to vector<8x128xi32>
      %406 = arith.select %404, %400, %405 : vector<8x128xi1>, vector<8x128xi32>
      %cst_148 = arith.constant dense<2147483647> : vector<8xi32>
      %407 = vector.multi_reduction <minsi>, %406, %cst_148 [1] : vector<8x128xi32> to vector<8xi32>
      %408 = vector.shape_cast %407 : vector<8xi32> to vector<8x1xi32>
      %409 = vector.broadcast %408 : vector<8x1xi32> to vector<8x128xi32>
      %410 = arith.cmpi eq, %400, %409 : vector<8x128xi32>
      %411 = arith.extui %410 : vector<8x128xi1> to vector<8x128xi32>
      %412 = arith.sitofp %411 : vector<8x128xi32> to vector<8x128xf32>
      %c0_149 = arith.constant 0 : index
      %c0_150 = arith.constant 0 : index
      %413 = vector.load %arg10[%c0_149, %c0_150] : memref<128x384xf32, #tpu.memory_space<vmem>>, vector<128x384xf32>
      %cst_151 = arith.constant dense<0.000000e+00> : vector<8x384xf32>
      %414 = tpu.matmul %412, %413, %cst_151 {dimension_numbers = #tpu.dot_dimension_numbers<[1], [0], [0], [1], [0, 0, 1, 1], [], []>} : vector<8x128xf32>, vector<128x384xf32>, vector<8x384xf32> -> vector<8x384xf32>
      %415 = vector.broadcast %13 : vector<1x384xf32> to vector<8x384xf32>
      %416 = arith.addf %414, %415 : vector<8x384xf32>
      %c0_152 = arith.constant 0 : index
      %c0_153 = arith.constant 0 : index
      %417 = vector.load %arg13[%c0_152, %c0_153] : memref<8x384xf32, #tpu.memory_space<vmem>>, vector<8x384xf32>
      tpu.vector_store %arg13[%c0_152, %c0_153], %416 {strides = array<i32>} : memref<8x384xf32, #tpu.memory_space<vmem>>, vector<8x384xf32>,
    } else {
    }
    %c2_i32 = arith.constant 2 : i32
    %c8_i32_56 = arith.constant 8 : i32
    %125 = arith.muli %c2_i32, %c8_i32_56 : i32
    %126 = tpu.assume_multiple %125, 8 : i32
    %c0_i32_57 = arith.constant 0 : i32
    %127 = arith.cmpi eq, %c2_i32, %c0_i32_57 : i32
    %c1_i32_58 = arith.constant 1 : i32
    %128 = arith.subi %c2_i32, %c1_i32_58 : i32
    %c0_i32_59 = arith.constant 0 : i32
    %129 = arith.maxsi %128, %c0_i32_59 : i32
    %130 = arith.index_cast %129 : i32 to index
    %131 = memref.load %arg1[%130] : memref<7xi32, #tpu.memory_space<smem>>
    %c0_i32_60 = arith.constant 0 : i32
    %132 = arith.cmpi ne, %131, %c0_i32_60 : i32
    %133 = arith.ori %127, %132 : i1
    %134 = arith.index_cast %126 : i32 to index
    %c0_61 = arith.constant 0 : index
    %135 = vector.load %arg12[%134, %c0_61] : memref<56x384xf32, #tpu.memory_space<vmem>>, vector<8x384xf32>
    %c0_62 = arith.constant 0 : index
    %c0_63 = arith.constant 0 : index
    %136 = vector.load %arg13[%c0_62, %c0_63] : memref<8x384xf32, #tpu.memory_space<vmem>>, vector<8x384xf32>
    %137 = arith.select %133, %135, %136 : vector<8x384xf32>
    %cst_64 = arith.constant dense<0.000000e+00> : vector<8x384xf32>
    %138 = tpu.matmul %111, %9, %cst_64 {dimension_numbers = #tpu.dot_dimension_numbers<[1], [0], [0], [1], [0, 0, 1, 1], [], []>} : vector<8x128xf32>, vector<128x384xf32>, vector<8x384xf32> -> vector<8x384xf32>
    %139 = vector.extract_strided_slice %137 {offsets = [0, 0], sizes = [8, 128], strides = [1, 1]} : vector<8x384xf32> to vector<8x128xf32>
    %140 = vector.extract_strided_slice %138 {offsets = [0, 0], sizes = [8, 128], strides = [1, 1]} : vector<8x384xf32> to vector<8x128xf32>
    %141 = arith.addf %139, %140 : vector<8x128xf32>
    %142 = arith.negf %141 : vector<8x128xf32>
    %143 = math.exp %142 : vector<8x128xf32>
    %cst_65 = arith.constant 1.000000e+00 : f32
    %144 = vector.broadcast %cst_65 : f32 to vector<8x128xf32>
    %145 = arith.addf %144, %143 : vector<8x128xf32>
    %146 = arith.divf %144, %145 : vector<8x128xf32>
    %147 = vector.extract_strided_slice %137 {offsets = [0, 128], sizes = [8, 128], strides = [1, 1]} : vector<8x384xf32> to vector<8x128xf32>
    %148 = vector.extract_strided_slice %138 {offsets = [0, 128], sizes = [8, 128], strides = [1, 1]} : vector<8x384xf32> to vector<8x128xf32>
    %149 = arith.addf %147, %148 : vector<8x128xf32>
    %150 = arith.negf %149 : vector<8x128xf32>
    %151 = math.exp %150 : vector<8x128xf32>
    %cst_66 = arith.constant 1.000000e+00 : f32
    %152 = vector.broadcast %cst_66 : f32 to vector<8x128xf32>
    %153 = arith.addf %152, %151 : vector<8x128xf32>
    %154 = arith.divf %152, %153 : vector<8x128xf32>
    %155 = vector.extract_strided_slice %137 {offsets = [0, 256], sizes = [8, 128], strides = [1, 1]} : vector<8x384xf32> to vector<8x128xf32>
    %156 = vector.extract_strided_slice %138 {offsets = [0, 256], sizes = [8, 128], strides = [1, 1]} : vector<8x384xf32> to vector<8x128xf32>
    %157 = vector.broadcast %10 : vector<1x128xf32> to vector<8x128xf32>
    %158 = arith.addf %156, %157 : vector<8x128xf32>
    %159 = arith.mulf %146, %158 : vector<8x128xf32>
    %160 = arith.addf %155, %159 : vector<8x128xf32>
    %161 = math.tanh %160 : vector<8x128xf32>
    %cst_67 = arith.constant 1.000000e+00 : f32
    %162 = vector.broadcast %cst_67 : f32 to vector<8x128xf32>
    %163 = arith.subf %162, %154 : vector<8x128xf32>
    %164 = arith.mulf %163, %161 : vector<8x128xf32>
    %165 = arith.mulf %154, %111 : vector<8x128xf32>
    %166 = arith.addf %164, %165 : vector<8x128xf32>
    %cst_68 = arith.constant dense<0.000000e+00> : vector<8x128xf32>
    %167 = tpu.matmul %166, %11, %cst_68 {dimension_numbers = #tpu.dot_dimension_numbers<[1], [0], [0], [1], [0, 0, 1, 1], [], []>} : vector<8x128xf32>, vector<128x128xf32>, vector<8x128xf32> -> vector<8x128xf32>
    %168 = vector.broadcast %12 : vector<1x128xf32> to vector<8x128xf32>
    %169 = arith.addf %167, %168 : vector<8x128xf32>
    %170 = arith.index_cast %126 : i32 to index
    %c0_69 = arith.constant 0 : index
    %171 = vector.load %arg11[%170, %c0_69] : memref<56x128xf32, #tpu.memory_space<vmem>>, vector<8x128xf32>
    tpu.vector_store %arg11[%170, %c0_69], %169 {strides = array<i32>} : memref<56x128xf32, #tpu.memory_space<vmem>>, vector<8x128xf32>,
    %c1_i32_70 = arith.constant 1 : i32
    %172 = arith.addi %c2_i32, %c1_i32_70 : i32
    %c7_i32_71 = arith.constant 7 : i32
    %173 = arith.cmpi slt, %172, %c7_i32_71 : i32
    %174 = arith.index_cast %c2_i32 : i32 to index
    %175 = memref.load %arg1[%174] : memref<7xi32, #tpu.memory_space<smem>>
    %c0_i32_72 = arith.constant 0 : i32
    %176 = arith.cmpi eq, %175, %c0_i32_72 : i32
    %177 = arith.andi %173, %176 : i1
    %178 = arith.extui %177 : i1 to i32
    %c0_i32_73 = arith.constant 0 : i32
    %179 = arith.cmpi ne, %178, %c0_i32_73 : i32
    scf.if %179 {
      %400 = tpu.iota {dimensions = array<i32: 1>} : vector<8x128xi32>
      %cst_147 = arith.constant dense<0xFF800000> : vector<8xf32>
      %401 = vector.multi_reduction <maximumf>, %169, %cst_147 [1] : vector<8x128xf32> to vector<8xf32>
      %402 = vector.shape_cast %401 : vector<8xf32> to vector<8x1xf32>
      %403 = vector.broadcast %402 : vector<8x1xf32> to vector<8x128xf32>
      %404 = arith.cmpf oeq, %169, %403 : vector<8x128xf32>
      %c128_i32 = arith.constant 128 : i32
      %405 = vector.broadcast %c128_i32 : i32 to vector<8x128xi32>
      %406 = arith.select %404, %400, %405 : vector<8x128xi1>, vector<8x128xi32>
      %cst_148 = arith.constant dense<2147483647> : vector<8xi32>
      %407 = vector.multi_reduction <minsi>, %406, %cst_148 [1] : vector<8x128xi32> to vector<8xi32>
      %408 = vector.shape_cast %407 : vector<8xi32> to vector<8x1xi32>
      %409 = vector.broadcast %408 : vector<8x1xi32> to vector<8x128xi32>
      %410 = arith.cmpi eq, %400, %409 : vector<8x128xi32>
      %411 = arith.extui %410 : vector<8x128xi1> to vector<8x128xi32>
      %412 = arith.sitofp %411 : vector<8x128xi32> to vector<8x128xf32>
      %c0_149 = arith.constant 0 : index
      %c0_150 = arith.constant 0 : index
      %413 = vector.load %arg10[%c0_149, %c0_150] : memref<128x384xf32, #tpu.memory_space<vmem>>, vector<128x384xf32>
      %cst_151 = arith.constant dense<0.000000e+00> : vector<8x384xf32>
      %414 = tpu.matmul %412, %413, %cst_151 {dimension_numbers = #tpu.dot_dimension_numbers<[1], [0], [0], [1], [0, 0, 1, 1], [], []>} : vector<8x128xf32>, vector<128x384xf32>, vector<8x384xf32> -> vector<8x384xf32>
      %415 = vector.broadcast %13 : vector<1x384xf32> to vector<8x384xf32>
      %416 = arith.addf %414, %415 : vector<8x384xf32>
      %c0_152 = arith.constant 0 : index
      %c0_153 = arith.constant 0 : index
      %417 = vector.load %arg13[%c0_152, %c0_153] : memref<8x384xf32, #tpu.memory_space<vmem>>, vector<8x384xf32>
      tpu.vector_store %arg13[%c0_152, %c0_153], %416 {strides = array<i32>} : memref<8x384xf32, #tpu.memory_space<vmem>>, vector<8x384xf32>,
    } else {
    }
    %c3_i32 = arith.constant 3 : i32
    %c8_i32_74 = arith.constant 8 : i32
    %180 = arith.muli %c3_i32, %c8_i32_74 : i32
    %181 = tpu.assume_multiple %180, 8 : i32
    %c0_i32_75 = arith.constant 0 : i32
    %182 = arith.cmpi eq, %c3_i32, %c0_i32_75 : i32
    %c1_i32_76 = arith.constant 1 : i32
    %183 = arith.subi %c3_i32, %c1_i32_76 : i32
    %c0_i32_77 = arith.constant 0 : i32
    %184 = arith.maxsi %183, %c0_i32_77 : i32
    %185 = arith.index_cast %184 : i32 to index
    %186 = memref.load %arg1[%185] : memref<7xi32, #tpu.memory_space<smem>>
    %c0_i32_78 = arith.constant 0 : i32
    %187 = arith.cmpi ne, %186, %c0_i32_78 : i32
    %188 = arith.ori %182, %187 : i1
    %189 = arith.index_cast %181 : i32 to index
    %c0_79 = arith.constant 0 : index
    %190 = vector.load %arg12[%189, %c0_79] : memref<56x384xf32, #tpu.memory_space<vmem>>, vector<8x384xf32>
    %c0_80 = arith.constant 0 : index
    %c0_81 = arith.constant 0 : index
    %191 = vector.load %arg13[%c0_80, %c0_81] : memref<8x384xf32, #tpu.memory_space<vmem>>, vector<8x384xf32>
    %192 = arith.select %188, %190, %191 : vector<8x384xf32>
    %cst_82 = arith.constant dense<0.000000e+00> : vector<8x384xf32>
    %193 = tpu.matmul %166, %9, %cst_82 {dimension_numbers = #tpu.dot_dimension_numbers<[1], [0], [0], [1], [0, 0, 1, 1], [], []>} : vector<8x128xf32>, vector<128x384xf32>, vector<8x384xf32> -> vector<8x384xf32>
    %194 = vector.extract_strided_slice %192 {offsets = [0, 0], sizes = [8, 128], strides = [1, 1]} : vector<8x384xf32> to vector<8x128xf32>
    %195 = vector.extract_strided_slice %193 {offsets = [0, 0], sizes = [8, 128], strides = [1, 1]} : vector<8x384xf32> to vector<8x128xf32>
    %196 = arith.addf %194, %195 : vector<8x128xf32>
    %197 = arith.negf %196 : vector<8x128xf32>
    %198 = math.exp %197 : vector<8x128xf32>
    %cst_83 = arith.constant 1.000000e+00 : f32
    %199 = vector.broadcast %cst_83 : f32 to vector<8x128xf32>
    %200 = arith.addf %199, %198 : vector<8x128xf32>
    %201 = arith.divf %199, %200 : vector<8x128xf32>
    %202 = vector.extract_strided_slice %192 {offsets = [0, 128], sizes = [8, 128], strides = [1, 1]} : vector<8x384xf32> to vector<8x128xf32>
    %203 = vector.extract_strided_slice %193 {offsets = [0, 128], sizes = [8, 128], strides = [1, 1]} : vector<8x384xf32> to vector<8x128xf32>
    %204 = arith.addf %202, %203 : vector<8x128xf32>
    %205 = arith.negf %204 : vector<8x128xf32>
    %206 = math.exp %205 : vector<8x128xf32>
    %cst_84 = arith.constant 1.000000e+00 : f32
    %207 = vector.broadcast %cst_84 : f32 to vector<8x128xf32>
    %208 = arith.addf %207, %206 : vector<8x128xf32>
    %209 = arith.divf %207, %208 : vector<8x128xf32>
    %210 = vector.extract_strided_slice %192 {offsets = [0, 256], sizes = [8, 128], strides = [1, 1]} : vector<8x384xf32> to vector<8x128xf32>
    %211 = vector.extract_strided_slice %193 {offsets = [0, 256], sizes = [8, 128], strides = [1, 1]} : vector<8x384xf32> to vector<8x128xf32>
    %212 = vector.broadcast %10 : vector<1x128xf32> to vector<8x128xf32>
    %213 = arith.addf %211, %212 : vector<8x128xf32>
    %214 = arith.mulf %201, %213 : vector<8x128xf32>
    %215 = arith.addf %210, %214 : vector<8x128xf32>
    %216 = math.tanh %215 : vector<8x128xf32>
    %cst_85 = arith.constant 1.000000e+00 : f32
    %217 = vector.broadcast %cst_85 : f32 to vector<8x128xf32>
    %218 = arith.subf %217, %209 : vector<8x128xf32>
    %219 = arith.mulf %218, %216 : vector<8x128xf32>
    %220 = arith.mulf %209, %166 : vector<8x128xf32>
    %221 = arith.addf %219, %220 : vector<8x128xf32>
    %cst_86 = arith.constant dense<0.000000e+00> : vector<8x128xf32>
    %222 = tpu.matmul %221, %11, %cst_86 {dimension_numbers = #tpu.dot_dimension_numbers<[1], [0], [0], [1], [0, 0, 1, 1], [], []>} : vector<8x128xf32>, vector<128x128xf32>, vector<8x128xf32> -> vector<8x128xf32>
    %223 = vector.broadcast %12 : vector<1x128xf32> to vector<8x128xf32>
    %224 = arith.addf %222, %223 : vector<8x128xf32>
    %225 = arith.index_cast %181 : i32 to index
    %c0_87 = arith.constant 0 : index
    %226 = vector.load %arg11[%225, %c0_87] : memref<56x128xf32, #tpu.memory_space<vmem>>, vector<8x128xf32>
    tpu.vector_store %arg11[%225, %c0_87], %224 {strides = array<i32>} : memref<56x128xf32, #tpu.memory_space<vmem>>, vector<8x128xf32>,
    %c1_i32_88 = arith.constant 1 : i32
    %227 = arith.addi %c3_i32, %c1_i32_88 : i32
    %c7_i32_89 = arith.constant 7 : i32
    %228 = arith.cmpi slt, %227, %c7_i32_89 : i32
    %229 = arith.index_cast %c3_i32 : i32 to index
    %230 = memref.load %arg1[%229] : memref<7xi32, #tpu.memory_space<smem>>
    %c0_i32_90 = arith.constant 0 : i32
    %231 = arith.cmpi eq, %230, %c0_i32_90 : i32
    %232 = arith.andi %228, %231 : i1
    %233 = arith.extui %232 : i1 to i32
    %c0_i32_91 = arith.constant 0 : i32
    %234 = arith.cmpi ne, %233, %c0_i32_91 : i32
    scf.if %234 {
      %400 = tpu.iota {dimensions = array<i32: 1>} : vector<8x128xi32>
      %cst_147 = arith.constant dense<0xFF800000> : vector<8xf32>
      %401 = vector.multi_reduction <maximumf>, %224, %cst_147 [1] : vector<8x128xf32> to vector<8xf32>
      %402 = vector.shape_cast %401 : vector<8xf32> to vector<8x1xf32>
      %403 = vector.broadcast %402 : vector<8x1xf32> to vector<8x128xf32>
      %404 = arith.cmpf oeq, %224, %403 : vector<8x128xf32>
      %c128_i32 = arith.constant 128 : i32
      %405 = vector.broadcast %c128_i32 : i32 to vector<8x128xi32>
      %406 = arith.select %404, %400, %405 : vector<8x128xi1>, vector<8x128xi32>
      %cst_148 = arith.constant dense<2147483647> : vector<8xi32>
      %407 = vector.multi_reduction <minsi>, %406, %cst_148 [1] : vector<8x128xi32> to vector<8xi32>
      %408 = vector.shape_cast %407 : vector<8xi32> to vector<8x1xi32>
      %409 = vector.broadcast %408 : vector<8x1xi32> to vector<8x128xi32>
      %410 = arith.cmpi eq, %400, %409 : vector<8x128xi32>
      %411 = arith.extui %410 : vector<8x128xi1> to vector<8x128xi32>
      %412 = arith.sitofp %411 : vector<8x128xi32> to vector<8x128xf32>
      %c0_149 = arith.constant 0 : index
      %c0_150 = arith.constant 0 : index
      %413 = vector.load %arg10[%c0_149, %c0_150] : memref<128x384xf32, #tpu.memory_space<vmem>>, vector<128x384xf32>
      %cst_151 = arith.constant dense<0.000000e+00> : vector<8x384xf32>
      %414 = tpu.matmul %412, %413, %cst_151 {dimension_numbers = #tpu.dot_dimension_numbers<[1], [0], [0], [1], [0, 0, 1, 1], [], []>} : vector<8x128xf32>, vector<128x384xf32>, vector<8x384xf32> -> vector<8x384xf32>
      %415 = vector.broadcast %13 : vector<1x384xf32> to vector<8x384xf32>
      %416 = arith.addf %414, %415 : vector<8x384xf32>
      %c0_152 = arith.constant 0 : index
      %c0_153 = arith.constant 0 : index
      %417 = vector.load %arg13[%c0_152, %c0_153] : memref<8x384xf32, #tpu.memory_space<vmem>>, vector<8x384xf32>
      tpu.vector_store %arg13[%c0_152, %c0_153], %416 {strides = array<i32>} : memref<8x384xf32, #tpu.memory_space<vmem>>, vector<8x384xf32>,
    } else {
    }
    %c4_i32 = arith.constant 4 : i32
    %c8_i32_92 = arith.constant 8 : i32
    %235 = arith.muli %c4_i32, %c8_i32_92 : i32
    %236 = tpu.assume_multiple %235, 8 : i32
    %c0_i32_93 = arith.constant 0 : i32
    %237 = arith.cmpi eq, %c4_i32, %c0_i32_93 : i32
    %c1_i32_94 = arith.constant 1 : i32
    %238 = arith.subi %c4_i32, %c1_i32_94 : i32
    %c0_i32_95 = arith.constant 0 : i32
    %239 = arith.maxsi %238, %c0_i32_95 : i32
    %240 = arith.index_cast %239 : i32 to index
    %241 = memref.load %arg1[%240] : memref<7xi32, #tpu.memory_space<smem>>
    %c0_i32_96 = arith.constant 0 : i32
    %242 = arith.cmpi ne, %241, %c0_i32_96 : i32
    %243 = arith.ori %237, %242 : i1
    %244 = arith.index_cast %236 : i32 to index
    %c0_97 = arith.constant 0 : index
    %245 = vector.load %arg12[%244, %c0_97] : memref<56x384xf32, #tpu.memory_space<vmem>>, vector<8x384xf32>
    %c0_98 = arith.constant 0 : index
    %c0_99 = arith.constant 0 : index
    %246 = vector.load %arg13[%c0_98, %c0_99] : memref<8x384xf32, #tpu.memory_space<vmem>>, vector<8x384xf32>
    %247 = arith.select %243, %245, %246 : vector<8x384xf32>
    %cst_100 = arith.constant dense<0.000000e+00> : vector<8x384xf32>
    %248 = tpu.matmul %221, %9, %cst_100 {dimension_numbers = #tpu.dot_dimension_numbers<[1], [0], [0], [1], [0, 0, 1, 1], [], []>} : vector<8x128xf32>, vector<128x384xf32>, vector<8x384xf32> -> vector<8x384xf32>
    %249 = vector.extract_strided_slice %247 {offsets = [0, 0], sizes = [8, 128], strides = [1, 1]} : vector<8x384xf32> to vector<8x128xf32>
    %250 = vector.extract_strided_slice %248 {offsets = [0, 0], sizes = [8, 128], strides = [1, 1]} : vector<8x384xf32> to vector<8x128xf32>
    %251 = arith.addf %249, %250 : vector<8x128xf32>
    %252 = arith.negf %251 : vector<8x128xf32>
    %253 = math.exp %252 : vector<8x128xf32>
    %cst_101 = arith.constant 1.000000e+00 : f32
    %254 = vector.broadcast %cst_101 : f32 to vector<8x128xf32>
    %255 = arith.addf %254, %253 : vector<8x128xf32>
    %256 = arith.divf %254, %255 : vector<8x128xf32>
    %257 = vector.extract_strided_slice %247 {offsets = [0, 128], sizes = [8, 128], strides = [1, 1]} : vector<8x384xf32> to vector<8x128xf32>
    %258 = vector.extract_strided_slice %248 {offsets = [0, 128], sizes = [8, 128], strides = [1, 1]} : vector<8x384xf32> to vector<8x128xf32>
    %259 = arith.addf %257, %258 : vector<8x128xf32>
    %260 = arith.negf %259 : vector<8x128xf32>
    %261 = math.exp %260 : vector<8x128xf32>
    %cst_102 = arith.constant 1.000000e+00 : f32
    %262 = vector.broadcast %cst_102 : f32 to vector<8x128xf32>
    %263 = arith.addf %262, %261 : vector<8x128xf32>
    %264 = arith.divf %262, %263 : vector<8x128xf32>
    %265 = vector.extract_strided_slice %247 {offsets = [0, 256], sizes = [8, 128], strides = [1, 1]} : vector<8x384xf32> to vector<8x128xf32>
    %266 = vector.extract_strided_slice %248 {offsets = [0, 256], sizes = [8, 128], strides = [1, 1]} : vector<8x384xf32> to vector<8x128xf32>
    %267 = vector.broadcast %10 : vector<1x128xf32> to vector<8x128xf32>
    %268 = arith.addf %266, %267 : vector<8x128xf32>
    %269 = arith.mulf %256, %268 : vector<8x128xf32>
    %270 = arith.addf %265, %269 : vector<8x128xf32>
    %271 = math.tanh %270 : vector<8x128xf32>
    %cst_103 = arith.constant 1.000000e+00 : f32
    %272 = vector.broadcast %cst_103 : f32 to vector<8x128xf32>
    %273 = arith.subf %272, %264 : vector<8x128xf32>
    %274 = arith.mulf %273, %271 : vector<8x128xf32>
    %275 = arith.mulf %264, %221 : vector<8x128xf32>
    %276 = arith.addf %274, %275 : vector<8x128xf32>
    %cst_104 = arith.constant dense<0.000000e+00> : vector<8x128xf32>
    %277 = tpu.matmul %276, %11, %cst_104 {dimension_numbers = #tpu.dot_dimension_numbers<[1], [0], [0], [1], [0, 0, 1, 1], [], []>} : vector<8x128xf32>, vector<128x128xf32>, vector<8x128xf32> -> vector<8x128xf32>
    %278 = vector.broadcast %12 : vector<1x128xf32> to vector<8x128xf32>
    %279 = arith.addf %277, %278 : vector<8x128xf32>
    %280 = arith.index_cast %236 : i32 to index
    %c0_105 = arith.constant 0 : index
    %281 = vector.load %arg11[%280, %c0_105] : memref<56x128xf32, #tpu.memory_space<vmem>>, vector<8x128xf32>
    tpu.vector_store %arg11[%280, %c0_105], %279 {strides = array<i32>} : memref<56x128xf32, #tpu.memory_space<vmem>>, vector<8x128xf32>,
    %c1_i32_106 = arith.constant 1 : i32
    %282 = arith.addi %c4_i32, %c1_i32_106 : i32
    %c7_i32_107 = arith.constant 7 : i32
    %283 = arith.cmpi slt, %282, %c7_i32_107 : i32
    %284 = arith.index_cast %c4_i32 : i32 to index
    %285 = memref.load %arg1[%284] : memref<7xi32, #tpu.memory_space<smem>>
    %c0_i32_108 = arith.constant 0 : i32
    %286 = arith.cmpi eq, %285, %c0_i32_108 : i32
    %287 = arith.andi %283, %286 : i1
    %288 = arith.extui %287 : i1 to i32
    %c0_i32_109 = arith.constant 0 : i32
    %289 = arith.cmpi ne, %288, %c0_i32_109 : i32
    scf.if %289 {
      %400 = tpu.iota {dimensions = array<i32: 1>} : vector<8x128xi32>
      %cst_147 = arith.constant dense<0xFF800000> : vector<8xf32>
      %401 = vector.multi_reduction <maximumf>, %279, %cst_147 [1] : vector<8x128xf32> to vector<8xf32>
      %402 = vector.shape_cast %401 : vector<8xf32> to vector<8x1xf32>
      %403 = vector.broadcast %402 : vector<8x1xf32> to vector<8x128xf32>
      %404 = arith.cmpf oeq, %279, %403 : vector<8x128xf32>
      %c128_i32 = arith.constant 128 : i32
      %405 = vector.broadcast %c128_i32 : i32 to vector<8x128xi32>
      %406 = arith.select %404, %400, %405 : vector<8x128xi1>, vector<8x128xi32>
      %cst_148 = arith.constant dense<2147483647> : vector<8xi32>
      %407 = vector.multi_reduction <minsi>, %406, %cst_148 [1] : vector<8x128xi32> to vector<8xi32>
      %408 = vector.shape_cast %407 : vector<8xi32> to vector<8x1xi32>
      %409 = vector.broadcast %408 : vector<8x1xi32> to vector<8x128xi32>
      %410 = arith.cmpi eq, %400, %409 : vector<8x128xi32>
      %411 = arith.extui %410 : vector<8x128xi1> to vector<8x128xi32>
      %412 = arith.sitofp %411 : vector<8x128xi32> to vector<8x128xf32>
      %c0_149 = arith.constant 0 : index
      %c0_150 = arith.constant 0 : index
      %413 = vector.load %arg10[%c0_149, %c0_150] : memref<128x384xf32, #tpu.memory_space<vmem>>, vector<128x384xf32>
      %cst_151 = arith.constant dense<0.000000e+00> : vector<8x384xf32>
      %414 = tpu.matmul %412, %413, %cst_151 {dimension_numbers = #tpu.dot_dimension_numbers<[1], [0], [0], [1], [0, 0, 1, 1], [], []>} : vector<8x128xf32>, vector<128x384xf32>, vector<8x384xf32> -> vector<8x384xf32>
      %415 = vector.broadcast %13 : vector<1x384xf32> to vector<8x384xf32>
      %416 = arith.addf %414, %415 : vector<8x384xf32>
      %c0_152 = arith.constant 0 : index
      %c0_153 = arith.constant 0 : index
      %417 = vector.load %arg13[%c0_152, %c0_153] : memref<8x384xf32, #tpu.memory_space<vmem>>, vector<8x384xf32>
      tpu.vector_store %arg13[%c0_152, %c0_153], %416 {strides = array<i32>} : memref<8x384xf32, #tpu.memory_space<vmem>>, vector<8x384xf32>,
    } else {
    }
    %c5_i32 = arith.constant 5 : i32
    %c8_i32_110 = arith.constant 8 : i32
    %290 = arith.muli %c5_i32, %c8_i32_110 : i32
    %291 = tpu.assume_multiple %290, 8 : i32
    %c0_i32_111 = arith.constant 0 : i32
    %292 = arith.cmpi eq, %c5_i32, %c0_i32_111 : i32
    %c1_i32_112 = arith.constant 1 : i32
    %293 = arith.subi %c5_i32, %c1_i32_112 : i32
    %c0_i32_113 = arith.constant 0 : i32
    %294 = arith.maxsi %293, %c0_i32_113 : i32
    %295 = arith.index_cast %294 : i32 to index
    %296 = memref.load %arg1[%295] : memref<7xi32, #tpu.memory_space<smem>>
    %c0_i32_114 = arith.constant 0 : i32
    %297 = arith.cmpi ne, %296, %c0_i32_114 : i32
    %298 = arith.ori %292, %297 : i1
    %299 = arith.index_cast %291 : i32 to index
    %c0_115 = arith.constant 0 : index
    %300 = vector.load %arg12[%299, %c0_115] : memref<56x384xf32, #tpu.memory_space<vmem>>, vector<8x384xf32>
    %c0_116 = arith.constant 0 : index
    %c0_117 = arith.constant 0 : index
    %301 = vector.load %arg13[%c0_116, %c0_117] : memref<8x384xf32, #tpu.memory_space<vmem>>, vector<8x384xf32>
    %302 = arith.select %298, %300, %301 : vector<8x384xf32>
    %cst_118 = arith.constant dense<0.000000e+00> : vector<8x384xf32>
    %303 = tpu.matmul %276, %9, %cst_118 {dimension_numbers = #tpu.dot_dimension_numbers<[1], [0], [0], [1], [0, 0, 1, 1], [], []>} : vector<8x128xf32>, vector<128x384xf32>, vector<8x384xf32> -> vector<8x384xf32>
    %304 = vector.extract_strided_slice %302 {offsets = [0, 0], sizes = [8, 128], strides = [1, 1]} : vector<8x384xf32> to vector<8x128xf32>
    %305 = vector.extract_strided_slice %303 {offsets = [0, 0], sizes = [8, 128], strides = [1, 1]} : vector<8x384xf32> to vector<8x128xf32>
    %306 = arith.addf %304, %305 : vector<8x128xf32>
    %307 = arith.negf %306 : vector<8x128xf32>
    %308 = math.exp %307 : vector<8x128xf32>
    %cst_119 = arith.constant 1.000000e+00 : f32
    %309 = vector.broadcast %cst_119 : f32 to vector<8x128xf32>
    %310 = arith.addf %309, %308 : vector<8x128xf32>
    %311 = arith.divf %309, %310 : vector<8x128xf32>
    %312 = vector.extract_strided_slice %302 {offsets = [0, 128], sizes = [8, 128], strides = [1, 1]} : vector<8x384xf32> to vector<8x128xf32>
    %313 = vector.extract_strided_slice %303 {offsets = [0, 128], sizes = [8, 128], strides = [1, 1]} : vector<8x384xf32> to vector<8x128xf32>
    %314 = arith.addf %312, %313 : vector<8x128xf32>
    %315 = arith.negf %314 : vector<8x128xf32>
    %316 = math.exp %315 : vector<8x128xf32>
    %cst_120 = arith.constant 1.000000e+00 : f32
    %317 = vector.broadcast %cst_120 : f32 to vector<8x128xf32>
    %318 = arith.addf %317, %316 : vector<8x128xf32>
    %319 = arith.divf %317, %318 : vector<8x128xf32>
    %320 = vector.extract_strided_slice %302 {offsets = [0, 256], sizes = [8, 128], strides = [1, 1]} : vector<8x384xf32> to vector<8x128xf32>
    %321 = vector.extract_strided_slice %303 {offsets = [0, 256], sizes = [8, 128], strides = [1, 1]} : vector<8x384xf32> to vector<8x128xf32>
    %322 = vector.broadcast %10 : vector<1x128xf32> to vector<8x128xf32>
    %323 = arith.addf %321, %322 : vector<8x128xf32>
    %324 = arith.mulf %311, %323 : vector<8x128xf32>
    %325 = arith.addf %320, %324 : vector<8x128xf32>
    %326 = math.tanh %325 : vector<8x128xf32>
    %cst_121 = arith.constant 1.000000e+00 : f32
    %327 = vector.broadcast %cst_121 : f32 to vector<8x128xf32>
    %328 = arith.subf %327, %319 : vector<8x128xf32>
    %329 = arith.mulf %328, %326 : vector<8x128xf32>
    %330 = arith.mulf %319, %276 : vector<8x128xf32>
    %331 = arith.addf %329, %330 : vector<8x128xf32>
    %cst_122 = arith.constant dense<0.000000e+00> : vector<8x128xf32>
    %332 = tpu.matmul %331, %11, %cst_122 {dimension_numbers = #tpu.dot_dimension_numbers<[1], [0], [0], [1], [0, 0, 1, 1], [], []>} : vector<8x128xf32>, vector<128x128xf32>, vector<8x128xf32> -> vector<8x128xf32>
    %333 = vector.broadcast %12 : vector<1x128xf32> to vector<8x128xf32>
    %334 = arith.addf %332, %333 : vector<8x128xf32>
    %335 = arith.index_cast %291 : i32 to index
    %c0_123 = arith.constant 0 : index
    %336 = vector.load %arg11[%335, %c0_123] : memref<56x128xf32, #tpu.memory_space<vmem>>, vector<8x128xf32>
    tpu.vector_store %arg11[%335, %c0_123], %334 {strides = array<i32>} : memref<56x128xf32, #tpu.memory_space<vmem>>, vector<8x128xf32>,
    %c1_i32_124 = arith.constant 1 : i32
    %337 = arith.addi %c5_i32, %c1_i32_124 : i32
    %c7_i32_125 = arith.constant 7 : i32
    %338 = arith.cmpi slt, %337, %c7_i32_125 : i32
    %339 = arith.index_cast %c5_i32 : i32 to index
    %340 = memref.load %arg1[%339] : memref<7xi32, #tpu.memory_space<smem>>
    %c0_i32_126 = arith.constant 0 : i32
    %341 = arith.cmpi eq, %340, %c0_i32_126 : i32
    %342 = arith.andi %338, %341 : i1
    %343 = arith.extui %342 : i1 to i32
    %c0_i32_127 = arith.constant 0 : i32
    %344 = arith.cmpi ne, %343, %c0_i32_127 : i32
    scf.if %344 {
      %400 = tpu.iota {dimensions = array<i32: 1>} : vector<8x128xi32>
      %cst_147 = arith.constant dense<0xFF800000> : vector<8xf32>
      %401 = vector.multi_reduction <maximumf>, %334, %cst_147 [1] : vector<8x128xf32> to vector<8xf32>
      %402 = vector.shape_cast %401 : vector<8xf32> to vector<8x1xf32>
      %403 = vector.broadcast %402 : vector<8x1xf32> to vector<8x128xf32>
      %404 = arith.cmpf oeq, %334, %403 : vector<8x128xf32>
      %c128_i32 = arith.constant 128 : i32
      %405 = vector.broadcast %c128_i32 : i32 to vector<8x128xi32>
      %406 = arith.select %404, %400, %405 : vector<8x128xi1>, vector<8x128xi32>
      %cst_148 = arith.constant dense<2147483647> : vector<8xi32>
      %407 = vector.multi_reduction <minsi>, %406, %cst_148 [1] : vector<8x128xi32> to vector<8xi32>
      %408 = vector.shape_cast %407 : vector<8xi32> to vector<8x1xi32>
      %409 = vector.broadcast %408 : vector<8x1xi32> to vector<8x128xi32>
      %410 = arith.cmpi eq, %400, %409 : vector<8x128xi32>
      %411 = arith.extui %410 : vector<8x128xi1> to vector<8x128xi32>
      %412 = arith.sitofp %411 : vector<8x128xi32> to vector<8x128xf32>
      %c0_149 = arith.constant 0 : index
      %c0_150 = arith.constant 0 : index
      %413 = vector.load %arg10[%c0_149, %c0_150] : memref<128x384xf32, #tpu.memory_space<vmem>>, vector<128x384xf32>
      %cst_151 = arith.constant dense<0.000000e+00> : vector<8x384xf32>
      %414 = tpu.matmul %412, %413, %cst_151 {dimension_numbers = #tpu.dot_dimension_numbers<[1], [0], [0], [1], [0, 0, 1, 1], [], []>} : vector<8x128xf32>, vector<128x384xf32>, vector<8x384xf32> -> vector<8x384xf32>
      %415 = vector.broadcast %13 : vector<1x384xf32> to vector<8x384xf32>
      %416 = arith.addf %414, %415 : vector<8x384xf32>
      %c0_152 = arith.constant 0 : index
      %c0_153 = arith.constant 0 : index
      %417 = vector.load %arg13[%c0_152, %c0_153] : memref<8x384xf32, #tpu.memory_space<vmem>>, vector<8x384xf32>
      tpu.vector_store %arg13[%c0_152, %c0_153], %416 {strides = array<i32>} : memref<8x384xf32, #tpu.memory_space<vmem>>, vector<8x384xf32>,
    } else {
    }
    %c6_i32 = arith.constant 6 : i32
    %c8_i32_128 = arith.constant 8 : i32
    %345 = arith.muli %c6_i32, %c8_i32_128 : i32
    %346 = tpu.assume_multiple %345, 8 : i32
    %c0_i32_129 = arith.constant 0 : i32
    %347 = arith.cmpi eq, %c6_i32, %c0_i32_129 : i32
    %c1_i32_130 = arith.constant 1 : i32
    %348 = arith.subi %c6_i32, %c1_i32_130 : i32
    %c0_i32_131 = arith.constant 0 : i32
    %349 = arith.maxsi %348, %c0_i32_131 : i32
    %350 = arith.index_cast %349 : i32 to index
    %351 = memref.load %arg1[%350] : memref<7xi32, #tpu.memory_space<smem>>
    %c0_i32_132 = arith.constant 0 : i32
    %352 = arith.cmpi ne, %351, %c0_i32_132 : i32
    %353 = arith.ori %347, %352 : i1
    %354 = arith.index_cast %346 : i32 to index
    %c0_133 = arith.constant 0 : index
    %355 = vector.load %arg12[%354, %c0_133] : memref<56x384xf32, #tpu.memory_space<vmem>>, vector<8x384xf32>
    %c0_134 = arith.constant 0 : index
    %c0_135 = arith.constant 0 : index
    %356 = vector.load %arg13[%c0_134, %c0_135] : memref<8x384xf32, #tpu.memory_space<vmem>>, vector<8x384xf32>
    %357 = arith.select %353, %355, %356 : vector<8x384xf32>
    %cst_136 = arith.constant dense<0.000000e+00> : vector<8x384xf32>
    %358 = tpu.matmul %331, %9, %cst_136 {dimension_numbers = #tpu.dot_dimension_numbers<[1], [0], [0], [1], [0, 0, 1, 1], [], []>} : vector<8x128xf32>, vector<128x384xf32>, vector<8x384xf32> -> vector<8x384xf32>
    %359 = vector.extract_strided_slice %357 {offsets = [0, 0], sizes = [8, 128], strides = [1, 1]} : vector<8x384xf32> to vector<8x128xf32>
    %360 = vector.extract_strided_slice %358 {offsets = [0, 0], sizes = [8, 128], strides = [1, 1]} : vector<8x384xf32> to vector<8x128xf32>
    %361 = arith.addf %359, %360 : vector<8x128xf32>
    %362 = arith.negf %361 : vector<8x128xf32>
    %363 = math.exp %362 : vector<8x128xf32>
    %cst_137 = arith.constant 1.000000e+00 : f32
    %364 = vector.broadcast %cst_137 : f32 to vector<8x128xf32>
    %365 = arith.addf %364, %363 : vector<8x128xf32>
    %366 = arith.divf %364, %365 : vector<8x128xf32>
    %367 = vector.extract_strided_slice %357 {offsets = [0, 128], sizes = [8, 128], strides = [1, 1]} : vector<8x384xf32> to vector<8x128xf32>
    %368 = vector.extract_strided_slice %358 {offsets = [0, 128], sizes = [8, 128], strides = [1, 1]} : vector<8x384xf32> to vector<8x128xf32>
    %369 = arith.addf %367, %368 : vector<8x128xf32>
    %370 = arith.negf %369 : vector<8x128xf32>
    %371 = math.exp %370 : vector<8x128xf32>
    %cst_138 = arith.constant 1.000000e+00 : f32
    %372 = vector.broadcast %cst_138 : f32 to vector<8x128xf32>
    %373 = arith.addf %372, %371 : vector<8x128xf32>
    %374 = arith.divf %372, %373 : vector<8x128xf32>
    %375 = vector.extract_strided_slice %357 {offsets = [0, 256], sizes = [8, 128], strides = [1, 1]} : vector<8x384xf32> to vector<8x128xf32>
    %376 = vector.extract_strided_slice %358 {offsets = [0, 256], sizes = [8, 128], strides = [1, 1]} : vector<8x384xf32> to vector<8x128xf32>
    %377 = vector.broadcast %10 : vector<1x128xf32> to vector<8x128xf32>
    %378 = arith.addf %376, %377 : vector<8x128xf32>
    %379 = arith.mulf %366, %378 : vector<8x128xf32>
    %380 = arith.addf %375, %379 : vector<8x128xf32>
    %381 = math.tanh %380 : vector<8x128xf32>
    %cst_139 = arith.constant 1.000000e+00 : f32
    %382 = vector.broadcast %cst_139 : f32 to vector<8x128xf32>
    %383 = arith.subf %382, %374 : vector<8x128xf32>
    %384 = arith.mulf %383, %381 : vector<8x128xf32>
    %385 = arith.mulf %374, %331 : vector<8x128xf32>
    %386 = arith.addf %384, %385 : vector<8x128xf32>
    %cst_140 = arith.constant dense<0.000000e+00> : vector<8x128xf32>
    %387 = tpu.matmul %386, %11, %cst_140 {dimension_numbers = #tpu.dot_dimension_numbers<[1], [0], [0], [1], [0, 0, 1, 1], [], []>} : vector<8x128xf32>, vector<128x128xf32>, vector<8x128xf32> -> vector<8x128xf32>
    %388 = vector.broadcast %12 : vector<1x128xf32> to vector<8x128xf32>
    %389 = arith.addf %387, %388 : vector<8x128xf32>
    %390 = arith.index_cast %346 : i32 to index
    %c0_141 = arith.constant 0 : index
    %391 = vector.load %arg11[%390, %c0_141] : memref<56x128xf32, #tpu.memory_space<vmem>>, vector<8x128xf32>
    tpu.vector_store %arg11[%390, %c0_141], %389 {strides = array<i32>} : memref<56x128xf32, #tpu.memory_space<vmem>>, vector<8x128xf32>,
    %c1_i32_142 = arith.constant 1 : i32
    %392 = arith.addi %c6_i32, %c1_i32_142 : i32
    %c7_i32_143 = arith.constant 7 : i32
    %393 = arith.cmpi slt, %392, %c7_i32_143 : i32
    %394 = arith.index_cast %c6_i32 : i32 to index
    %395 = memref.load %arg1[%394] : memref<7xi32, #tpu.memory_space<smem>>
    %c0_i32_144 = arith.constant 0 : i32
    %396 = arith.cmpi eq, %395, %c0_i32_144 : i32
    %397 = arith.andi %393, %396 : i1
    %398 = arith.extui %397 : i1 to i32
    %c0_i32_145 = arith.constant 0 : i32
    %399 = arith.cmpi ne, %398, %c0_i32_145 : i32
    scf.if %399 {
      %400 = tpu.iota {dimensions = array<i32: 1>} : vector<8x128xi32>
      %cst_147 = arith.constant dense<0xFF800000> : vector<8xf32>
      %401 = vector.multi_reduction <maximumf>, %389, %cst_147 [1] : vector<8x128xf32> to vector<8xf32>
      %402 = vector.shape_cast %401 : vector<8xf32> to vector<8x1xf32>
      %403 = vector.broadcast %402 : vector<8x1xf32> to vector<8x128xf32>
      %404 = arith.cmpf oeq, %389, %403 : vector<8x128xf32>
      %c128_i32 = arith.constant 128 : i32
      %405 = vector.broadcast %c128_i32 : i32 to vector<8x128xi32>
      %406 = arith.select %404, %400, %405 : vector<8x128xi1>, vector<8x128xi32>
      %cst_148 = arith.constant dense<2147483647> : vector<8xi32>
      %407 = vector.multi_reduction <minsi>, %406, %cst_148 [1] : vector<8x128xi32> to vector<8xi32>
      %408 = vector.shape_cast %407 : vector<8xi32> to vector<8x1xi32>
      %409 = vector.broadcast %408 : vector<8x1xi32> to vector<8x128xi32>
      %410 = arith.cmpi eq, %400, %409 : vector<8x128xi32>
      %411 = arith.extui %410 : vector<8x128xi1> to vector<8x128xi32>
      %412 = arith.sitofp %411 : vector<8x128xi32> to vector<8x128xf32>
      %c0_149 = arith.constant 0 : index
      %c0_150 = arith.constant 0 : index
      %413 = vector.load %arg10[%c0_149, %c0_150] : memref<128x384xf32, #tpu.memory_space<vmem>>, vector<128x384xf32>
      %cst_151 = arith.constant dense<0.000000e+00> : vector<8x384xf32>
      %414 = tpu.matmul %412, %413, %cst_151 {dimension_numbers = #tpu.dot_dimension_numbers<[1], [0], [0], [1], [0, 0, 1, 1], [], []>} : vector<8x128xf32>, vector<128x384xf32>, vector<8x384xf32> -> vector<8x384xf32>
      %415 = vector.broadcast %13 : vector<1x384xf32> to vector<8x384xf32>
      %416 = arith.addf %414, %415 : vector<8x384xf32>
      %c0_152 = arith.constant 0 : index
      %c0_153 = arith.constant 0 : index
      %417 = vector.load %arg13[%c0_152, %c0_153] : memref<8x384xf32, #tpu.memory_space<vmem>>, vector<8x384xf32>
      tpu.vector_store %arg13[%c0_152, %c0_153], %416 {strides = array<i32>} : memref<8x384xf32, #tpu.memory_space<vmem>>, vector<8x384xf32>,
    } else {
    }
    %c7_i32_146 = arith.constant 7 : i32
    return
  }
  func.func @transform_0(%arg0: i32, %arg1: memref<7xi32, #tpu.memory_space<smem>>) -> (i32, i32) {
    %c0_i32 = arith.constant 0 : i32
    %c0_i32_0 = arith.constant 0 : i32
    %c0_i32_1 = arith.constant 0 : i32
    return %c0_i32, %c0_i32_0 : i32, i32
  }
  func.func @transform_1(%arg0: i32, %arg1: memref<7xi32, #tpu.memory_space<smem>>) -> (i32, i32) {
    %c0_i32 = arith.constant 0 : i32
    %c0_i32_0 = arith.constant 0 : i32
    %c0_i32_1 = arith.constant 0 : i32
    return %c0_i32, %c0_i32_0 : i32, i32
  }
  func.func @transform_2(%arg0: i32, %arg1: memref<7xi32, #tpu.memory_space<smem>>) -> (i32, i32) {
    %c0_i32 = arith.constant 0 : i32
    %c0_i32_0 = arith.constant 0 : i32
    %c0_i32_1 = arith.constant 0 : i32
    return %c0_i32, %c0_i32_0 : i32, i32
  }
  func.func @transform_3(%arg0: i32, %arg1: memref<7xi32, #tpu.memory_space<smem>>) -> (i32, i32) {
    %c0_i32 = arith.constant 0 : i32
    %c0_i32_0 = arith.constant 0 : i32
    %c0_i32_1 = arith.constant 0 : i32
    return %c0_i32, %c0_i32_0 : i32, i32
  }
  func.func @transform_4(%arg0: i32, %arg1: memref<7xi32, #tpu.memory_space<smem>>) -> (i32, i32) {
    %c0_i32 = arith.constant 0 : i32
    %c0_i32_0 = arith.constant 0 : i32
    %c0_i32_1 = arith.constant 0 : i32
    return %c0_i32, %c0_i32_0 : i32, i32
  }
  func.func @transform_5(%arg0: i32, %arg1: memref<7xi32, #tpu.memory_space<smem>>) -> (i32, i32) {
    %c0_i32 = arith.constant 0 : i32
    %c0_i32_0 = arith.constant 0 : i32
    %c0_i32_1 = arith.constant 0 : i32
    return %c0_i32, %c0_i32_0 : i32, i32
  }
  func.func @transform_6(%arg0: i32, %arg1: memref<7xi32, #tpu.memory_space<smem>>) -> (i32, i32) {
    %c0_i32 = arith.constant 0 : i32
    %c0_i32_0 = arith.constant 0 : i32
    %c0_i32_1 = arith.constant 0 : i32
    return %c0_i32, %c0_i32_0 : i32, i32
  }
  func.func @transform_7(%arg0: i32, %arg1: memref<7xi32, #tpu.memory_space<smem>>) -> (i32, i32) {
    %c0_i32 = arith.constant 0 : i32
    %c0_i32_0 = arith.constant 0 : i32
    %c0_i32_1 = arith.constant 0 : i32
    return %c0_i32, %c0_i32_0 : i32, i32
  }
  func.func @transform_8(%arg0: i32, %arg1: memref<7xi32, #tpu.memory_space<smem>>) -> (i32, i32) {
    %c0_i32 = arith.constant 0 : i32
    %c0_i32_0 = arith.constant 0 : i32
    %c0_i32_1 = arith.constant 0 : i32
    return %c0_i32, %c0_i32_0 : i32, i32
  }
  func.func @transform_9(%arg0: i32, %arg1: memref<7xi32, #tpu.memory_space<smem>>) -> (i32, i32) {
    %c0_i32 = arith.constant 0 : i32
    %c0_i32_0 = arith.constant 0 : i32
    %c0_i32_1 = arith.constant 0 : i32
    return %c0_i32, %c0_i32_0 : i32, i32
  }
}

</mosaic_0001>

<bundles_post_ra>
// kernel: _seq2seq_forward_jit.2
= control target key start
LH: loop header
LB: loop body
LE: loop exit
PB: predicated region body
PF: predicated region fallthrough
CT: control target
= control target key end

     0   :  { %v2882_v3 = vmov 0.0   ;;  %vm2884_vm0 = vmmov 0   ;;  %s3629_s1 = inlined_call_operand.vmem [shape: f32[128,384], index: 1, kind: input, shape index: {}]   ;;  %s3630_s0 = inlined_call_operand.vmem [shape: f32[64,128], index: 0, kind: input, shape index: {}]   ;;  %s3631_s2 = inlined_call_operand.vmem [shape: f32[128,384], index: 2, kind: input, shape index: {}]   ;;  %s3632_s3 = inlined_call_operand.vmem [shape: f32[1,384], index: 3, kind: input, shape index: {}]   ;;  %s3633_s4 = inlined_call_operand.vmem [shape: f32[1,128], index: 4, kind: input, shape index: {}]   ;;  %s3634_s5 = inlined_call_operand.vmem [shape: f32[8,128], index: 5, kind: output, shape index: {}]  }
   0x1   :  { %v29_v0 = vld [vmem:[%s3629_s1 + $0x8] sm:$0xff]  ;;  %v32_v1 = vld [vmem:[%s3629_s1 + $0x20] sm:$0xff]  ;;  %157 = vmatprep.mubr.f32.mxu0 %v2882_v3  ;;  %v31_v5 = vld [vmem:[%s3629_s1 + $0x18] sm:$0xff] }
   0x2   :  { %v28_v2 = vld [vmem:[%s3629_s1] sm:$0xff]  ;;  %v2255_v4 = vpack.c.bf16 %v32_v1, %v29_v0  ;;  %v35_v6 = vld [vmem:[%s3629_s1 + $0x38] sm:$0xff]  ;;  %v38_v7 = vld [vmem:[%s3629_s1 + $0x50] sm:$0xff] }
   0x3   :  { %v2257_v8 = vpack.c.bf16 %v31_v5, %v28_v2  ;;  %v2259_v9 = vpack.c.bf16 %v38_v7, %v35_v6  ;;  %v34_v10 = vld [vmem:[%s3629_s1 + $0x30] sm:$0xff]  ;;  %v37_v11 = vld [vmem:[%s3629_s1 + $0x48] sm:$0xff]  ;;  %v44_v13 = vld [vmem:[%s3629_s1 + $0x80] sm:$0xff] }
   0x4   :  { %v41_v12 = vld [vmem:[%s3629_s1 + $0x68] sm:$0xff]  ;;  %2256 = vmatprep.subr.bf16.mxu0 %v2255_v4  ;;  %v2261_v14 = vpack.c.bf16 %v37_v11, %v34_v10  ;;  %v40_v16 = vld [vmem:[%s3629_s1 + $0x60] sm:$0xff]  ;;  %v43_v17 = vld [vmem:[%s3629_s1 + $0x78] sm:$0xff] }
   0x5   :  { %2258 = vmatpush1.bf16.msra.mxu0 %v2257_v8  ;;  %v2263_v15 = vpack.c.bf16 %v44_v13, %v41_v12  ;;  %v47_v18 = vld [vmem:[%s3629_s1 + $0x98] sm:$0xff]  ;;  %v50_v19 = vld [vmem:[%s3629_s1 + $0xb0] sm:$0xff]  ;;  %v2265_v20 = vpack.c.bf16 %v43_v17, %v40_v16  ;;  %v49_v23 = vld [vmem:[%s3629_s1 + $0xa8] sm:$0xff] }
   0x6   :  { %2260 = vmatprep.subr.bf16.mxu0 %v2259_v9  ;;  %v46_v21 = vld [vmem:[%s3629_s1 + $0x90] sm:$0xff]  ;;  %v2267_v22 = vpack.c.bf16 %v50_v19, %v47_v18  ;;  %v33_v25 = vld [vmem:[%s3629_s1 + $0x28] sm:$0xff]  ;;  %v56_v27 = vld [vmem:[%s3629_s1 + $0xe0] sm:$0xff] }
   0x7   :  { %v30_v24 = vld [vmem:[%s3629_s1 + $0x10] sm:$0xff]  ;;  %v53_v26 = vld [vmem:[%s3629_s1 + $0xc8] sm:$0xff]  ;;  %v36_v29 = vld [vmem:[%s3629_s1 + $0x40] sm:$0xff]  ;;  %v2269_v31 = vpack.c.bf16 %v49_v23, %v46_v21 }
   0x8   :  { %v2287_v28 = vpack.c.bf16 %v33_v25, %v30_v24  ;;  %v39_v30 = vld [vmem:[%s3629_s1 + $0x58] sm:$0xff]  ;;  %v52_v32 = vld [vmem:[%s3629_s1 + $0xc0] sm:$0xff]  ;;  %v2271_v34 = vpack.c.bf16 %v56_v27, %v53_v26  ;;  %v42_v37 = vld [vmem:[%s3629_s1 + $0x70] sm:$0xff] }
   0x9   :  { %2262 = vmatpush1.bf16.msra.mxu0 %v2261_v14  ;;  %v2291_v33 = vpack.c.bf16 %v39_v30, %v36_v29  ;;  %v55_v35 = vld [vmem:[%s3629_s1 + $0xd8] sm:$0xff]  ;;  %v2991_v36 = vld [vmem:[%s3630_s0] sm:$0xff]  ;;  %v62_v39 = vld [vmem:[%s3629_s1 + $0x110] sm:$0xff] }
   0xa   :  { %2264 = vmatprep.subr.bf16.mxu0 %v2263_v15  ;;  %2288 = vmatprep.subr.bf16.mxu1 %v2287_v28  ;;  %v59_v38 = vld [vmem:[%s3629_s1 + $0xf8] sm:$0xff]  ;;  %v45_v40 = vld [vmem:[%s3629_s1 + $0x88] sm:$0xff]  ;;  %v2273_v42 = vpack.c.bf16 %v55_v35, %v52_v32  ;;  %v48_v43 = vld [vmem:[%s3629_s1 + $0xa0] sm:$0xff] }
   0xb   :  { %2290 = vmatpush3.bf16.msra.mxu1 %v2287_v28  ;;  %1963 = vmatprep.mubr.f32.mxu1 %v2991_v36  ;;  %v2295_v41 = vpack.c.bf16 %v45_v40, %v42_v37  ;;  %v51_v44 = vld [vmem:[%s3629_s1 + $0xb8] sm:$0xff]  ;;  %v2275_v45 = vpack.c.bf16 %v62_v39, %v59_v38  ;;  %v58_v46 = vld [vmem:[%s3629_s1 + $0xf0] sm:$0xff]  ;;  %v61_v47 = vld [vmem:[%s3629_s1 + $0x108] sm:$0xff]  ;;  %v2883_v40 = vmov 0.0|0.0  }
   0xc   :  { %2292 = vmatprep.subr.bf16.mxu1 %v2291_v33  ;;  %v65_v48 = vld [vmem:[%s3629_s1 + $0x128] sm:$0xff]  ;;  %v68_v49 = vld [vmem:[%s3629_s1 + $0x140] sm:$0xff]  ;;  %v2299_v50 = vpack.c.bf16 %v51_v44, %v48_v43  ;;  %v54_v51 = vld [vmem:[%s3629_s1 + $0xd0] sm:$0xff]  ;;  %v2277_v53 = vpack.c.bf16 %v61_v47, %v58_v46 }
   0xd   :  { %2266 = vmatpush1.bf16.msra.mxu0 %v2265_v20  ;;  %v57_v52 = vld [vmem:[%s3629_s1 + $0xe8] sm:$0xff]  ;;  %v2279_v54 = vpack.c.bf16 %v68_v49, %v65_v48  ;;  %v64_v55 = vld [vmem:[%s3629_s1 + $0x120] sm:$0xff]  ;;  %v67_v56 = vld [vmem:[%s3629_s1 + $0x138] sm:$0xff] }
   0xe   :  { %2268 = vmatprep.subr.bf16.mxu0 %v2267_v22  ;;  %v71_v57 = vld [vmem:[%s3629_s1 + $0x158] sm:$0xff]  ;;  %v74_v58 = vld [vmem:[%s3629_s1 + $0x170] sm:$0xff]  ;;  %v2303_v59 = vpack.c.bf16 %v57_v52, %v54_v51  ;;  %v60_v60 = vld [vmem:[%s3629_s1 + $0x100] sm:$0xff]  ;;  %v2281_v62 = vpack.c.bf16 %v67_v56, %v64_v55 }
   0xf   :  { %2294 = vmatpush3.bf16.msra.mxu1 %v2291_v33  ;;  %v63_v61 = vld [vmem:[%s3629_s1 + $0x118] sm:$0xff]  ;;  %v2283_v63 = vpack.c.bf16 %v74_v58, %v71_v57  ;;  %v70_v0 = vld [vmem:[%s3629_s1 + $0x150] sm:$0xff]  ;;  %v73_v1 = vld [vmem:[%s3629_s1 + $0x168] sm:$0xff] }
  0x10   :  { %2296 = vmatprep.subr.bf16.mxu1 %v2295_v41  ;;  %v336_v2 = vld [vmem:[%s3631_s2 + $0x8] sm:$0xff]  ;;  %v339_v4 = vld [vmem:[%s3631_s2 + $0x20] sm:$0xff]  ;;  %v2307_v5 = vpack.c.bf16 %v63_v61, %v60_v60  ;;  %v66_v6 = vld [vmem:[%s3629_s1 + $0x130] sm:$0xff]  ;;  %v2285_v8 = vpack.c.bf16 %v73_v1, %v70_v0 }
  0x11   :  { %2270 = vmatpush1.bf16.msra.mxu0 %v2269_v31  ;;  %v69_v7 = vld [vmem:[%s3629_s1 + $0x148] sm:$0xff]  ;;  %v3066_v9 = vpack.c.bf16 %v339_v4, %v336_v2  ;;  %v335_v10 = vld [vmem:[%s3631_s2] sm:$0xff]  ;;  %v338_v11 = vld [vmem:[%s3631_s2 + $0x18] sm:$0xff] }
  0x12   :  { %2272 = vmatprep.subr.bf16.mxu0 %v2271_v34  ;;  %v342_v12 = vld [vmem:[%s3631_s2 + $0x38] sm:$0xff]  ;;  %v345_v13 = vld [vmem:[%s3631_s2 + $0x50] sm:$0xff]  ;;  %v2311_v14 = vpack.c.bf16 %v69_v7, %v66_v6  ;;  %v72_v15 = vld [vmem:[%s3629_s1 + $0x160] sm:$0xff]  ;;  %v3086_v17 = vpack.c.bf16 %v338_v11, %v335_v10 }
  0x13   :  { %2298 = vmatpush3.bf16.msra.mxu1 %v2295_v41  ;;  %v75_v16 = vld [vmem:[%s3629_s1 + $0x178] sm:$0xff]  ;;  %v3089_v18 = vpack.c.bf16 %v345_v13, %v342_v12  ;;  %v341_v19 = vld [vmem:[%s3631_s2 + $0x30] sm:$0xff]  ;;  %v344_v20 = vld [vmem:[%s3631_s2 + $0x48] sm:$0xff] }
  0x14   :  { %2300 = vmatprep.subr.bf16.mxu1 %v2299_v50  ;;  %v348_v21 = vld [vmem:[%s3631_s2 + $0x68] sm:$0xff]  ;;  %v351_v22 = vld [vmem:[%s3631_s2 + $0x80] sm:$0xff]  ;;  %v2315_v23 = vpack.c.bf16 %v75_v16, %v72_v15  ;;  %v3109_v25 = vpack.c.bf16 %v344_v20, %v341_v19  ;;  %v350_v28 = vld [vmem:[%s3631_s2 + $0x78] sm:$0xff] }
  0x15   :  { %2274 = vmatpush1.bf16.msra.mxu0 %v2273_v42  ;;  %v21_v24 = vld [vmem:[%s3630_s0 + $0x8] sm:$0xff]  ;;  %v3112_v26 = vpack.c.bf16 %v351_v22, %v348_v21  ;;  %v347_v27 = vld [vmem:[%s3631_s2 + $0x60] sm:$0xff]  ;;  %v354_v29 = vld [vmem:[%s3631_s2 + $0x98] sm:$0xff] }
  0x16   :  { %2276 = vmatprep.subr.bf16.mxu0 %v2275_v45  ;;  %v357_v30 = vld [vmem:[%s3631_s2 + $0xb0] sm:$0xff]  ;;  %v340_v32 = vld [vmem:[%s3631_s2 + $0x28] sm:$0xff]  ;;  %v3137_v34 = vpack.c.bf16 %v350_v28, %v347_v27  ;;  %v363_v39 = vld [vmem:[%s3631_s2 + $0xe0] sm:$0xff] }
  0x17   :  { %2302 = vmatpush3.bf16.msra.mxu1 %v2299_v50  ;;  %v337_v31 = vld [vmem:[%s3631_s2 + $0x10] sm:$0xff]  ;;  %v3140_v35 = vpack.c.bf16 %v357_v30, %v354_v29  ;;  %v356_v37 = vld [vmem:[%s3631_s2 + $0xa8] sm:$0xff]  ;;  %v343_v42 = vld [vmem:[%s3631_s2 + $0x40] sm:$0xff] }
  0x18   :  { %2304 = vmatprep.subr.bf16.mxu1 %v2303_v59  ;;  %v22_v33 = vld [vmem:[%s3630_s0 + $0x10] sm:$0xff]  ;;  %v360_v38 = vld [vmem:[%s3631_s2 + $0xc8] sm:$0xff]  ;;  %v3155_v41 = vpack.c.bf16 %v340_v32, %v337_v31  ;;  %v346_v43 = vld [vmem:[%s3631_s2 + $0x58] sm:$0xff] }
  0x19   :  { %2278 = vmatpush1.bf16.msra.mxu0 %v2277_v53  ;;  %v23_v44 = vld [vmem:[%s3630_s0 + $0x18] sm:$0xff]  ;;  %v3171_v46 = vpack.c.bf16 %v363_v39, %v360_v38  ;;  %v359_v47 = vld [vmem:[%s3631_s2 + $0xc0] sm:$0xff]  ;;  %v369_v50 = vld [vmem:[%s3631_s2 + $0x110] sm:$0xff]  ;;  %v3186_v51 = vpack.c.bf16 %v346_v43, %v343_v42 }
  0x1a   :  { %2280 = vmatprep.subr.bf16.mxu0 %v2279_v54  ;;  %v362_v48 = vld [vmem:[%s3631_s2 + $0xd8] sm:$0xff]  ;;  %v349_v52 = vld [vmem:[%s3631_s2 + $0x70] sm:$0xff]  ;;  %v352_v53 = vld [vmem:[%s3631_s2 + $0x88] sm:$0xff] }
  0x1b   :  { %2306 = vmatpush3.bf16.msra.mxu1 %v2303_v59  ;;  %v366_v49 = vld [vmem:[%s3631_s2 + $0xf8] sm:$0xff]  ;;  %v24_v54 = vld [vmem:[%s3630_s0 + $0x20] sm:$0xff]  ;;  %v3200_v55 = vpack.c.bf16 %v362_v48, %v359_v47  ;;  %v365_v57 = vld [vmem:[%s3631_s2 + $0xf0] sm:$0xff]  ;;  %v3218_v61 = vpack.c.bf16 %v352_v53, %v349_v52 }
  0x1c   :  { %2308 = vmatprep.subr.bf16.mxu1 %v2307_v5  ;;  %v3203_v56 = vpack.c.bf16 %v369_v50, %v366_v49  ;;  %v368_v58 = vld [vmem:[%s3631_s2 + $0x108] sm:$0xff]  ;;  %v375_v60 = vld [vmem:[%s3631_s2 + $0x140] sm:$0xff]  ;;  %v26_v2 = vld [vmem:[%s3630_s0 + $0x30] sm:$0xff] }
  0x1d   :  { %2282 = vmatpush1.bf16.msra.mxu0 %v2281_v62  ;;  %v372_v59 = vld [vmem:[%s3631_s2 + $0x128] sm:$0xff]  ;;  %v355_v62 = vld [vmem:[%s3631_s2 + $0xa0] sm:$0xff]  ;;  %v3232_v1 = vpack.c.bf16 %v368_v58, %v365_v57  ;;  %v374_v6 = vld [vmem:[%s3631_s2 + $0x138] sm:$0xff] }
  0x1e   :  { %2284 = vmatprep.subr.bf16.mxu0 %v2283_v63  ;;  %v358_v63 = vld [vmem:[%s3631_s2 + $0xb8] sm:$0xff]  ;;  %v25_v0 = vld [vmem:[%s3630_s0 + $0x28] sm:$0xff]  ;;  %v3238_v4 = vpack.c.bf16 %v375_v60, %v372_v59  ;;  %v361_v11 = vld [vmem:[%s3631_s2 + $0xd0] sm:$0xff] }
  0x1f   :  { %2310 = vmatpush3.bf16.msra.mxu1 %v2307_v5  ;;  %v371_v5 = vld [vmem:[%s3631_s2 + $0x120] sm:$0xff]  ;;  %v378_v7 = vld [vmem:[%s3631_s2 + $0x158] sm:$0xff]  ;;  %v3253_v10 = vpack.c.bf16 %v358_v63, %v355_v62  ;;  %v364_v12 = vld [vmem:[%s3631_s2 + $0xe8] sm:$0xff] }
  0x20   :  { %2312 = vmatprep.subr.bf16.mxu1 %v2311_v14  ;;  %v3264_v13 = vpack.c.bf16 %v374_v6, %v371_v5  ;;  %v377_v16 = vld [vmem:[%s3631_s2 + $0x150] sm:$0xff]  ;;  %v380_v19 = vld [vmem:[%s3631_s2 + $0x168] sm:$0xff]  ;;  %v3279_v20 = vpack.c.bf16 %v364_v12, %v361_v11  ;;  %v367_v21 = vld [vmem:[%s3631_s2 + $0x100] sm:$0xff] }
  0x21   :  { %2286 = vmatpush1.bf16.msra.mxu0 %v2285_v8  ;;  %v381_v8 = vld [vmem:[%s3631_s2 + $0x170] sm:$0xff]  ;;  %v370_v22 = vld [vmem:[%s3631_s2 + $0x118] sm:$0xff]  ;;  %v376_v28 = vld [vmem:[%s3631_s2 + $0x148] sm:$0xff] }
  0x22   :  { %2320 = vmatprep.subr.bf16.mxu0 %v3066_v9  ;;  %v3270_v15 = vpack.c.bf16 %v381_v8, %v378_v7  ;;  %v373_v27 = vld [vmem:[%s3631_s2 + $0x130] sm:$0xff]  ;;  %v379_v30 = vld [vmem:[%s3631_s2 + $0x160] sm:$0xff]  ;;  %v382_v31 = vld [vmem:[%s3631_s2 + $0x178] sm:$0xff] }
  0x23   :  { %2314 = vmatpush3.bf16.msra.mxu1 %v2311_v14  ;;  %v27_v14 = vld [vmem:[%s3630_s0 + $0x38] sm:$0xff]  ;;  %v3309_v29 = vpack.c.bf16 %v376_v28, %v373_v27  ;;  %v3323_v32 = vpack.c.bf16 %v382_v31, %v379_v30  ;;  %v76_v38 = vld [vmem:[%s3632_s3] sm:$0x7] }
  0x24   :  { %158 = vmatmul.mubr.f32.vlgmr.msra.gmra.mrb[0].mxu0 %v2991_v36  ;;  %2316 = vmatprep.subr.bf16.mxu1 %v2315_v23  ;;  %v353_v36 = vld [vmem:[%s3631_s2 + $0x90] sm:$0xff]  ;;  %v3387_v28 = vld [vmem:[%s3633_s4] ss:$0 sm:$0xff] }
  0x25   :  { %2322 = vmatpush1.bf16.msra.mxu0 %v3086_v17  ;;  %163 = vmatprep.mubr.f32.mxu0 %v2882_v3  ;;  %v3168_v45 = vpack.c.bf16 %v356_v37, %v353_v36 }
  0x26   :  { %2324 = vmatprep.subr.bf16.mxu0 %v3089_v18 }
  0x27   :  { %2318 = vmatpush3.bf16.msra.mxu1 %v2315_v23  ;;  %v3292_v23 = vpack.c.bf16 %v380_v19, %v377_v16 }
  0x28   :  { %164 = vmatmul.mubr.f32.gmra.mrb[2].mxu0 %v21_v24  ;;  %2351 = vmatprep.subr.bf16.mxu1 %v2883_v40 }
  0x29   :  { %2326 = vmatpush1.bf16.msra.mxu0 %v3109_v25  ;;  %169 = vmatprep.mubr.f32.mxu0 %v2882_v3 }
  0x2a   :  { %2328 = vmatprep.subr.bf16.mxu0 %v3112_v26  ;;  %1964 = vmatmul.mubr.f32.vlgmr.msra.gmra.mrb[0].mxu1 %v21_v24  ;;  %v3296_v24 = vpack.c.bf16 %v370_v22, %v367_v21 }
  0x2b   :  { %2353 = vmatpush3.bf16.msra.mxu1 %v3155_v41  ;;  %1966 = vmatprep.mubr.f32.mxu1 %v22_v33 }
  0x2c   :  { %170 = vmatmul.mubr.f32.gmra.mrb[4].mxu0 %v22_v33  ;;  %2354 = vmatprep.subr.bf16.mxu1 %v2883_v40  ;;  %v78_v33 = vlaneseq }
  0x2d   :  { %2330 = vmatpush1.bf16.msra.mxu0 %v3137_v34  ;;  %175 = vmatprep.mubr.f32.mxu0 %v2882_v3 }
  0x2e   :  { %2332 = vmatprep.subr.bf16.mxu0 %v3140_v35  ;;  %1967 = vmatmul.mubr.f32.gmra.mrb[2].mxu1 %v23_v44  ;;  %v79_v36 = vshrl.u32 %v78_v33, 7 }
  0x2f   :  { %2356 = vmatpush3.bf16.msra.mxu1 %v3186_v51  ;;  %1969 = vmatprep.mubr.f32.mxu1 %v24_v54 }
  0x30   :  { %176 = vmatmul.mubr.f32.gmra.mrb[6].mxu0 %v23_v44  ;;  %2357 = vmatprep.subr.bf16.mxu1 %v2883_v40  ;;  %v88_v37 = vsub.s32 2, %v79_v36  ;;  %v80_v63 = vsub.s32 0, %v79_v36 }
  0x31   :  { %2334 = vmatpush1.bf16.msra.mxu0 %v3168_v45  ;;  %181 = vmatprep.mubr.f32.mxu0 %v2882_v3 }
  0x32   :  { %2336 = vmatprep.subr.bf16.mxu0 %v3171_v46  ;;  %1970 = vmatmul.mubr.f32.gmra.mrb[4].mxu1 %v25_v0  ;;  %v89_v39 = vrot.slane %v76_v38, %v88_v37 }
  0x33   :  { %2359 = vmatpush3.bf16.msra.mxu1 %v3218_v61  ;;  %1972 = vmatprep.mubr.f32.mxu1 %v26_v2 }
  0x34   :  { %182 = vmatmul.mubr.f32.gmra.mrb[8].mxu0 %v24_v54  ;;  %2360 = vmatprep.subr.bf16.mxu1 %v2883_v40 }
  0x35   :  { %2338 = vmatpush1.bf16.msra.mxu0 %v3200_v55  ;;  %187 = vmatprep.mubr.f32.mxu0 %v2882_v3 }
  0x36   :  { %2340 = vmatprep.subr.bf16.mxu0 %v3203_v56  ;;  %1973 = vmatmul.mubr.f32.gmra.mrb[6].mxu1 %v27_v14 }
  0x37   :  { %2362 = vmatpush3.bf16.msra.mxu1 %v3253_v10  ;;  %2007 = vmatprep.mubr.msk.f32.mxu1 %vm2884_vm0, %v2882_v3 }
  0x38   :  { %188 = vmatmul.mubr.f32.gmra.mrb[10].mxu0 %v25_v0  ;;  %2363 = vmatprep.subr.bf16.mxu1 %v2883_v40  ;;  %v84_v0 = vsub.s32 1, %v79_v36 }
  0x39   :  { %2342 = vmatpush1.bf16.msra.mxu0 %v3232_v1  ;;  %193 = vmatprep.mubr.f32.mxu0 %v2882_v3 }
  0x3a   :  { %2344 = vmatprep.subr.bf16.mxu0 %v3238_v4  ;;  %v3380_v6 = vrot.slane %v76_v38, %v84_v0 }
  0x3b   :  { %2365 = vmatpush3.bf16.msra.mxu1 %v3279_v20 }
  0x3c   :  { %194 = vmatmul.mubr.f32.gmra.mrb[12].mxu0 %v26_v2  ;;  %2366 = vmatprep.subr.bf16.mxu1 %v2883_v40  ;;  %v3378_v2 = vrot.slane %v76_v38, %v80_v63 }
  0x3d   :  { %2346 = vmatpush1.bf16.msra.mxu0 %v3264_v13  ;;  %199 = vmatprep.mubr.f32.mxu0 %v2882_v3 }
  0x3e   :  { %2348 = vmatprep.subr.bf16.mxu0 %v3270_v15 }
  0x3f   :  { %2368 = vmatpush3.bf16.msra.mxu1 %v3296_v24 }
  0x40   :  { %200 = vmatmul.mubr.f32.gmra.mrb[14].mxu0 %v27_v14  ;;  %2369 = vmatprep.subr.bf16.mxu1 %v2883_v40 }
  0x41   :  { %2350 = vmatpush1.bf16.msra.mxu0 %v3292_v23  ;;  %454 = vmatprep.mubr.f32.mxu0 %v2882_v3 }
  0x42   :  { %2376 = vmatprep.subr.bf16.mxu0 %v3066_v9 }
  0x43   :  { %2371 = vmatpush3.bf16.msra.mxu1 %v3309_v29 }
  0x44   :  { %455 = vmatmul.mubr.f32.vlgmr.msra.gmra.mrb[0].mxu0 %v2882_v3  ;;  %2372 = vmatprep.subr.bf16.mxu1 %v2883_v40 }
  0x45   :  { %2378 = vmatpush1.bf16.msra.mxu0 %v3086_v17  ;;  %629 = vmatprep.mubr.f32.mxu0 %v2882_v3 }
  0x46   :  { %2380 = vmatprep.subr.bf16.mxu0 %v3089_v18 }
  0x47   :  { %2374 = vmatpush3.bf16.msra.mxu1 %v3323_v32 }
  0x48   :  { %2407 = vmatprep.subr.bf16.mxu1 %v2883_v40 }
  0x49   :  { %2382 = vmatpush1.bf16.msra.mxu0 %v3109_v25 }
  0x4a   :  { %2384 = vmatprep.subr.bf16.mxu0 %v3112_v26  ;;  %2008 = vmatmul.mubr.f32.vlgmr.msra.gmra.mrb[8].mxu1 %v2882_v3 }
  0x4b   :  { %2409 = vmatpush3.bf16.msra.mxu1 %v3155_v41  ;;  %2042 = vmatprep.mubr.msk.f32.mxu1 %vm2884_vm0, %v2882_v3 }
  0x4c   :  { %2410 = vmatprep.subr.bf16.mxu1 %v2883_v40 }
  0x4d   :  { %2386 = vmatpush1.bf16.msra.mxu0 %v3137_v34 }
  0x4e   :  { %2388 = vmatprep.subr.bf16.mxu0 %v3140_v35 }
  0x4f   :  { %2412 = vmatpush3.bf16.msra.mxu1 %v3186_v51 }
  0x50   :  { %2413 = vmatprep.subr.bf16.mxu1 %v2883_v40 }
  0x51   :  { %2390 = vmatpush1.bf16.msra.mxu0 %v3168_v45 }
  0x52   :  { %2392 = vmatprep.subr.bf16.mxu0 %v3171_v46 }
  0x53   :  { %2415 = vmatpush3.bf16.msra.mxu1 %v3218_v61 }
  0x54   :  { %2416 = vmatprep.subr.bf16.mxu1 %v2883_v40 }
  0x55   :  { %2394 = vmatpush1.bf16.msra.mxu0 %v3200_v55 }
  0x56   :  { %2396 = vmatprep.subr.bf16.mxu0 %v3203_v56 }
  0x57   :  { %2418 = vmatpush3.bf16.msra.mxu1 %v3253_v10 }
  0x58   :  { %2419 = vmatprep.subr.bf16.mxu1 %v2883_v40 }
  0x59   :  { %2398 = vmatpush1.bf16.msra.mxu0 %v3232_v1 }
  0x5a   :  { %2400 = vmatprep.subr.bf16.mxu0 %v3238_v4 }
  0x5b   :  { %2421 = vmatpush3.bf16.msra.mxu1 %v3279_v20 }
  0x5c   :  { %2422 = vmatprep.subr.bf16.mxu1 %v2883_v40 }
  0x5d   :  { %2402 = vmatpush1.bf16.msra.mxu0 %v3264_v13 }
  0x5e   :  { %2404 = vmatprep.subr.bf16.mxu0 %v3270_v15 }
  0x5f   :  { %2424 = vmatpush3.bf16.msra.mxu1 %v3296_v24 }
  0x60   :  { %2425 = vmatprep.subr.bf16.mxu1 %v2883_v40 }
  0x61   :  { %2406 = vmatpush1.bf16.msra.mxu0 %v3292_v23 }
  0x62   :  { %2432 = vmatprep.subr.bf16.mxu0 %v3066_v9 }
  0x63   :  { %2427 = vmatpush3.bf16.msra.mxu1 %v3309_v29 }
  0x64   :  { %2428 = vmatprep.subr.bf16.mxu1 %v2883_v40 }
  0x67   :  { %2430 = vmatpush3.bf16.msra.mxu1 %v3323_v32 }
  0x68   :  { %2463 = vmatprep.subr.bf16.mxu1 %v2883_v40 }
  0xfd   :  { %v1965_v42 = vpop.f32.mrb[0].mxu1 }
  0xfe   :  { %v3364_v43 = vadd.f32 %v1965_v42, %v89_v39  ;;  %v272_v44 = vpop.f32.mrb[1].mxu1 }
  0xff   :  { %v273_v36 = vadd.f32 %v272_v44, %v89_v39 }
 0x101   :  { %v1968_v47 = vpop.f32.mrb[2].mxu1 }
 0x102   :  { %v3366_v48 = vadd.f32 %v1968_v47, %v89_v39  ;;  %v282_v49 = vpop.f32.mrb[3].mxu1 }
 0x103   :  { %v3368_v50 = vadd.f32 %v282_v49, %v89_v39 }
 0x105   :  { %v1971_v52 = vpop.f32.mrb[4].mxu1 }
 0x106   :  { %v3370_v53 = vadd.f32 %v1971_v52, %v89_v39  ;;  %v292_v54 = vpop.f32.mrb[5].mxu1 }
 0x107   :  { %v3372_v57 = vadd.f32 %v292_v54, %v89_v39 }
 0x109   :  { %v1974_v58 = vpop.f32.mrb[6].mxu1 }
 0x10a   :  { %v3374_v59 = vadd.f32 %v1974_v58, %v89_v39  ;;  %v302_v60 = vpop.f32.mrb[7].mxu1 }
 0x10b   :  { %v3376_v62 = vadd.f32 %v302_v60, %v89_v39 }
 0x117   :  { %v456_v5 = vpop.f32.mrb[0].mxu0 }
 0x118   :  { %v2767_v7 = vadd.f32 %v456_v5, %v3378_v2  ;;  %v458_v8 = vpop.f32.mrb[1].mxu0 }
 0x119   :  { %v2768_v12 = vadd.f32 %v458_v8, %v3380_v6 }
 0x11a   :  { %v1754_v11 = vmul.f32 -1.442695, %v2767_v7 }
 0x11b   :  { %v1755_v14 = vmul.f32 -1.442695, %v2768_v12 }
 0x11c   :  { %2802 = vpow2.f32 %v1754_v11 }
 0x11d   :  { %v527_v16 = vpop.f32.mrb[8].mxu1  ;;  %2804 = vpow2.f32 %v1755_v14 }
 0x11e   :  { %v2009_v19 = vpop.f32.mrb[9].mxu1  ;;  %v551_v31 = vadd.f32 %v3387_v28, %v527_v16 }
 0x126   :  { %v2803_v21 = vpop.eup %2802 }
 0x127   :  { %v535_v22 = vadd.f32 1.0, %v2803_v21  ;;  %v2805_v27 = vpop.eup %2804 }
 0x128   :  { %v542_v30 = vadd.f32 1.0, %v2805_v27 }
 0x129   :  { %2806 = vrcp.f32 %v535_v22 }
 0x12a   :  { %2808 = vrcp.f32 %v542_v30 }
 0x133   :  { %v2807_v33 = vpop.eup %2806 }
 0x134   :  { %v552_v37 = vmul.f32 %v2807_v33, %v551_v31  ;;  %v2809_v42 = vpop.eup %2808 }
 0x135   :  { %v555_v47 = vsub.f32 1.0, %v2809_v42  ;;  %v557_v54 = vmul.f32 0.0, %v2809_v42 }
 0x136   :  { %v553_v38 = vadd.f32 %v552_v37, %v273_v36 }
 0x138   :  { %2810 = vtanh.f32 %v553_v38 }
 0x142   :  { %v2811_v49 = vpop.eup %2810 }
 0x143   :  { %v556_v52 = vmul.f32 %v2811_v49, %v555_v47 }
 0x145   :  { %v558_v58 = vadd.f32 %v557_v54, %v556_v52 }
 0x147   :  { %630 = vmatmul.mubr.f32.vlgmr.msra.gmra.mrb[2].mxu0 %v558_v58  ;;  %2043 = vmatmul.mubr.f32.vlgmr.msra.gmra.mrb[10].mxu1 %v558_v58 }
 0x148   :  { %2434 = vmatpush1.bf16.msra.mxu0 %v3086_v17  ;;  %2465 = vmatpush3.bf16.msra.mxu1 %v3155_v41 }
 0x149   :  { %2436 = vmatprep.subr.bf16.mxu0 %v3089_v18  ;;  %2466 = vmatprep.subr.bf16.mxu1 %v2883_v40 }
 0x14a   :  { %798 = vmatprep.mubr.f32.mxu0 %v2882_v3  ;;  %2077 = vmatprep.mubr.msk.f32.mxu1 %vm2884_vm0, %v2882_v3 }
 0x14c   :  { %2438 = vmatpush1.bf16.msra.mxu0 %v3109_v25  ;;  %2468 = vmatpush3.bf16.msra.mxu1 %v3186_v51 }
 0x14d   :  { %2440 = vmatprep.subr.bf16.mxu0 %v3112_v26  ;;  %2469 = vmatprep.subr.bf16.mxu1 %v2883_v40 }
 0x150   :  { %2442 = vmatpush1.bf16.msra.mxu0 %v3137_v34  ;;  %2471 = vmatpush3.bf16.msra.mxu1 %v3218_v61 }
 0x151   :  { %2444 = vmatprep.subr.bf16.mxu0 %v3140_v35  ;;  %2472 = vmatprep.subr.bf16.mxu1 %v2883_v40 }
 0x154   :  { %2446 = vmatpush1.bf16.msra.mxu0 %v3168_v45  ;;  %2474 = vmatpush3.bf16.msra.mxu1 %v3253_v10 }
 0x155   :  { %2448 = vmatprep.subr.bf16.mxu0 %v3171_v46  ;;  %2475 = vmatprep.subr.bf16.mxu1 %v2883_v40 }
 0x158   :  { %2450 = vmatpush1.bf16.msra.mxu0 %v3200_v55  ;;  %2477 = vmatpush3.bf16.msra.mxu1 %v3279_v20 }
 0x159   :  { %2452 = vmatprep.subr.bf16.mxu0 %v3203_v56  ;;  %2478 = vmatprep.subr.bf16.mxu1 %v2883_v40 }
 0x15c   :  { %2454 = vmatpush1.bf16.msra.mxu0 %v3232_v1  ;;  %2480 = vmatpush3.bf16.msra.mxu1 %v3296_v24 }
 0x15d   :  { %2456 = vmatprep.subr.bf16.mxu0 %v3238_v4  ;;  %2481 = vmatprep.subr.bf16.mxu1 %v2883_v40 }
 0x160   :  { %2458 = vmatpush1.bf16.msra.mxu0 %v3264_v13  ;;  %2483 = vmatpush3.bf16.msra.mxu1 %v3309_v29 }
 0x161   :  { %2460 = vmatprep.subr.bf16.mxu0 %v3270_v15  ;;  %2484 = vmatprep.subr.bf16.mxu1 %v2883_v40 }
 0x164   :  { %2462 = vmatpush1.bf16.msra.mxu0 %v3292_v23  ;;  %2486 = vmatpush3.bf16.msra.mxu1 %v3323_v32 }
 0x165   :  { %2488 = vmatprep.subr.bf16.mxu0 %v3066_v9  ;;  %2519 = vmatprep.subr.bf16.mxu1 %v2883_v40 }
 0x21a   :  { %v631_v39 = vpop.f32.mrb[2].mxu0  ;;  %v702_v44 = vpop.f32.mrb[10].mxu1 }
 0x21b   :  { %v2769_v60 = vadd.f32 %v631_v39, %v3378_v2  ;;  %v633_v63 = vpop.f32.mrb[3].mxu0  ;;  %v2044_v0 = vpop.f32.mrb[11].mxu1  ;;  %v720_v19 = vadd.f32 %v3387_v28, %v702_v44 }
 0x21c   :  { %v2770_v7 = vadd.f32 %v633_v63, %v3380_v6 }
 0x21d   :  { %v1757_v5 = vmul.f32 -1.442695, %v2769_v60 }
 0x21e   :  { %v1758_v8 = vmul.f32 -1.442695, %v2770_v7 }
 0x21f   :  { %2812 = vpow2.f32 %v1757_v5 }
 0x220   :  { %2814 = vpow2.f32 %v1758_v8 }
 0x229   :  { %v2813_v11 = vpop.eup %2812 }
 0x22a   :  { %v710_v12 = vadd.f32 1.0, %v2813_v11  ;;  %v2815_v14 = vpop.eup %2814 }
 0x22b   :  { %v717_v16 = vadd.f32 1.0, %v2815_v14 }
 0x22c   :  { %2816 = vrcp.f32 %v710_v12 }
 0x22d   :  { %2818 = vrcp.f32 %v717_v16 }
 0x236   :  { %v2817_v21 = vpop.eup %2816 }
 0x237   :  { %v721_v22 = vmul.f32 %v2817_v21, %v720_v19  ;;  %v2819_v30 = vpop.eup %2818 }
 0x238   :  { %v724_v31 = vsub.f32 1.0, %v2819_v30  ;;  %v726_v37 = vmul.f32 %v2819_v30, %v558_v58 }
 0x239   :  { %v722_v27 = vadd.f32 %v721_v22, %v3364_v43 }
 0x23b   :  { %2820 = vtanh.f32 %v722_v27 }
 0x245   :  { %v2821_v33 = vpop.eup %2820 }
 0x246   :  { %v725_v36 = vmul.f32 %v2821_v33, %v724_v31 }
 0x248   :  { %v727_v38 = vadd.f32 %v726_v37, %v725_v36 }
 0x24a   :  { %799 = vmatmul.mubr.f32.vlgmr.msra.gmra.mrb[4].mxu0 %v727_v38  ;;  %2078 = vmatmul.mubr.f32.vlgmr.msra.gmra.mrb[12].mxu1 %v727_v38 }
 0x24b   :  { %2490 = vmatpush1.bf16.msra.mxu0 %v3086_v17  ;;  %2521 = vmatpush3.bf16.msra.mxu1 %v3155_v41 }
 0x24c   :  { %2492 = vmatprep.subr.bf16.mxu0 %v3089_v18  ;;  %2522 = vmatprep.subr.bf16.mxu1 %v2883_v40 }
 0x24d   :  { %967 = vmatprep.mubr.f32.mxu0 %v2882_v3  ;;  %2112 = vmatprep.mubr.msk.f32.mxu1 %vm2884_vm0, %v2882_v3 }
 0x24f   :  { %2494 = vmatpush1.bf16.msra.mxu0 %v3109_v25  ;;  %2524 = vmatpush3.bf16.msra.mxu1 %v3186_v51 }
 0x250   :  { %2496 = vmatprep.subr.bf16.mxu0 %v3112_v26  ;;  %2525 = vmatprep.subr.bf16.mxu1 %v2883_v40 }
 0x253   :  { %2498 = vmatpush1.bf16.msra.mxu0 %v3137_v34  ;;  %2527 = vmatpush3.bf16.msra.mxu1 %v3218_v61 }
 0x254   :  { %2500 = vmatprep.subr.bf16.mxu0 %v3140_v35  ;;  %2528 = vmatprep.subr.bf16.mxu1 %v2883_v40 }
 0x257   :  { %2502 = vmatpush1.bf16.msra.mxu0 %v3168_v45  ;;  %2530 = vmatpush3.bf16.msra.mxu1 %v3253_v10 }
 0x258   :  { %2504 = vmatprep.subr.bf16.mxu0 %v3171_v46  ;;  %2531 = vmatprep.subr.bf16.mxu1 %v2883_v40 }
 0x25b   :  { %2506 = vmatpush1.bf16.msra.mxu0 %v3200_v55  ;;  %2533 = vmatpush3.bf16.msra.mxu1 %v3279_v20 }
 0x25c   :  { %2508 = vmatprep.subr.bf16.mxu0 %v3203_v56  ;;  %2534 = vmatprep.subr.bf16.mxu1 %v2883_v40 }
 0x25f   :  { %2510 = vmatpush1.bf16.msra.mxu0 %v3232_v1  ;;  %2536 = vmatpush3.bf16.msra.mxu1 %v3296_v24 }
 0x260   :  { %2512 = vmatprep.subr.bf16.mxu0 %v3238_v4  ;;  %2537 = vmatprep.subr.bf16.mxu1 %v2883_v40 }
 0x263   :  { %2514 = vmatpush1.bf16.msra.mxu0 %v3264_v13  ;;  %2539 = vmatpush3.bf16.msra.mxu1 %v3309_v29 }
 0x264   :  { %2516 = vmatprep.subr.bf16.mxu0 %v3270_v15  ;;  %2540 = vmatprep.subr.bf16.mxu1 %v2883_v40 }
 0x267   :  { %2518 = vmatpush1.bf16.msra.mxu0 %v3292_v23  ;;  %2542 = vmatpush3.bf16.msra.mxu1 %v3323_v32 }
 0x268   :  { %2544 = vmatprep.subr.bf16.mxu0 %v3066_v9  ;;  %2575 = vmatprep.subr.bf16.mxu1 %v2883_v40 }
 0x31d   :  { %v800_v43 = vpop.f32.mrb[4].mxu0  ;;  %v871_v42 = vpop.f32.mrb[12].mxu1 }
 0x31e   :  { %v2771_v47 = vadd.f32 %v800_v43, %v3378_v2  ;;  %v802_v49 = vpop.f32.mrb[5].mxu0  ;;  %v2079_v52 = vpop.f32.mrb[13].mxu1  ;;  %v889_v5 = vadd.f32 %v3387_v28, %v871_v42 }
 0x31f   :  { %v2772_v58 = vadd.f32 %v802_v49, %v3380_v6 }
 0x320   :  { %v1759_v54 = vmul.f32 -1.442695, %v2771_v47 }
 0x321   :  { %v1760_v39 = vmul.f32 -1.442695, %v2772_v58 }
 0x322   :  { %2822 = vpow2.f32 %v1759_v54 }
 0x323   :  { %2824 = vpow2.f32 %v1760_v39 }
 0x32c   :  { %v2823_v44 = vpop.eup %2822 }
 0x32d   :  { %v879_v60 = vadd.f32 1.0, %v2823_v44  ;;  %v2825_v63 = vpop.eup %2824 }
 0x32e   :  { %v886_v0 = vadd.f32 1.0, %v2825_v63 }
 0x32f   :  { %2826 = vrcp.f32 %v879_v60 }
 0x330   :  { %2828 = vrcp.f32 %v886_v0 }
 0x339   :  { %v2827_v7 = vpop.eup %2826 }
 0x33a   :  { %v890_v8 = vmul.f32 %v2827_v7, %v889_v5  ;;  %v2829_v12 = vpop.eup %2828 }
 0x33b   :  { %v893_v14 = vsub.f32 1.0, %v2829_v12  ;;  %v895_v21 = vmul.f32 %v2829_v12, %v727_v38 }
 0x33c   :  { %v891_v11 = vadd.f32 %v890_v8, %v3368_v50 }
 0x33e   :  { %2830 = vtanh.f32 %v891_v11 }
 0x348   :  { %v2831_v16 = vpop.eup %2830 }
 0x349   :  { %v894_v19 = vmul.f32 %v2831_v16, %v893_v14 }
 0x34b   :  { %v896_v22 = vadd.f32 %v895_v21, %v894_v19 }
 0x34d   :  { %968 = vmatmul.mubr.f32.vlgmr.msra.gmra.mrb[6].mxu0 %v896_v22  ;;  %2113 = vmatmul.mubr.f32.vlgmr.msra.gmra.mrb[14].mxu1 %v896_v22 }
 0x34e   :  { %2546 = vmatpush1.bf16.msra.mxu0 %v3086_v17  ;;  %2577 = vmatpush3.bf16.msra.mxu1 %v3155_v41 }
 0x34f   :  { %2548 = vmatprep.subr.bf16.mxu0 %v3089_v18  ;;  %2578 = vmatprep.subr.bf16.mxu1 %v2883_v40 }
 0x350   :  { %1136 = vmatprep.mubr.f32.mxu0 %v2882_v3  ;;  %2147 = vmatprep.mubr.msk.f32.mxu1 %vm2884_vm0, %v2882_v3 }
 0x352   :  { %2550 = vmatpush1.bf16.msra.mxu0 %v3109_v25  ;;  %2580 = vmatpush3.bf16.msra.mxu1 %v3186_v51 }
 0x353   :  { %2552 = vmatprep.subr.bf16.mxu0 %v3112_v26  ;;  %2581 = vmatprep.subr.bf16.mxu1 %v2883_v40 }
 0x356   :  { %2554 = vmatpush1.bf16.msra.mxu0 %v3137_v34  ;;  %2583 = vmatpush3.bf16.msra.mxu1 %v3218_v61 }
 0x357   :  { %2556 = vmatprep.subr.bf16.mxu0 %v3140_v35  ;;  %2584 = vmatprep.subr.bf16.mxu1 %v2883_v40 }
 0x35a   :  { %2558 = vmatpush1.bf16.msra.mxu0 %v3168_v45  ;;  %2586 = vmatpush3.bf16.msra.mxu1 %v3253_v10 }
 0x35b   :  { %2560 = vmatprep.subr.bf16.mxu0 %v3171_v46  ;;  %2587 = vmatprep.subr.bf16.mxu1 %v2883_v40 }
 0x35e   :  { %2562 = vmatpush1.bf16.msra.mxu0 %v3200_v55  ;;  %2589 = vmatpush3.bf16.msra.mxu1 %v3279_v20 }
 0x35f   :  { %2564 = vmatprep.subr.bf16.mxu0 %v3203_v56  ;;  %2590 = vmatprep.subr.bf16.mxu1 %v2883_v40 }
 0x362   :  { %2566 = vmatpush1.bf16.msra.mxu0 %v3232_v1  ;;  %2592 = vmatpush3.bf16.msra.mxu1 %v3296_v24 }
 0x363   :  { %2568 = vmatprep.subr.bf16.mxu0 %v3238_v4  ;;  %2593 = vmatprep.subr.bf16.mxu1 %v2883_v40 }
 0x366   :  { %2570 = vmatpush1.bf16.msra.mxu0 %v3264_v13  ;;  %2595 = vmatpush3.bf16.msra.mxu1 %v3309_v29 }
 0x367   :  { %2572 = vmatprep.subr.bf16.mxu0 %v3270_v15  ;;  %2596 = vmatprep.subr.bf16.mxu1 %v2883_v40 }
 0x36a   :  { %2574 = vmatpush1.bf16.msra.mxu0 %v3292_v23  ;;  %2598 = vmatpush3.bf16.msra.mxu1 %v3323_v32 }
 0x36b   :  { %2600 = vmatprep.subr.bf16.mxu0 %v3066_v9  ;;  %2631 = vmatprep.subr.bf16.mxu1 %v2883_v40 }
 0x420   :  { %v969_v50 = vpop.f32.mrb[6].mxu0  ;;  %v1040_v27 = vpop.f32.mrb[14].mxu1 }
 0x421   :  { %v2773_v30 = vadd.f32 %v969_v50, %v3378_v2  ;;  %v971_v31 = vpop.f32.mrb[7].mxu0  ;;  %v2114_v33 = vpop.f32.mrb[15].mxu1  ;;  %v1058_v52 = vadd.f32 %v3387_v28, %v1040_v27 }
 0x422   :  { %v2774_v37 = vadd.f32 %v971_v31, %v3380_v6 }
 0x423   :  { %v1761_v36 = vmul.f32 -1.442695, %v2773_v30 }
 0x424   :  { %v1762_v38 = vmul.f32 -1.442695, %v2774_v37 }
 0x425   :  { %2832 = vpow2.f32 %v1761_v36 }
 0x426   :  { %2834 = vpow2.f32 %v1762_v38 }
 0x42f   :  { %v2833_v43 = vpop.eup %2832 }
 0x430   :  { %v1048_v42 = vadd.f32 1.0, %v2833_v43  ;;  %v2835_v47 = vpop.eup %2834 }
 0x431   :  { %v1055_v49 = vadd.f32 1.0, %v2835_v47 }
 0x432   :  { %2836 = vrcp.f32 %v1048_v42 }
 0x433   :  { %2838 = vrcp.f32 %v1055_v49 }
 0x43c   :  { %v2837_v54 = vpop.eup %2836 }
 0x43d   :  { %v1059_v58 = vmul.f32 %v2837_v54, %v1058_v52  ;;  %v2839_v44 = vpop.eup %2838 }
 0x43e   :  { %v1062_v60 = vsub.f32 1.0, %v2839_v44  ;;  %v1064_v5 = vmul.f32 %v2839_v44, %v896_v22 }
 0x43f   :  { %v1060_v39 = vadd.f32 %v1059_v58, %v3366_v48 }
 0x441   :  { %2840 = vtanh.f32 %v1060_v39 }
 0x44b   :  { %v2841_v63 = vpop.eup %2840 }
 0x44c   :  { %v1063_v0 = vmul.f32 %v2841_v63, %v1062_v60 }
 0x44e   :  { %v1065_v7 = vadd.f32 %v1064_v5, %v1063_v0 }
 0x450   :  { %1137 = vmatmul.mubr.f32.vlgmr.msra.gmra.mrb[8].mxu0 %v1065_v7  ;;  %2148 = vmatmul.mubr.f32.vlgmr.msra.gmra.mrb[16].mxu1 %v1065_v7 }
 0x451   :  { %2602 = vmatpush1.bf16.msra.mxu0 %v3086_v17  ;;  %2633 = vmatpush3.bf16.msra.mxu1 %v3155_v41 }
 0x452   :  { %2604 = vmatprep.subr.bf16.mxu0 %v3089_v18  ;;  %2634 = vmatprep.subr.bf16.mxu1 %v2883_v40 }
 0x453   :  { %1305 = vmatprep.mubr.f32.mxu0 %v2882_v3  ;;  %2182 = vmatprep.mubr.msk.f32.mxu1 %vm2884_vm0, %v2882_v3 }
 0x455   :  { %2606 = vmatpush1.bf16.msra.mxu0 %v3109_v25  ;;  %2636 = vmatpush3.bf16.msra.mxu1 %v3186_v51 }
 0x456   :  { %2608 = vmatprep.subr.bf16.mxu0 %v3112_v26  ;;  %2637 = vmatprep.subr.bf16.mxu1 %v2883_v40 }
 0x459   :  { %2610 = vmatpush1.bf16.msra.mxu0 %v3137_v34  ;;  %2639 = vmatpush3.bf16.msra.mxu1 %v3218_v61 }
 0x45a   :  { %2612 = vmatprep.subr.bf16.mxu0 %v3140_v35  ;;  %2640 = vmatprep.subr.bf16.mxu1 %v2883_v40 }
 0x45d   :  { %2614 = vmatpush1.bf16.msra.mxu0 %v3168_v45  ;;  %2642 = vmatpush3.bf16.msra.mxu1 %v3253_v10 }
 0x45e   :  { %2616 = vmatprep.subr.bf16.mxu0 %v3171_v46  ;;  %2643 = vmatprep.subr.bf16.mxu1 %v2883_v40 }
 0x461   :  { %2618 = vmatpush1.bf16.msra.mxu0 %v3200_v55  ;;  %2645 = vmatpush3.bf16.msra.mxu1 %v3279_v20 }
 0x462   :  { %2620 = vmatprep.subr.bf16.mxu0 %v3203_v56  ;;  %2646 = vmatprep.subr.bf16.mxu1 %v2883_v40 }
 0x465   :  { %2622 = vmatpush1.bf16.msra.mxu0 %v3232_v1  ;;  %2648 = vmatpush3.bf16.msra.mxu1 %v3296_v24 }
 0x466   :  { %2624 = vmatprep.subr.bf16.mxu0 %v3238_v4  ;;  %2649 = vmatprep.subr.bf16.mxu1 %v2883_v40 }
 0x469   :  { %2626 = vmatpush1.bf16.msra.mxu0 %v3264_v13  ;;  %2651 = vmatpush3.bf16.msra.mxu1 %v3309_v29 }
 0x46a   :  { %2628 = vmatprep.subr.bf16.mxu0 %v3270_v15  ;;  %2652 = vmatprep.subr.bf16.mxu1 %v2883_v40 }
 0x46d   :  { %2630 = vmatpush1.bf16.msra.mxu0 %v3292_v23  ;;  %2654 = vmatpush3.bf16.msra.mxu1 %v3323_v32 }
 0x46e   :  { %2656 = vmatprep.subr.bf16.mxu0 %v3066_v9  ;;  %2687 = vmatprep.subr.bf16.mxu1 %v2883_v40 }
 0x523   :  { %v1138_v48 = vpop.f32.mrb[8].mxu0  ;;  %v1209_v8 = vpop.f32.mrb[16].mxu1 }
 0x524   :  { %v2775_v11 = vadd.f32 %v1138_v48, %v3378_v2  ;;  %v1140_v12 = vpop.f32.mrb[9].mxu0  ;;  %v2149_v14 = vpop.f32.mrb[17].mxu1  ;;  %v1227_v31 = vadd.f32 %v3387_v28, %v1209_v8 }
 0x525   :  { %v2776_v19 = vadd.f32 %v1140_v12, %v3380_v6 }
 0x526   :  { %v1763_v16 = vmul.f32 -1.442695, %v2775_v11 }
 0x527   :  { %v1764_v21 = vmul.f32 -1.442695, %v2776_v19 }
 0x528   :  { %2842 = vpow2.f32 %v1763_v16 }
 0x529   :  { %2844 = vpow2.f32 %v1764_v21 }
 0x532   :  { %v2843_v22 = vpop.eup %2842 }
 0x533   :  { %v1217_v50 = vadd.f32 1.0, %v2843_v22  ;;  %v2845_v27 = vpop.eup %2844 }
 0x534   :  { %v1224_v30 = vadd.f32 1.0, %v2845_v27 }
 0x535   :  { %2846 = vrcp.f32 %v1217_v50 }
 0x536   :  { %2848 = vrcp.f32 %v1224_v30 }
 0x53f   :  { %v2847_v33 = vpop.eup %2846 }
 0x540   :  { %v1228_v36 = vmul.f32 %v2847_v33, %v1227_v31  ;;  %v2849_v38 = vpop.eup %2848 }
 0x541   :  { %v1231_v43 = vsub.f32 1.0, %v2849_v38  ;;  %v1233_v49 = vmul.f32 %v2849_v38, %v1065_v7 }
 0x542   :  { %v1229_v37 = vadd.f32 %v1228_v36, %v3372_v57 }
 0x544   :  { %2850 = vtanh.f32 %v1229_v37 }
 0x54e   :  { %v2851_v42 = vpop.eup %2850 }
 0x54f   :  { %v1232_v47 = vmul.f32 %v2851_v42, %v1231_v43 }
 0x551   :  { %v1234_v52 = vadd.f32 %v1233_v49, %v1232_v47 }
 0x553   :  { %1306 = vmatmul.mubr.f32.vlgmr.msra.gmra.mrb[10].mxu0 %v1234_v52  ;;  %2183 = vmatmul.mubr.f32.vlgmr.msra.gmra.mrb[18].mxu1 %v1234_v52 }
 0x554   :  { %2658 = vmatpush1.bf16.msra.mxu0 %v3086_v17  ;;  %2689 = vmatpush3.bf16.msra.mxu1 %v3155_v41 }
 0x555   :  { %2660 = vmatprep.subr.bf16.mxu0 %v3089_v18  ;;  %2690 = vmatprep.subr.bf16.mxu1 %v2883_v40 }
 0x556   :  { %1474 = vmatprep.mubr.f32.mxu0 %v2882_v3  ;;  %2217 = vmatprep.mubr.msk.f32.mxu1 %vm2884_vm0, %v2882_v3 }
 0x558   :  { %2662 = vmatpush1.bf16.msra.mxu0 %v3109_v25  ;;  %2692 = vmatpush3.bf16.msra.mxu1 %v3186_v51 }
 0x559   :  { %2664 = vmatprep.subr.bf16.mxu0 %v3112_v26  ;;  %2693 = vmatprep.subr.bf16.mxu1 %v2883_v40 }
 0x55c   :  { %2666 = vmatpush1.bf16.msra.mxu0 %v3137_v34  ;;  %2695 = vmatpush3.bf16.msra.mxu1 %v3218_v61 }
 0x55d   :  { %2668 = vmatprep.subr.bf16.mxu0 %v3140_v35  ;;  %2696 = vmatprep.subr.bf16.mxu1 %v2883_v40 }
 0x560   :  { %2670 = vmatpush1.bf16.msra.mxu0 %v3168_v45  ;;  %2698 = vmatpush3.bf16.msra.mxu1 %v3253_v10 }
 0x561   :  { %2672 = vmatprep.subr.bf16.mxu0 %v3171_v46  ;;  %2699 = vmatprep.subr.bf16.mxu1 %v2883_v40 }
 0x564   :  { %2674 = vmatpush1.bf16.msra.mxu0 %v3200_v55  ;;  %2701 = vmatpush3.bf16.msra.mxu1 %v3279_v20 }
 0x565   :  { %2676 = vmatprep.subr.bf16.mxu0 %v3203_v56  ;;  %2702 = vmatprep.subr.bf16.mxu1 %v2883_v40 }
 0x568   :  { %2678 = vmatpush1.bf16.msra.mxu0 %v3232_v1  ;;  %2704 = vmatpush3.bf16.msra.mxu1 %v3296_v24 }
 0x569   :  { %2680 = vmatprep.subr.bf16.mxu0 %v3238_v4  ;;  %2705 = vmatprep.subr.bf16.mxu1 %v2883_v40 }
 0x56c   :  { %2682 = vmatpush1.bf16.msra.mxu0 %v3264_v13  ;;  %2707 = vmatpush3.bf16.msra.mxu1 %v3309_v29 }
 0x56d   :  { %2684 = vmatprep.subr.bf16.mxu0 %v3270_v15  ;;  %2708 = vmatprep.subr.bf16.mxu1 %v2883_v40 }
 0x570   :  { %2686 = vmatpush1.bf16.msra.mxu0 %v3292_v23  ;;  %2710 = vmatpush3.bf16.msra.mxu1 %v3323_v32 }
 0x571   :  { %2712 = vmatprep.subr.bf16.mxu0 %v3066_v9  ;;  %2743 = vmatprep.subr.bf16.mxu1 %v2883_v40 }
 0x626   :  { %v1307_v57 = vpop.f32.mrb[10].mxu0  ;;  %v1378_v54 = vpop.f32.mrb[18].mxu1 }
 0x627   :  { %v2777_v58 = vadd.f32 %v1307_v57, %v3378_v2  ;;  %v1309_v39 = vpop.f32.mrb[11].mxu0  ;;  %v2184_v44 = vpop.f32.mrb[19].mxu1  ;;  %v1396_v9 = vadd.f32 %v3387_v28, %v1378_v54 }
 0x628   :  { %v2778_v63 = vadd.f32 %v1309_v39, %v3380_v6 }
 0x629   :  { %v1765_v60 = vmul.f32 -1.442695, %v2777_v58 }
 0x62a   :  { %v1766_v0 = vmul.f32 -1.442695, %v2778_v63 }
 0x62b   :  { %2852 = vpow2.f32 %v1765_v60 }
 0x62c   :  { %2854 = vpow2.f32 %v1766_v0 }
 0x635   :  { %v2853_v5 = vpop.eup %2852 }
 0x636   :  { %v1386_v7 = vadd.f32 1.0, %v2853_v5  ;;  %v2855_v48 = vpop.eup %2854 }
 0x637   :  { %v1393_v8 = vadd.f32 1.0, %v2855_v48 }
 0x638   :  { %2856 = vrcp.f32 %v1386_v7 }
 0x639   :  { %2858 = vrcp.f32 %v1393_v8 }
 0x642   :  { %v2857_v11 = vpop.eup %2856 }
 0x643   :  { %v1397_v12 = vmul.f32 %v2857_v11, %v1396_v9  ;;  %v2859_v16 = vpop.eup %2858 }
 0x644   :  { %v1400_v19 = vsub.f32 1.0, %v2859_v16  ;;  %v1402_v50 = vmul.f32 %v2859_v16, %v1234_v52 }
 0x645   :  { %v1398_v14 = vadd.f32 %v1397_v12, %v3370_v53 }
 0x647   :  { %2860 = vtanh.f32 %v1398_v14 }
 0x651   :  { %v2861_v21 = vpop.eup %2860 }
 0x652   :  { %v1401_v22 = vmul.f32 %v2861_v21, %v1400_v19 }
 0x654   :  { %v1403_v27 = vadd.f32 %v1402_v50, %v1401_v22 }
 0x656   :  { %1475 = vmatmul.mubr.f32.vlgmr.msra.gmra.mrb[12].mxu0 %v1403_v27  ;;  %2218 = vmatmul.mubr.f32.vlgmr.msra.gmra.mrb[20].mxu1 %v1403_v27 }
 0x657   :  { %2714 = vmatpush1.bf16.msra.mxu0 %v3086_v17  ;;  %2745 = vmatpush3.bf16.msra.mxu1 %v3155_v41 }
 0x658   :  { %2716 = vmatprep.subr.bf16.mxu0 %v3089_v18  ;;  %2746 = vmatprep.subr.bf16.mxu1 %v2883_v40 }
 0x659   :  { %1643 = vmatprep.mubr.f32.mxu0 %v2882_v3  ;;  %2252 = vmatprep.mubr.msk.f32.mxu1 %vm2884_vm0, %v2882_v3 }
 0x65b   :  { %2718 = vmatpush1.bf16.msra.mxu0 %v3109_v25  ;;  %2748 = vmatpush3.bf16.msra.mxu1 %v3186_v51 }
 0x65c   :  { %2720 = vmatprep.subr.bf16.mxu0 %v3112_v26  ;;  %2749 = vmatprep.subr.bf16.mxu1 %v2883_v40 }
 0x65f   :  { %2722 = vmatpush1.bf16.msra.mxu0 %v3137_v34  ;;  %2751 = vmatpush3.bf16.msra.mxu1 %v3218_v61 }
 0x660   :  { %2724 = vmatprep.subr.bf16.mxu0 %v3140_v35  ;;  %2752 = vmatprep.subr.bf16.mxu1 %v2883_v40 }
 0x663   :  { %2726 = vmatpush1.bf16.msra.mxu0 %v3168_v45  ;;  %2754 = vmatpush3.bf16.msra.mxu1 %v3253_v10 }
 0x664   :  { %2728 = vmatprep.subr.bf16.mxu0 %v3171_v46  ;;  %2755 = vmatprep.subr.bf16.mxu1 %v2883_v40 }
 0x667   :  { %2730 = vmatpush1.bf16.msra.mxu0 %v3200_v55  ;;  %2757 = vmatpush3.bf16.msra.mxu1 %v3279_v20 }
 0x668   :  { %2732 = vmatprep.subr.bf16.mxu0 %v3203_v56  ;;  %2758 = vmatprep.subr.bf16.mxu1 %v2883_v40 }
 0x66b   :  { %2734 = vmatpush1.bf16.msra.mxu0 %v3232_v1  ;;  %2760 = vmatpush3.bf16.msra.mxu1 %v3296_v24 }
 0x66c   :  { %2736 = vmatprep.subr.bf16.mxu0 %v3238_v4  ;;  %2761 = vmatprep.subr.bf16.mxu1 %v2883_v40 }
 0x66f   :  { %2738 = vmatpush1.bf16.msra.mxu0 %v3264_v13  ;;  %2763 = vmatpush3.bf16.msra.mxu1 %v3309_v29 }
 0x670   :  { %2740 = vmatprep.subr.bf16.mxu0 %v3270_v15  ;;  %2764 = vmatprep.subr.bf16.mxu1 %v2883_v40 }
 0x673   :  { %2742 = vmatpush1.bf16.msra.mxu0 %v3292_v23  ;;  %2766 = vmatpush3.bf16.msra.mxu1 %v3323_v32 }
 0x729   :  { %v1476_v3 = vpop.f32.mrb[12].mxu0  ;;  %v1547_v17 = vpop.f32.mrb[20].mxu1 }
 0x72a   :  { %v2779_v18 = vadd.f32 %v1476_v3, %v3378_v2  ;;  %v1478_v25 = vpop.f32.mrb[13].mxu0  ;;  %v2219_v26 = vpop.f32.mrb[21].mxu1  ;;  %v1565_v55 = vadd.f32 %v3387_v28, %v1547_v17 }
 0x72b   :  { %v2780_v35 = vadd.f32 %v1478_v25, %v3380_v6 }
 0x72c   :  { %v1767_v34 = vmul.f32 -1.442695, %v2779_v18 }
 0x72d   :  { %v1768_v41 = vmul.f32 -1.442695, %v2780_v35 }
 0x72e   :  { %2862 = vpow2.f32 %v1767_v34 }
 0x72f   :  { %2864 = vpow2.f32 %v1768_v41 }
 0x738   :  { %v2863_v45 = vpop.eup %2862 }
 0x739   :  { %v1555_v46 = vadd.f32 1.0, %v2863_v45  ;;  %v2865_v40 = vpop.eup %2864 }
 0x73a   :  { %v1562_v51 = vadd.f32 1.0, %v2865_v40 }
 0x73b   :  { %2866 = vrcp.f32 %v1555_v46 }
 0x73c   :  { %2868 = vrcp.f32 %v1562_v51 }
 0x745   :  { %v2867_v56 = vpop.eup %2866 }
 0x746   :  { %v1566_v61 = vmul.f32 %v2867_v56, %v1565_v55  ;;  %v2869_v4 = vpop.eup %2868 }
 0x747   :  { %v1569_v10 = vsub.f32 1.0, %v2869_v4  ;;  %v1571_v20 = vmul.f32 %v2869_v4, %v1403_v27 }
 0x748   :  { %v1567_v1 = vadd.f32 %v1566_v61, %v3376_v62 }
 0x74a   :  { %2870 = vtanh.f32 %v1567_v1 }
 0x754   :  { %v2871_v13 = vpop.eup %2870 }
 0x755   :  { %v1570_v15 = vmul.f32 %v2871_v13, %v1569_v10 }
 0x757   :  { %v1572_v23 = vadd.f32 %v1571_v20, %v1570_v15 }
 0x759   :  { %1644 = vmatmul.mubr.f32.vlgmr.msra.gmra.mrb[14].mxu0 %v1572_v23  ;;  %2253 = vmatmul.mubr.f32.vlgmr.msra.gmra.mrb[22].mxu1 %v1572_v23 }
 0x82c   :  { %v1645_v24 = vpop.f32.mrb[14].mxu0  ;;  %v1716_v29 = vpop.f32.mrb[22].mxu1 }
 0x82d   :  { %v2781_v32 = vadd.f32 %v1645_v24, %v3378_v2  ;;  %v1647_v53 = vpop.f32.mrb[15].mxu0  ;;  %v2254_v30 = vpop.f32.mrb[23].mxu1  ;;  %v1734_v42 = vadd.f32 %v3387_v28, %v1716_v29 }
 0x82e   :  { %v2782_v33 = vadd.f32 %v1647_v53, %v3380_v6 }
 0x82f   :  { %v1769_v31 = vmul.f32 -1.442695, %v2781_v32 }
 0x830   :  { %v1770_v62 = vmul.f32 -1.442695, %v2782_v33 }
 0x831   :  { %2872 = vpow2.f32 %v1769_v31 }
 0x832   :  { %2874 = vpow2.f32 %v1770_v62 }
 0x83b   :  { %v2873_v36 = vpop.eup %2872 }
 0x83c   :  { %v1724_v37 = vadd.f32 1.0, %v2873_v36  ;;  %v2875_v38 = vpop.eup %2874 }
 0x83d   :  { %v1731_v43 = vadd.f32 1.0, %v2875_v38 }
 0x83e   :  { %2876 = vrcp.f32 %v1724_v37 }
 0x83f   :  { %2878 = vrcp.f32 %v1731_v43 }
 0x848   :  { %v2877_v47 = vpop.eup %2876 }
 0x849   :  { %v1735_v49 = vmul.f32 %v2877_v47, %v1734_v42  ;;  %v2879_v52 = vpop.eup %2878 }
 0x84a   :  { %v1738_v57 = vsub.f32 1.0, %v2879_v52  ;;  %v1740_v58 = vmul.f32 %v2879_v52, %v1572_v23 }
 0x84b   :  { %v1736_v2 = vadd.f32 %v1735_v49, %v3374_v59 }
 0x84d   :  { %2880 = vtanh.f32 %v1736_v2 }
 0x857   :  { %v2881_v54 = vpop.eup %2880 }
 0x858   :  { %v1739_v6 = vmul.f32 %v2881_v54, %v1738_v57 }
 0x85a   :  { %v1741_v39 = vadd.f32 %v1740_v58, %v1739_v6 }
 0x85c   :  { %1742 = vst [vmem:[%s3634_s5] sm:$0xff] %v1741_v39 }

// kernel: _seq2seq_forward_jit.3
= control target key start
LH: loop header
LB: loop body
LE: loop exit
PB: predicated region body
PF: predicated region fallthrough
CT: control target
= control target key end

     0   :  { %s7978_s0 = inlined_call_operand.vmem [shape: s32[7], index: 0, kind: input, shape index: {}]   ;;  %s7979_s1 = inlined_call_operand.vmem [shape: f32[56,128], index: 1, kind: input, shape index: {}]   ;;  %s7980_s2 = inlined_call_operand.vmem [shape: f32[8,128], index: 2, kind: input, shape index: {}]   ;;  %s7981_s3 = inlined_call_operand.vmem [shape: f32[128,384], index: 3, kind: input, shape index: {}]   ;;  %s7982_s4 = inlined_call_operand.vmem [shape: f32[128,384], index: 4, kind: input, shape index: {}]   ;;  %s7983_s5 = inlined_call_operand.vmem [shape: f32[1,384], index: 5, kind: input, shape index: {}]   ;;  %s7984_s6 = inlined_call_operand.vmem [shape: f32[1,128], index: 6, kind: input, shape index: {}]   ;;  %s7985_s7 = inlined_call_operand.vmem [shape: f32[128,128], index: 7, kind: input, shape index: {}]   ;;  %s7986_s8 = inlined_call_operand.vmem [shape: f32[1,128], index: 8, kind: input, shape index: {}]   ;;  %s7987_s9 = inlined_call_operand.vmem [shape: f32[128,384], index: 9, kind: input, shape index: {}]   ;;  %s7988_s10 = inlined_call_operand.vmem [shape: f32[56,128], index: 10, kind: output, shape index: {}]  }
   0x1   :  { %s15_s15 = sshll.u32 %s7978_s0, 4  ;;  %s16_s15 = int_to_ptr.vmem [resolvable:$true] %s15_s15 }
   0x2   :  { %s5830_s16 = scalar_lea.vmem %s16_s15, 16  ;;  %p5835_p1 = scmp.lt.s32.totalorder %s16_s15, %s16_s15 }
   0x3   :  { %p5831_p0 = scmp.ne.s32.totalorder %s16_s15, %s5830_s16  ;;  %p5836_p2 = scmp.lt.s32.totalorder %s5830_s16, %s5830_s16 }
   0x5   :  { %p5837_p3 = por %p5836_p2, %p5835_p1 }
   0x7   :  { %p5838_p4 = pnand %p5837_p3, %p5831_p0 }
   0x9   :  { %5841 = shalt.err (!%p5838_p4)  }
   0xa   :  { %s5844_s17 = smov [#allocation5]  }
   0xb   :  { %18 = dma.vmem_to_smem %s16_s15, 16, %s5844_s17, [#allocation4] }
   0xc   :  { %5842 = dma.done.wait [#allocation4], 16 }
   0xd   :  { %5843 = vsyncadd [#allocation4], 4294967280 }
   0xe   :  { %20 = sfence }
   0xf   :  { %v47_v0 = vld [vmem:[%s7981_s3 + $0x8] sm:$0xff]  ;;  %v50_v1 = vld [vmem:[%s7981_s3 + $0x20] sm:$0xff]  ;;  %v49_v4 = vld [vmem:[%s7981_s3 + $0x18] sm:$0xff]  ;;  %v5845_v7 = vmov 0.0|0.0   ;;  %v5846_v8 = vmov 0.0   ;;  %vm5847_vm0 = vmmov 0   ;;  %v96_v63 = vlaneseq }
  0x10   :  { %v46_v2 = vld [vmem:[%s7981_s3] sm:$0xff]  ;;  %v4772_v3 = vpack.c.bf16 %v50_v1, %v47_v0  ;;  %v53_v5 = vld [vmem:[%s7981_s3 + $0x38] sm:$0xff]  ;;  %v56_v6 = vld [vmem:[%s7981_s3 + $0x50] sm:$0xff]  ;;  %4804 = vmatprep.subr.bf16.mxu1 %v5845_v7  ;;  %175 = vmatprep.mubr.f32.mxu0 %v5846_v8  ;;  %339 = vst [vmem:[#allocation3] sm:$0xff] %v5846_v8 }
  0x11   :  { %340 = vst [vmem:[#allocation3 + $0x8] sm:$0xff] %v5846_v8  ;;  %341 = vst [vmem:[#allocation3 + $0x10] sm:$0xff] %v5846_v8  ;;  %v4774_v9 = vpack.c.bf16 %v49_v4, %v46_v2  ;;  %v4776_v10 = vpack.c.bf16 %v56_v6, %v53_v5  ;;  %v52_v11 = vld [vmem:[%s7981_s3 + $0x30] sm:$0xff]  ;;  %v55_v12 = vld [vmem:[%s7981_s3 + $0x48] sm:$0xff]  ;;  %4051 = vmatprep.mubr.msk.f32.mxu1 %vm5847_vm0, %v5846_v8 }
  0x12   :  { %v59_v13 = vld [vmem:[%s7981_s3 + $0x68] sm:$0xff]  ;;  %4773 = vmatprep.subr.bf16.mxu0 %v4772_v3  ;;  %v62_v14 = vld [vmem:[%s7981_s3 + $0x80] sm:$0xff]  ;;  %v4778_v15 = vpack.c.bf16 %v55_v12, %v52_v11  ;;  %v61_v18 = vld [vmem:[%s7981_s3 + $0x78] sm:$0xff] }
  0x13   :  { %4775 = vmatpush1.bf16.msra.mxu0 %v4774_v9  ;;  %v4780_v16 = vpack.c.bf16 %v62_v14, %v59_v13  ;;  %v58_v17 = vld [vmem:[%s7981_s3 + $0x60] sm:$0xff]  ;;  %v65_v19 = vld [vmem:[%s7981_s3 + $0x98] sm:$0xff]  ;;  %v68_v20 = vld [vmem:[%s7981_s3 + $0xb0] sm:$0xff] }
  0x14   :  { %4777 = vmatprep.subr.bf16.mxu0 %v4776_v10  ;;  %v4782_v21 = vpack.c.bf16 %v61_v18, %v58_v17  ;;  %v64_v22 = vld [vmem:[%s7981_s3 + $0x90] sm:$0xff]  ;;  %v4784_v23 = vpack.c.bf16 %v68_v20, %v65_v19  ;;  %v67_v24 = vld [vmem:[%s7981_s3 + $0xa8] sm:$0xff]  ;;  %v74_v28 = vld [vmem:[%s7981_s3 + $0xe0] sm:$0xff]  ;;  %v6085_v10 = vshrl.u32 %v96_v63, 7 }
  0x15   :  { %v48_v25 = vld [vmem:[%s7981_s3 + $0x10] sm:$0xff]  ;;  %v51_v26 = vld [vmem:[%s7981_s3 + $0x28] sm:$0xff]  ;;  %v54_v30 = vld [vmem:[%s7981_s3 + $0x40] sm:$0xff]  ;;  %v4786_v32 = vpack.c.bf16 %v67_v24, %v64_v22 }
  0x16   :  { %v71_v27 = vld [vmem:[%s7981_s3 + $0xc8] sm:$0xff]  ;;  %v4805_v29 = vpack.c.bf16 %v51_v26, %v48_v25  ;;  %v57_v31 = vld [vmem:[%s7981_s3 + $0x58] sm:$0xff]  ;;  %v6006_v34 = vld [vmem:[%s7983_s5] sm:$0x7]  ;;  %v6114_v20 = vsub.s32 0, %v6085_v10 }
  0x17   :  { %4779 = vmatpush1.bf16.msra.mxu0 %v4778_v15  ;;  %v4808_v33 = vpack.c.bf16 %v57_v31, %v54_v30  ;;  %v4788_v35 = vpack.c.bf16 %v74_v28, %v71_v27  ;;  %v70_v36 = vld [vmem:[%s7981_s3 + $0xc0] sm:$0xff]  ;;  %v73_v37 = vld [vmem:[%s7981_s3 + $0xd8] sm:$0xff]  ;;  %v80_v39 = vld [vmem:[%s7981_s3 + $0x110] sm:$0xff] }
  0x18   :  { %4781 = vmatprep.subr.bf16.mxu0 %v4780_v16  ;;  %4806 = vmatpush3.bf16.msra.mxu1 %v4805_v29  ;;  %v77_v38 = vld [vmem:[%s7981_s3 + $0xf8] sm:$0xff]  ;;  %v60_v40 = vld [vmem:[%s7981_s3 + $0x70] sm:$0xff]  ;;  %v63_v41 = vld [vmem:[%s7981_s3 + $0x88] sm:$0xff]  ;;  %v4790_v42 = vpack.c.bf16 %v73_v37, %v70_v36 }
  0x19   :  { %4807 = vmatprep.subr.bf16.mxu1 %v5845_v7  ;;  %v76_v43 = vld [vmem:[%s7981_s3 + $0xf0] sm:$0xff]  ;;  %v4811_v44 = vpack.c.bf16 %v63_v41, %v60_v40  ;;  %v4792_v45 = vpack.c.bf16 %v80_v39, %v77_v38  ;;  %v79_v46 = vld [vmem:[%s7981_s3 + $0x108] sm:$0xff]  ;;  %v66_v47 = vld [vmem:[%s7981_s3 + $0xa0] sm:$0xff] }
  0x1a   :  { %v69_v48 = vld [vmem:[%s7981_s3 + $0xb8] sm:$0xff]  ;;  %v83_v49 = vld [vmem:[%s7981_s3 + $0x128] sm:$0xff]  ;;  %v86_v50 = vld [vmem:[%s7981_s3 + $0x140] sm:$0xff]  ;;  %v4794_v51 = vpack.c.bf16 %v79_v46, %v76_v43 }
  0x1b   :  { %4783 = vmatpush1.bf16.msra.mxu0 %v4782_v21  ;;  %v82_v52 = vld [vmem:[%s7981_s3 + $0x120] sm:$0xff]  ;;  %v4814_v53 = vpack.c.bf16 %v69_v48, %v66_v47  ;;  %v4796_v54 = vpack.c.bf16 %v86_v50, %v83_v49  ;;  %v85_v55 = vld [vmem:[%s7981_s3 + $0x138] sm:$0xff]  ;;  %v72_v56 = vld [vmem:[%s7981_s3 + $0xd0] sm:$0xff] }
  0x1c   :  { %4785 = vmatprep.subr.bf16.mxu0 %v4784_v23  ;;  %4809 = vmatpush3.bf16.msra.mxu1 %v4808_v33  ;;  %v75_v57 = vld [vmem:[%s7981_s3 + $0xe8] sm:$0xff]  ;;  %v89_v58 = vld [vmem:[%s7981_s3 + $0x158] sm:$0xff]  ;;  %v92_v59 = vld [vmem:[%s7981_s3 + $0x170] sm:$0xff]  ;;  %v4798_v60 = vpack.c.bf16 %v85_v55, %v82_v52 }
  0x1d   :  { %4810 = vmatprep.subr.bf16.mxu1 %v5845_v7  ;;  %v88_v61 = vld [vmem:[%s7981_s3 + $0x150] sm:$0xff]  ;;  %v4817_v62 = vpack.c.bf16 %v75_v57, %v72_v56  ;;  %v4800_v0 = vpack.c.bf16 %v92_v59, %v89_v58  ;;  %v91_v1 = vld [vmem:[%s7981_s3 + $0x168] sm:$0xff]  ;;  %v78_v2 = vld [vmem:[%s7981_s3 + $0x100] sm:$0xff] }
  0x1e   :  { %v81_v3 = vld [vmem:[%s7981_s3 + $0x118] sm:$0xff]  ;;  %v343_v4 = vld [vmem:[%s7982_s4 + $0x8] sm:$0xff]  ;;  %v346_v5 = vld [vmem:[%s7982_s4 + $0x20] sm:$0xff]  ;;  %v4802_v6 = vpack.c.bf16 %v91_v1, %v88_v61 }
  0x1f   :  { %4787 = vmatpush1.bf16.msra.mxu0 %v4786_v32  ;;  %v4820_v9 = vpack.c.bf16 %v81_v3, %v78_v2  ;;  %v6087_v11 = vpack.c.bf16 %v346_v5, %v343_v4  ;;  %v342_v12 = vld [vmem:[%s7982_s4] sm:$0xff]  ;;  %v345_v13 = vld [vmem:[%s7982_s4 + $0x18] sm:$0xff]  ;;  %v352_v15 = vld [vmem:[%s7982_s4 + $0x50] sm:$0xff] }
  0x20   :  { %4789 = vmatprep.subr.bf16.mxu0 %v4788_v35  ;;  %4812 = vmatpush3.bf16.msra.mxu1 %v4811_v44  ;;  %v349_v14 = vld [vmem:[%s7982_s4 + $0x38] sm:$0xff]  ;;  %v84_v16 = vld [vmem:[%s7981_s3 + $0x130] sm:$0xff]  ;;  %v87_v17 = vld [vmem:[%s7981_s3 + $0x148] sm:$0xff]  ;;  %v6111_v19 = vpack.c.bf16 %v345_v13, %v342_v12 }
  0x21   :  { %4813 = vmatprep.subr.bf16.mxu1 %v5845_v7  ;;  %v39_v18 = vld [vmem:[%s7979_s1] sm:$0xff]  ;;  %v6117_v21 = vpack.c.bf16 %v352_v15, %v349_v14  ;;  %v348_v22 = vld [vmem:[%s7982_s4 + $0x30] sm:$0xff]  ;;  %v351_v23 = vld [vmem:[%s7982_s4 + $0x48] sm:$0xff]  ;;  %v4823_v25 = vpack.c.bf16 %v87_v17, %v84_v16 }
  0x22   :  { %v355_v24 = vld [vmem:[%s7982_s4 + $0x68] sm:$0xff]  ;;  %v358_v26 = vld [vmem:[%s7982_s4 + $0x80] sm:$0xff]  ;;  %v93_v28 = vld [vmem:[%s7981_s3 + $0x178] sm:$0xff]  ;;  %v6144_v30 = vpack.c.bf16 %v351_v23, %v348_v22 }
  0x23   :  { %4791 = vmatpush1.bf16.msra.mxu0 %v4790_v42  ;;  %v90_v27 = vld [vmem:[%s7981_s3 + $0x160] sm:$0xff]  ;;  %v40_v31 = vld [vmem:[%s7979_s1 + $0x8] sm:$0xff]  ;;  %v6155_v33 = vpack.c.bf16 %v358_v26, %v355_v24  ;;  %v357_v36 = vld [vmem:[%s7982_s4 + $0x78] sm:$0xff] }
  0x24   :  { %4793 = vmatprep.subr.bf16.mxu0 %v4792_v45  ;;  %4815 = vmatpush3.bf16.msra.mxu1 %v4814_v53  ;;  %v6141_v29 = vld [vmem:[%s7983_s5] sm:$0x7]  ;;  %v4826_v37 = vpack.c.bf16 %v93_v28, %v90_v27  ;;  %v361_v38 = vld [vmem:[%s7982_s4 + $0x98] sm:$0xff]  ;;  %v364_v39 = vld [vmem:[%s7982_s4 + $0xb0] sm:$0xff] }
  0x25   :  { %4816 = vmatprep.subr.bf16.mxu1 %v5845_v7  ;;  %v6152_v32 = vrot.slane %v6141_v29, %v6114_v20  ;;  %v354_v35 = vld [vmem:[%s7982_s4 + $0x60] sm:$0xff]  ;;  %v344_v40 = vld [vmem:[%s7982_s4 + $0x10] sm:$0xff]  ;;  %v347_v41 = vld [vmem:[%s7982_s4 + $0x28] sm:$0xff]  ;;  %v6184_v44 = vpack.c.bf16 %v364_v39, %v361_v38 }
  0x26   :  { %v6177_v42 = vpack.c.bf16 %v357_v36, %v354_v35  ;;  %v41_v43 = vld [vmem:[%s7979_s1 + $0x10] sm:$0xff]  ;;  %v363_v46 = vld [vmem:[%s7982_s4 + $0xa8] sm:$0xff]  ;;  %v370_v48 = vld [vmem:[%s7982_s4 + $0xe0] sm:$0xff]  ;;  %v6199_v49 = vpack.c.bf16 %v347_v41, %v344_v40 }
  0x27   :  { %4795 = vmatpush1.bf16.msra.mxu0 %v4794_v51  ;;  %v360_v45 = vld [vmem:[%s7982_s4 + $0x90] sm:$0xff]  ;;  %v367_v47 = vld [vmem:[%s7982_s4 + $0xc8] sm:$0xff]  ;;  %v350_v50 = vld [vmem:[%s7982_s4 + $0x40] sm:$0xff] }
  0x28   :  { %4797 = vmatprep.subr.bf16.mxu0 %v4796_v54  ;;  %4818 = vmatpush3.bf16.msra.mxu1 %v4817_v62  ;;  %v353_v51 = vld [vmem:[%s7982_s4 + $0x58] sm:$0xff]  ;;  %v6208_v52 = vpack.c.bf16 %v363_v46, %v360_v45  ;;  %v6215_v54 = vpack.c.bf16 %v370_v48, %v367_v47  ;;  %v366_v55 = vld [vmem:[%s7982_s4 + $0xc0] sm:$0xff]  ;;  %v376_v58 = vld [vmem:[%s7982_s4 + $0x110] sm:$0xff] }
  0x29   :  { %4819 = vmatprep.subr.bf16.mxu1 %v5845_v7  ;;  %v42_v53 = vld [vmem:[%s7979_s1 + $0x18] sm:$0xff]  ;;  %v6230_v59 = vpack.c.bf16 %v353_v51, %v350_v50  ;;  %v359_v61 = vld [vmem:[%s7982_s4 + $0x88] sm:$0xff]  ;;  %v372_v2 = vld [vmem:[%s7982_s4 + $0xf0] sm:$0xff]  ;;  %v6385_v51 = vsub.s32 1, %v6085_v10 }
  0x2a   :  { %v369_v56 = vld [vmem:[%s7982_s4 + $0xd8] sm:$0xff]  ;;  %v375_v3 = vld [vmem:[%s7982_s4 + $0x108] sm:$0xff]  ;;  %v382_v5 = vld [vmem:[%s7982_s4 + $0x140] sm:$0xff] }
  0x2b   :  { %4799 = vmatpush1.bf16.msra.mxu0 %v4798_v60  ;;  %v373_v57 = vld [vmem:[%s7982_s4 + $0xf8] sm:$0xff]  ;;  %v356_v60 = vld [vmem:[%s7982_s4 + $0x70] sm:$0xff]  ;;  %v6242_v62 = vpack.c.bf16 %v369_v56, %v366_v55  ;;  %v379_v4 = vld [vmem:[%s7982_s4 + $0x128] sm:$0xff]  ;;  %v6276_v13 = vpack.c.bf16 %v375_v3, %v372_v2 }
  0x2c   :  { %4801 = vmatprep.subr.bf16.mxu0 %v4800_v0  ;;  %4821 = vmatpush3.bf16.msra.mxu1 %v4820_v9  ;;  %v43_v0 = vld [vmem:[%s7979_s1 + $0x20] sm:$0xff]  ;;  %v6249_v1 = vpack.c.bf16 %v376_v58, %v373_v57  ;;  %v365_v12 = vld [vmem:[%s7982_s4 + $0xb8] sm:$0xff]  ;;  %v44_v14 = vld [vmem:[%s7979_s1 + $0x28] sm:$0xff]  ;;  %v6283_v15 = vpack.c.bf16 %v382_v5, %v379_v4 }
  0x2d   :  { %4822 = vmatprep.subr.bf16.mxu1 %v5845_v7  ;;  %v362_v9 = vld [vmem:[%s7982_s4 + $0xa0] sm:$0xff]  ;;  %v381_v17 = vld [vmem:[%s7982_s4 + $0x138] sm:$0xff]  ;;  %v388_v22 = vld [vmem:[%s7982_s4 + $0x170] sm:$0xff] }
  0x2e   :  { %v378_v16 = vld [vmem:[%s7982_s4 + $0x120] sm:$0xff]  ;;  %v6298_v23 = vpack.c.bf16 %v365_v12, %v362_v9  ;;  %v368_v24 = vld [vmem:[%s7982_s4 + $0xd0] sm:$0xff]  ;;  %v387_v35 = vld [vmem:[%s7982_s4 + $0x168] sm:$0xff] }
  0x2f   :  { %4803 = vmatpush1.bf16.msra.mxu0 %v4802_v6  ;;  %v6264_v6 = vpack.c.bf16 %v359_v61, %v356_v60  ;;  %v6310_v26 = vpack.c.bf16 %v381_v17, %v378_v16  ;;  %v45_v27 = vld [vmem:[%s7979_s1 + $0x30] sm:$0xff]  ;;  %v377_v38 = vld [vmem:[%s7982_s4 + $0x118] sm:$0xff]  ;;  %v6358_v45 = vld [vmem:[%s7980_s2] sm:$0xff] }
  0x30   :  { %4829 = vmatprep.subr.bf16.mxu0 %v6087_v11  ;;  %4824 = vmatpush3.bf16.msra.mxu1 %v4823_v25  ;;  %v371_v25 = vld [vmem:[%s7982_s4 + $0xe8] sm:$0xff]  ;;  %v380_v41 = vld [vmem:[%s7982_s4 + $0x130] sm:$0xff]  ;;  %v386_v47 = vld [vmem:[%s7982_s4 + $0x160] sm:$0xff] }
  0x31   :  { %4825 = vmatprep.subr.bf16.mxu1 %v5845_v7  ;;  %v6326_v36 = vpack.c.bf16 %v371_v25, %v368_v24  ;;  %v389_v48 = vld [vmem:[%s7982_s4 + $0x178] sm:$0xff]  ;;  %v391_v55 = vld [vmem:[%s7985_s7] sm:$0xff]  ;;  %v392_v56 = vld [vmem:[%s7985_s7 + $0x8] sm:$0xff] }
  0x32   :  { %176 = vmatmul.mubr.f32.vlgmr.msra.gmra.mrb[0].mxu0 %v39_v18  ;;  %v6377_v50 = vpack.c.bf16 %v389_v48, %v386_v47  ;;  %v6397_v57 = vpack.c.bf16 %v392_v56, %v391_v55  ;;  %v393_v58 = vld [vmem:[%s7985_s7 + $0x10] sm:$0xff]  ;;  %v394_v60 = vld [vmem:[%s7985_s7 + $0x18] sm:$0xff]  ;;  %v396_v2 = vld [vmem:[%s7985_s7 + $0x28] sm:$0xff] }
  0x33   :  { %4831 = vmatpush1.bf16.msra.mxu0 %v6111_v19  ;;  %181 = vmatprep.mubr.f32.mxu0 %v5846_v8  ;;  %v6407_v61 = vpack.c.bf16 %v394_v60, %v393_v58  ;;  %v397_v4 = vld [vmem:[%s7985_s7 + $0x30] sm:$0xff]  ;;  %v398_v5 = vld [vmem:[%s7985_s7 + $0x38] sm:$0xff]  ;;  %v399_v12 = vld [vmem:[%s7985_s7 + $0x40] sm:$0xff] }
  0x34   :  { %4833 = vmatprep.subr.bf16.mxu0 %v6117_v21  ;;  %4827 = vmatpush3.bf16.msra.mxu1 %v4826_v37  ;;  %v374_v37 = vld [vmem:[%s7982_s4 + $0x100] sm:$0xff]  ;;  %v6427_v9 = vpack.c.bf16 %v398_v5, %v397_v4  ;;  %v401_v17 = vld [vmem:[%s7985_s7 + $0x50] sm:$0xff]  ;;  %v404_v25 = vld [vmem:[%s7985_s7 + $0x68] sm:$0xff] }
  0x35   :  { %4860 = vmatprep.subr.bf16.mxu1 %v5845_v7  ;;  %v6343_v40 = vpack.c.bf16 %v377_v38, %v374_v37  ;;  %v403_v24 = vld [vmem:[%s7985_s7 + $0x60] sm:$0xff]  ;;  %v6471_v38 = vsub.s32 2, %v6085_v10 }
  0x36   :  { %182 = vmatmul.mubr.f32.gmra.mrb[2].mxu0 %v40_v31 }
  0x37   :  { %4835 = vmatpush1.bf16.msra.mxu0 %v6144_v30  ;;  %187 = vmatprep.mubr.f32.mxu0 %v5846_v8  ;;  %v107_v55 = vrot.slane %v6141_v29, %v6471_v38 }
  0x38   :  { %4837 = vmatprep.subr.bf16.mxu0 %v6155_v33  ;;  %4052 = vmatmul.mubr.f32.vlgmr.msra.gmra.mrb[0].mxu1 %v39_v18  ;;  %v385_v18 = vld [vmem:[%s7982_s4 + $0x158] sm:$0xff] }
  0x39   :  { %4862 = vmatpush3.bf16.msra.mxu1 %v6199_v49  ;;  %4054 = vmatprep.mubr.msk.f32.mxu1 %vm5847_vm0, %v5846_v8  ;;  %v6317_v28 = vpack.c.bf16 %v388_v22, %v385_v18  ;;  %v402_v18 = vld [vmem:[%s7985_s7 + $0x58] sm:$0xff] }
  0x3a   :  { %188 = vmatmul.mubr.f32.gmra.mrb[4].mxu0 %v41_v43  ;;  %4863 = vmatprep.subr.bf16.mxu1 %v5845_v7  ;;  %v6447_v22 = vpack.c.bf16 %v402_v18, %v401_v17 }
  0x3b   :  { %4839 = vmatpush1.bf16.msra.mxu0 %v6177_v42  ;;  %193 = vmatprep.mubr.f32.mxu0 %v5846_v8 }
  0x3c   :  { %4841 = vmatprep.subr.bf16.mxu0 %v6184_v44  ;;  %4055 = vmatmul.mubr.f32.gmra.mrb[2].mxu1 %v40_v31  ;;  %v384_v31 = vld [vmem:[%s7982_s4 + $0x150] sm:$0xff] }
  0x3d   :  { %4865 = vmatpush3.bf16.msra.mxu1 %v6230_v59  ;;  %4057 = vmatprep.mubr.msk.f32.mxu1 %vm5847_vm0, %v5846_v8  ;;  %v6338_v39 = vpack.c.bf16 %v387_v35, %v384_v31  ;;  %v405_v31 = vld [vmem:[%s7985_s7 + $0x70] sm:$0xff]  ;;  %v406_v35 = vld [vmem:[%s7985_s7 + $0x78] sm:$0xff] }
  0x3e   :  { %194 = vmatmul.mubr.f32.gmra.mrb[6].mxu0 %v42_v53  ;;  %4866 = vmatprep.subr.bf16.mxu1 %v5845_v7  ;;  %v6466_v37 = vpack.c.bf16 %v406_v35, %v405_v31 }
  0x3f   :  { %4843 = vmatpush1.bf16.msra.mxu0 %v6208_v52  ;;  %199 = vmatprep.mubr.f32.mxu0 %v5846_v8 }
  0x40   :  { %4845 = vmatprep.subr.bf16.mxu0 %v6215_v54  ;;  %4058 = vmatmul.mubr.f32.gmra.mrb[4].mxu1 %v41_v43  ;;  %v383_v43 = vld [vmem:[%s7982_s4 + $0x148] sm:$0xff] }
  0x41   :  { %4868 = vmatpush3.bf16.msra.mxu1 %v6264_v6  ;;  %4060 = vmatprep.mubr.msk.f32.mxu1 %vm5847_vm0, %v5846_v8  ;;  %v6362_v46 = vpack.c.bf16 %v383_v43, %v380_v41 }
  0x42   :  { %200 = vmatmul.mubr.f32.gmra.mrb[8].mxu0 %v43_v0  ;;  %4869 = vmatprep.subr.bf16.mxu1 %v5845_v7 }
  0x43   :  { %4847 = vmatpush1.bf16.msra.mxu0 %v6242_v62  ;;  %205 = vmatprep.mubr.f32.mxu0 %v5846_v8 }
  0x44   :  { %4849 = vmatprep.subr.bf16.mxu0 %v6249_v1  ;;  %4061 = vmatmul.mubr.f32.gmra.mrb[6].mxu1 %v42_v53  ;;  %v6389_v53 = vrot.slane %v6141_v29, %v6385_v51 }
  0x45   :  { %4871 = vmatpush3.bf16.msra.mxu1 %v6298_v23  ;;  %4063 = vmatprep.mubr.msk.f32.mxu1 %vm5847_vm0, %v5846_v8 }
  0x46   :  { %206 = vmatmul.mubr.f32.gmra.mrb[10].mxu0 %v44_v14  ;;  %4872 = vmatprep.subr.bf16.mxu1 %v5845_v7 }
  0x47   :  { %4851 = vmatpush1.bf16.msra.mxu0 %v6276_v13  ;;  %211 = vmatprep.mubr.f32.mxu0 %v5846_v8 }
  0x48   :  { %4853 = vmatprep.subr.bf16.mxu0 %v6283_v15  ;;  %4064 = vmatmul.mubr.f32.gmra.mrb[8].mxu1 %v43_v0  ;;  %v395_v0 = vld [vmem:[%s7985_s7 + $0x20] sm:$0xff] }
  0x49   :  { %4874 = vmatpush3.bf16.msra.mxu1 %v6326_v36  ;;  %4066 = vmatprep.mubr.msk.f32.mxu1 %vm5847_vm0, %v5846_v8  ;;  %v6417_v3 = vpack.c.bf16 %v396_v2, %v395_v0 }
  0x4a   :  { %212 = vmatmul.mubr.f32.gmra.mrb[12].mxu0 %v45_v27  ;;  %4875 = vmatprep.subr.bf16.mxu1 %v5845_v7 }
  0x4b   :  { %4855 = vmatpush1.bf16.msra.mxu0 %v6310_v26  ;;  %480 = vmatprep.mubr.f32.mxu0 %v5846_v8 }
  0x4c   :  { %4857 = vmatprep.subr.bf16.mxu0 %v6317_v28  ;;  %4067 = vmatmul.mubr.f32.gmra.mrb[10].mxu1 %v44_v14  ;;  %v400_v14 = vld [vmem:[%s7985_s7 + $0x48] sm:$0xff] }
  0x4d   :  { %4877 = vmatpush3.bf16.msra.mxu1 %v6343_v40  ;;  %4069 = vmatprep.mubr.msk.f32.mxu1 %vm5847_vm0, %v5846_v8  ;;  %v6437_v16 = vpack.c.bf16 %v400_v14, %v399_v12 }
  0x4e   :  { %4878 = vmatprep.subr.bf16.mxu1 %v5845_v7 }
  0x4f   :  { %4859 = vmatpush1.bf16.msra.mxu0 %v6338_v39 }
  0x50   :  { %4884 = vmatprep.subr.bf16.mxu0 %v5845_v7  ;;  %4070 = vmatmul.mubr.f32.gmra.mrb[12].mxu1 %v45_v27  ;;  %v6456_v27 = vpack.c.bf16 %v404_v25, %v403_v24 }
  0x51   :  { %4880 = vmatpush3.bf16.msra.mxu1 %v6362_v46  ;;  %4104 = vmatprep.mubr.msk.f32.mxu1 %vm5847_vm0, %v5846_v8 }
  0x52   :  { %481 = vmatmul.mubr.f32.vlgmr.msra.gmra.mrb[0].mxu0 %v6358_v45  ;;  %4881 = vmatprep.subr.bf16.mxu1 %v5845_v7 }
  0x53   :  { %4139 = vmatprep.mubr.msk.f32.mxu0 %vm5847_vm0, %v5846_v8  ;;  %4886 = vmatpush3.bf16.msra.mxu0 %v6397_v57 }
  0x54   :  { %4887 = vmatprep.subr.bf16.mxu0 %v5845_v7 }
  0x55   :  { %4883 = vmatpush3.bf16.msra.mxu1 %v6377_v50 }
  0x57   :  { %4889 = vmatpush3.bf16.msra.mxu0 %v6407_v61 }
  0x58   :  { %4105 = vmatmul.mubr.f32.vlgmr.msra.gmra.mrb[14].mxu1 %v6358_v45  ;;  %4890 = vmatprep.subr.bf16.mxu0 %v5845_v7 }
  0x5b   :  { %4892 = vmatpush3.bf16.msra.mxu0 %v6417_v3 }
  0x5c   :  { %4893 = vmatprep.subr.bf16.mxu0 %v5845_v7 }
  0x5f   :  { %4895 = vmatpush3.bf16.msra.mxu0 %v6427_v9 }
  0x60   :  { %4896 = vmatprep.subr.bf16.mxu0 %v5845_v7 }
  0x63   :  { %4898 = vmatpush3.bf16.msra.mxu0 %v6437_v16 }
  0x64   :  { %4899 = vmatprep.subr.bf16.mxu0 %v5845_v7 }
  0x67   :  { %4901 = vmatpush3.bf16.msra.mxu0 %v6447_v22 }
  0x68   :  { %4902 = vmatprep.subr.bf16.mxu0 %v5845_v7 }
  0x6b   :  { %4904 = vmatpush3.bf16.msra.mxu0 %v6456_v27 }
  0x6c   :  { %4905 = vmatprep.subr.bf16.mxu0 %v5845_v7 }
  0x6f   :  { %4907 = vmatpush3.bf16.msra.mxu0 %v6466_v37 }
 0x109   :  { %v183_v41 = vpop.f32.mrb[2].mxu0 }
 0x10a   :  { %v184_v43 = vadd.f32 %v183_v41, %v6152_v32  ;;  %v185_v47 = vpop.f32.mrb[3].mxu0 }
 0x10b   :  { %v186_v48 = vadd.f32 %v185_v47, %v6389_v53  ;;  %v284_v2 = vpop.f32.mrb[0].mxu1 }
 0x10c   :  { %321 = vst [vmem:[#allocation2 + $0x18] sm:$0xff] %v184_v43  ;;  %v6479_v10 = vadd.f32 %v284_v2, %v107_v55  ;;  %v4053_v4 = vpop.f32.mrb[1].mxu1 }
 0x10d   :  { %322 = vst [vmem:[#allocation2 + $0x20] sm:$0xff] %v186_v48  ;;  %v189_v56 = vpop.f32.mrb[4].mxu0 }
 0x10e   :  { %v190_v58 = vadd.f32 %v189_v56, %v6152_v32  ;;  %v191_v60 = vpop.f32.mrb[5].mxu0 }
 0x10f   :  { %v192_v0 = vadd.f32 %v191_v60, %v6389_v53  ;;  %v289_v29 = vpop.f32.mrb[2].mxu1 }
 0x110   :  { %324 = vst [vmem:[#allocation2 + $0x30] sm:$0xff] %v190_v58  ;;  %v290_v18 = vadd.f32 %v289_v29, %v107_v55  ;;  %v4056_v24 = vpop.f32.mrb[3].mxu1 }
 0x111   :  { %325 = vst [vmem:[#allocation2 + $0x38] sm:$0xff] %v192_v0  ;;  %v195_v5 = vpop.f32.mrb[6].mxu0 }
 0x112   :  { %v196_v12 = vadd.f32 %v195_v5, %v6152_v32  ;;  %v197_v14 = vpop.f32.mrb[7].mxu0  ;;  %323 = vst [vmem:[#allocation2 + $0x28] sm:$0xff] %v290_v18 }
 0x113   :  { %v198_v17 = vadd.f32 %v197_v14, %v6389_v53  ;;  %v294_v43 = vpop.f32.mrb[4].mxu1 }
 0x114   :  { %327 = vst [vmem:[#allocation2 + $0x48] sm:$0xff] %v196_v12  ;;  %v295_v47 = vadd.f32 %v294_v43, %v107_v55  ;;  %v4059_v48 = vpop.f32.mrb[5].mxu1 }
 0x115   :  { %328 = vst [vmem:[#allocation2 + $0x50] sm:$0xff] %v198_v17  ;;  %v201_v25 = vpop.f32.mrb[8].mxu0 }
 0x116   :  { %v202_v31 = vadd.f32 %v201_v25, %v6152_v32  ;;  %v203_v35 = vpop.f32.mrb[9].mxu0  ;;  %326 = vst [vmem:[#allocation2 + $0x40] sm:$0xff] %v295_v47 }
 0x117   :  { %v204_v41 = vadd.f32 %v203_v35, %v6389_v53  ;;  %v299_v2 = vpop.f32.mrb[6].mxu1 }
 0x118   :  { %330 = vst [vmem:[#allocation2 + $0x60] sm:$0xff] %v202_v31  ;;  %v300_v4 = vadd.f32 %v299_v2, %v107_v55  ;;  %v4062_v5 = vpop.f32.mrb[7].mxu1 }
 0x119   :  { %331 = vst [vmem:[#allocation2 + $0x68] sm:$0xff] %v204_v41  ;;  %v207_v56 = vpop.f32.mrb[10].mxu0 }
 0x11a   :  { %v208_v58 = vadd.f32 %v207_v56, %v6152_v32  ;;  %v209_v60 = vpop.f32.mrb[11].mxu0  ;;  %329 = vst [vmem:[#allocation2 + $0x58] sm:$0xff] %v300_v4 }
 0x11b   :  { %v210_v0 = vadd.f32 %v209_v60, %v6389_v53  ;;  %v304_v18 = vpop.f32.mrb[8].mxu1 }
 0x11c   :  { %333 = vst [vmem:[#allocation2 + $0x78] sm:$0xff] %v208_v58  ;;  %v305_v24 = vadd.f32 %v304_v18, %v107_v55  ;;  %v4065_v25 = vpop.f32.mrb[9].mxu1 }
 0x11d   :  { %334 = vst [vmem:[#allocation2 + $0x80] sm:$0xff] %v210_v0  ;;  %v213_v12 = vpop.f32.mrb[12].mxu0 }
 0x11e   :  { %v214_v14 = vadd.f32 %v213_v12, %v6152_v32  ;;  %v215_v17 = vpop.f32.mrb[13].mxu0  ;;  %332 = vst [vmem:[#allocation2 + $0x70] sm:$0xff] %v305_v24 }
 0x11f   :  { %v216_v29 = vadd.f32 %v215_v17, %v6389_v53  ;;  %v309_v31 = vpop.f32.mrb[10].mxu1 }
 0x120   :  { %336 = vst [vmem:[#allocation2 + $0x90] sm:$0xff] %v214_v14  ;;  %v310_v35 = vadd.f32 %v309_v31, %v107_v55  ;;  %v4068_v41 = vpop.f32.mrb[11].mxu1 }
 0x121   :  { %337 = vst [vmem:[#allocation2 + $0x98] sm:$0xff] %v216_v29 }
 0x122   :  { %335 = vst [vmem:[#allocation2 + $0x88] sm:$0xff] %v310_v35 }
 0x123   :  { %v314_v56 = vpop.f32.mrb[12].mxu1 }
 0x124   :  { %v315_v60 = vadd.f32 %v314_v56, %v107_v55  ;;  %v4071_v0 = vpop.f32.mrb[13].mxu1  ;;  %v6505_v56 = vld [vmem:[%s7986_s8] ss:$0 sm:$0xff] }
 0x125   :  { %v482_v43 = vpop.f32.mrb[0].mxu0 }
 0x126   :  { %v5726_v47 = vadd.f32 %v482_v43, %v6152_v32  ;;  %v484_v48 = vpop.f32.mrb[1].mxu0  ;;  %338 = vst [vmem:[#allocation2 + $0xa0] sm:$0xff] %v315_v60  ;;  %v6494_v32 = vld [vmem:[%s7984_s6] ss:$0 sm:$0xff]  ;;  %s662_s6 = sld [smem:[#allocation5]] }
 0x127   :  { %v5729_v2 = vadd.f32 %v484_v48, %v6389_v53 }
 0x128   :  { %v3600_v58 = vmul.f32 -1.442695, %v5726_v47 }
 0x129   :  { %v3601_v4 = vmul.f32 -1.442695, %v5729_v2 }
 0x12a   :  { %5760 = vpow2.f32 %v3600_v58 }
 0x12b   :  { %v553_v5 = vpop.f32.mrb[14].mxu1  ;;  %5762 = vpow2.f32 %v3601_v4 }
 0x12c   :  { %v4106_v12 = vpop.f32.mrb[15].mxu1  ;;  %v577_v55 = vadd.f32 %v6494_v32, %v553_v5  ;;  %p3604_p5 = scmp.ne.s32.totalorder %s662_s6, 0 }
 0x12d   :  { %v691_v12 = vld [vmem:[%s7987_s9 + $0x8] sm:$0xff] (!%p3604_p5)  ;;  %vm5850_vm3 = vmmov (!%p3604_p5), 0  }
 0x134   :  { %v5761_v14 = vpop.eup %5760 }
 0x135   :  { %v561_v17 = vadd.f32 1.0, %v5761_v14  ;;  %v5763_v29 = vpop.eup %5762  ;;  %v694_v14 = vld [vmem:[%s7987_s9 + $0x20] sm:$0xff] (!%p3604_p5) }
 0x136   :  { %v568_v18 = vadd.f32 1.0, %v5763_v29  ;;  %v4908_v29 = vpack.c.bf16 (!%p3604_p5), %v694_v14, %v691_v12  ;;  %v703_v12 = vld [vmem:[%s7987_s9 + $0x68] sm:$0xff] (!%p3604_p5)  ;;  %v706_v14 = vld [vmem:[%s7987_s9 + $0x80] sm:$0xff] (!%p3604_p5) }
 0x137   :  { %5764 = vrcp.f32 %v561_v17  ;;  %v690_v17 = vld [vmem:[%s7987_s9] sm:$0xff] (!%p3604_p5) }
 0x138   :  { %5766 = vrcp.f32 %v568_v18  ;;  %v5848_v18 = vmov (!%p3604_p5), 0.0|0.0   ;;  %4909 = vmatprep.subr.bf16.mxu0 (!%p3604_p5), %v4908_v29  ;;  %v4916_v29 = vpack.c.bf16 (!%p3604_p5), %v706_v14, %v703_v12 }
 0x139   :  { %4940 = vmatprep.subr.bf16.mxu1 (!%p3604_p5), %v5848_v18 }
 0x141   :  { %v5765_v24 = vpop.eup %5764 }
 0x142   :  { %v578_v53 = vmul.f32 %v5765_v24, %v577_v55  ;;  %v5767_v31 = vpop.eup %5766  ;;  %v693_v55 = vld [vmem:[%s7987_s9 + $0x18] sm:$0xff] (!%p3604_p5)  ;;  %v692_v24 = vld [vmem:[%s7987_s9 + $0x10] sm:$0xff] (!%p3604_p5) }
 0x143   :  { %v581_v35 = vsub.f32 1.0, %v5767_v31  ;;  %v583_v47 = vmul.f32 %v5767_v31, %v6358_v45  ;;  %v6512_v45 = vand.u32 (!%p3604_p5), 127, %v96_v63 }
 0x144   :  { %v579_v25 = vadd.f32 %v578_v53, %v6479_v10  ;;  %v695_v53 = vld [vmem:[%s7987_s9 + $0x28] sm:$0xff] (!%p3604_p5) }
 0x145   :  { %v4941_v31 = vpack.c.bf16 (!%p3604_p5), %v695_v53, %v692_v24  ;;  %v704_v24 = vld [vmem:[%s7987_s9 + $0x70] sm:$0xff] (!%p3604_p5)  ;;  %v707_v53 = vld [vmem:[%s7987_s9 + $0x88] sm:$0xff] (!%p3604_p5) }
 0x146   :  { %5768 = vtanh.f32 %v579_v25  ;;  %v4910_v25 = vpack.c.bf16 (!%p3604_p5), %v693_v55, %v690_v17  ;;  %v702_v17 = vld [vmem:[%s7987_s9 + $0x60] sm:$0xff] (!%p3604_p5)  ;;  %v705_v55 = vld [vmem:[%s7987_s9 + $0x78] sm:$0xff] (!%p3604_p5) }
 0x147   :  { %4942 = vmatpush3.bf16.msra.mxu1 (!%p3604_p5), %v4941_v31  ;;  %v712_v31 = vld [vmem:[%s7987_s9 + $0xb0] sm:$0xff] (!%p3604_p5) }
 0x148   :  { %4943 = vmatprep.subr.bf16.mxu1 (!%p3604_p5), %v5848_v18 }
 0x150   :  { %v5769_v41 = vpop.eup %5768 }
 0x151   :  { %v582_v43 = vmul.f32 %v5769_v41, %v581_v35  ;;  %v697_v35 = vld [vmem:[%s7987_s9 + $0x38] sm:$0xff] (!%p3604_p5)  ;;  %v700_v41 = vld [vmem:[%s7987_s9 + $0x50] sm:$0xff] (!%p3604_p5) }
 0x153   :  { %v6499_v48 = vadd.f32 %v583_v47, %v582_v43  ;;  %v696_v43 = vld [vmem:[%s7987_s9 + $0x30] sm:$0xff] (!%p3604_p5)  ;;  %v4912_v47 = vpack.c.bf16 (!%p3604_p5), %v700_v41, %v697_v35  ;;  %v4918_v35 = vpack.c.bf16 (!%p3604_p5), %v705_v55, %v702_v17  ;;  %v4947_v41 = vpack.c.bf16 (!%p3604_p5), %v707_v53, %v704_v24  ;;  %v714_v17 = vld [vmem:[%s7987_s9 + $0xc0] sm:$0xff] (!%p3604_p5)  ;;  %v717_v55 = vld [vmem:[%s7987_s9 + $0xd8] sm:$0xff] (!%p3604_p5) }
 0x154   :  { %v716_v24 = vld [vmem:[%s7987_s9 + $0xd0] sm:$0xff] (!%p3604_p5)  ;;  %v719_v53 = vld [vmem:[%s7987_s9 + $0xe8] sm:$0xff] (!%p3604_p5) }
 0x155   :  { %4140 = vmatmul.mubr.f32.vlgmr.msra.gmra.mrb[14].mxu0 %v6499_v48 }
 0x156   :  { %4911 = vmatpush1.bf16.msra.mxu0 (!%p3604_p5), %v4910_v25  ;;  %v709_v25 = vld [vmem:[%s7987_s9 + $0x98] sm:$0xff] (!%p3604_p5) }
 0x157   :  { %4913 = vmatprep.subr.bf16.mxu0 (!%p3604_p5), %v4912_v47  ;;  %v4920_v47 = vpack.c.bf16 (!%p3604_p5), %v712_v31, %v709_v25  ;;  %v721_v25 = vld [vmem:[%s7987_s9 + $0xf8] sm:$0xff] (!%p3604_p5)  ;;  %v724_v31 = vld [vmem:[%s7987_s9 + $0x110] sm:$0xff] (!%p3604_p5) }
 0x225   :  { %666 = sbr.rel (%p3604_p5) target bundleno = 1210 (0x4ba), region = 41 }
 0x228   :  { %v657_v58 = vpop.f32.mrb[14].mxu0 }
 0x229   :  { %v658_v10 = vadd.f32 %v6505_v56, %v657_v58  ;;  %v4141_v60 = vpop.f32.mrb[15].mxu0  ;;  %v699_v58 = vld [vmem:[%s7987_s9 + $0x48] sm:$0xff] (!%p3604_p5) }
 0x22a   :  { %v701_v60 = vld [vmem:[%s7987_s9 + $0x58] sm:$0xff] (!%p3604_p5) }
 0x22b   :  { %661 = vst [vmem:[%s7988_s10] sm:$0xff] %v658_v10  ;;  %669 = vmax.xlane.f32.xlu0 (!%p3604_p5), %v658_v10 }
 0x2b8   :  { %v670_v0 = vpop.xlane.xlu0 %669 }
 0x2b9   :  { %vm671_vm1 = vcmp.eq.f32.partialorder %v658_v10, %v670_v0  ;;  %v698_v10 = vld [vmem:[%s7987_s9 + $0x40] sm:$0xff]  ;;  %v4914_v0 = vpack.c.bf16 %v699_v58, %v696_v43  ;;  %v708_v43 = vld [vmem:[%s7987_s9 + $0x90] sm:$0xff]  ;;  %v711_v58 = vld [vmem:[%s7987_s9 + $0xa8] sm:$0xff] }
 0x2ba   :  { %v6515_v2 = vsel %vm671_vm1, %v6512_v45, 128  ;;  %v4922_v12 = vpack.c.bf16 %v711_v58, %v708_v43  ;;  %v720_v43 = vld [vmem:[%s7987_s9 + $0xf0] sm:$0xff]  ;;  %v723_v58 = vld [vmem:[%s7987_s9 + $0x108] sm:$0xff] }
 0x2bb   :  { %v674_v4 = vshra.s32 %v6515_v2, 16  ;;  %4915 = vmatpush1.bf16.msra.mxu0 %v4914_v0  ;;  %v715_v0 = vld [vmem:[%s7987_s9 + $0xc8] sm:$0xff] }
 0x2bc   :  { %4917 = vmatprep.subr.bf16.mxu0 %v4916_v29 }
 0x2bd   :  { %v6518_v5 = vcvt.s32.f32 %v674_v4  ;;  %v4944_v4 = vpack.c.bf16 %v701_v60, %v698_v10  ;;  %v710_v10 = vld [vmem:[%s7987_s9 + $0xa0] sm:$0xff]  ;;  %v713_v60 = vld [vmem:[%s7987_s9 + $0xb8] sm:$0xff] }
 0x2be   :  { %v4950_v14 = vpack.c.bf16 %v713_v60, %v710_v10  ;;  %v722_v10 = vld [vmem:[%s7987_s9 + $0x100] sm:$0xff]  ;;  %v725_v60 = vld [vmem:[%s7987_s9 + $0x118] sm:$0xff] }
 0x2bf   :  { %677 = vmin.xlane.f32.xlu0 %v6518_v5  ;;  %4945 = vmatpush3.bf16.msra.mxu1 %v4944_v4  ;;  %v718_v4 = vld [vmem:[%s7987_s9 + $0xe0] sm:$0xff] }
 0x2c0   :  { %4946 = vmatprep.subr.bf16.mxu1 %v5848_v18  ;;  %4919 = vmatpush1.bf16.msra.mxu0 %v4918_v35  ;;  %v4924_v29 = vpack.c.bf16 %v718_v4, %v715_v0  ;;  %v4926_v35 = vpack.c.bf16 %v717_v55, %v714_v17  ;;  %v727_v0 = vld [vmem:[%s7987_s9 + $0x128] sm:$0xff]  ;;  %v730_v4 = vld [vmem:[%s7987_s9 + $0x140] sm:$0xff]  ;;  %v729_v55 = vld [vmem:[%s7987_s9 + $0x138] sm:$0xff] }
 0x2c1   :  { %4921 = vmatprep.subr.bf16.mxu0 %v4920_v47  ;;  %v4928_v47 = vpack.c.bf16 %v724_v31, %v721_v25  ;;  %v726_v17 = vld [vmem:[%s7987_s9 + $0x120] sm:$0xff] }
 0x2c2   :  { %v4934_v25 = vpack.c.bf16 %v729_v55, %v726_v17 }
 0x2c3   :  { %4948 = vmatpush3.bf16.msra.mxu1 %v4947_v41  ;;  %v4953_v41 = vpack.c.bf16 %v719_v53, %v716_v24  ;;  %v728_v24 = vld [vmem:[%s7987_s9 + $0x130] sm:$0xff]  ;;  %v731_v53 = vld [vmem:[%s7987_s9 + $0x148] sm:$0xff] }
 0x2c4   :  { %4949 = vmatprep.subr.bf16.mxu1 %v5848_v18  ;;  %4923 = vmatpush1.bf16.msra.mxu0 %v4922_v12  ;;  %v4930_v12 = vpack.c.bf16 %v723_v58, %v720_v43  ;;  %v4959_v31 = vpack.c.bf16 %v731_v53, %v728_v24  ;;  %v733_v58 = vld [vmem:[%s7987_s9 + $0x158] sm:$0xff] }
 0x2c5   :  { %4925 = vmatprep.subr.bf16.mxu0 %v4924_v29  ;;  %v4932_v29 = vpack.c.bf16 %v730_v4, %v727_v0  ;;  %v737_v4 = vld [vmem:[%s7987_s9 + $0x178] sm:$0xff] }
 0x2c7   :  { %4951 = vmatpush3.bf16.msra.mxu1 %v4950_v14  ;;  %v4956_v14 = vpack.c.bf16 %v725_v60, %v722_v10  ;;  %v736_v10 = vld [vmem:[%s7987_s9 + $0x170] sm:$0xff] }
 0x2c8   :  { %4952 = vmatprep.subr.bf16.mxu1 %v5848_v18  ;;  %4927 = vmatpush1.bf16.msra.mxu0 %v4926_v35  ;;  %v673_v35 = vand.u32 65535, %v6515_v2  ;;  %v4936_v60 = vpack.c.bf16 %v736_v10, %v733_v58  ;;  %v735_v2 = vld [vmem:[%s7987_s9 + $0x168] sm:$0xff] }
 0x2c9   :  { %4929 = vmatprep.subr.bf16.mxu0 %v4928_v47 }
 0x2ca   :  { %v675_v43 = vcvt.s32.f32 %v673_v35  ;;  %v750_v35 = vrot.slane %v6006_v34, %v6471_v38 }
 0x2cb   :  { %4954 = vmatpush3.bf16.msra.mxu1 %v4953_v41 }
 0x2cc   :  { %4955 = vmatprep.subr.bf16.mxu1 %v5848_v18  ;;  %4931 = vmatpush1.bf16.msra.mxu0 %v4930_v12 }
 0x2cd   :  { %4933 = vmatprep.subr.bf16.mxu0 %v4932_v29 }
 0x2cf   :  { %4957 = vmatpush3.bf16.msra.mxu1 %v4956_v14  ;;  %v5849_v14 = vmov 0.0  }
 0x2d0   :  { %4958 = vmatprep.subr.bf16.mxu1 %v5848_v18  ;;  %4935 = vmatpush1.bf16.msra.mxu0 %v4934_v25  ;;  %v5851_v25 = vmov 1.0  }
 0x2d1   :  { %4937 = vmatprep.subr.bf16.mxu0 %v4936_v60  ;;  %818 = vmatprep.mubr.f32.mxu0 %v5849_v14 }
 0x2d2   :  { %4174 = vmatprep.mubr.msk.f32.mxu1 %vm5850_vm3, %v5849_v14 }
 0x2d3   :  { %4960 = vmatpush3.bf16.msra.mxu1 %v4959_v31  ;;  %v742_v31 = vrot.slane %v6006_v34, %v6114_v20 }
 0x2d4   :  { %4961 = vmatprep.subr.bf16.mxu1 %v5848_v18  ;;  %v732_v18 = vld [vmem:[%s7987_s9 + $0x150] sm:$0xff] }
 0x2d5   :  { %v4938_v0 = vpack.c.bf16 %v735_v2, %v732_v18 }
 0x2d7   :  { %4939 = vmatpush1.bf16.msra.mxu0 %v4938_v0 }
 0x34c   :  { %v678_v41 = vpop.xlane.xlu0 %677 }
 0x34d   :  { %vm679_vm2 = vcmp.eq.f32.partialorder %v6518_v5, %v678_v41  ;;  %v734_v5 = vld [vmem:[%s7987_s9 + $0x160] sm:$0xff]  ;;  %v684_v17 = vcvt.f32.s32 %v678_v41 }
 0x34e   :  { %v680_v47 = vsel %vm679_vm2, %v675_v43, inf  ;;  %v4962_v12 = vpack.c.bf16 %v737_v4, %v734_v5  ;;  %v746_v43 = vrot.slane %v6006_v34, %v6385_v51 }
 0x34f   :  { %681 = vmin.xlane.f32.xlu1 %v680_v47  ;;  %v685_v55 = vshll.u32 %v684_v17, 16 }
 0x350   :  { %4963 = vmatpush3.bf16.msra.mxu1 %v4962_v12 }
 0x3dc   :  { %v682_v29 = vpop.xlane.xlu1 %681 }
 0x3dd   :  { %v683_v24 = vcvt.f32.s32 %v682_v29 }
 0x3df   :  { %v686_v53 = vadd.s32 %v685_v55, %v683_v24 }
 0x3e1   :  { %vm687_vm4 = vcmp.eq.s32.totalorder %v6512_v45, %v686_v53 }
 0x3e2   :  { %3606 = vmatmul.mubr.msk.f32.vlgmr.msra.gmra.mrb[0].mxu0 %vm687_vm4, %v5851_v25  ;;  %4175 = vmatmul.mubr.msk.f32.vlgmr.msra.gmra.mrb[0].mxu1 %vm687_vm4, %v5851_v25 }
 0x4b5   :  { %v820_v47 = vpop.f32.mrb[0].mxu0  ;;  %v891_v41 = vpop.f32.mrb[0].mxu1 }
 0x4b6   :  { %v821_v58 = vadd.f32 %v820_v47, %v742_v31  ;;  %v892_v10 = vadd.f32 %v891_v41, %v750_v35  ;;  %v822_v60 = vpop.f32.mrb[1].mxu0  ;;  %v4176_v18 = vpop.f32.mrb[1].mxu1 }
 0x4b7   :  { %v823_v2 = vadd.f32 %v822_v60, %v746_v43 }
 0x4b8   :  { %895 = vst [vmem:[#allocation3] sm:$0xff] %v821_v58  ;;  %897 = vst [vmem:[#allocation3 + $0x10] sm:$0xff] %v892_v10 }
 0x4b9   :  { %896 = vst [vmem:[#allocation3 + $0x8] sm:$0xff] %v823_v2 }
 0x4ba PF:  { %4965 = vmatprep.subr.bf16.mxu0 %v6087_v11  ;;  %4996 = vmatprep.subr.bf16.mxu1 %v5845_v7  ;;  %s898_s24 = sld [smem:[#allocation5]]  ;;  %v903_v5 = vld [vmem:[#allocation2 + $0x18] sm:$0xff]  ;;  %v904_v14 = vld [vmem:[#allocation2 + $0x20] sm:$0xff]  ;;  %v905_v18 = vld [vmem:[#allocation2 + $0x28] sm:$0xff]  ;;  %s3611_s26 = sld [smem:[#allocation5 + $0x1]] }
 0x4bb   :  { %4967 = vmatpush1.bf16.msra.mxu0 %v6111_v19  ;;  %4998 = vmatpush3.bf16.msra.mxu1 %v6199_v49 }
 0x4bc   :  { %4969 = vmatprep.subr.bf16.mxu0 %v6117_v21  ;;  %4999 = vmatprep.subr.bf16.mxu1 %v5845_v7 }
 0x4bd   :  { %979 = vmatprep.mubr.f32.mxu0 %v5846_v8  ;;  %4209 = vmatprep.mubr.msk.f32.mxu1 %vm5847_vm0, %v5846_v8 }
 0x4bf   :  { %4971 = vmatpush1.bf16.msra.mxu0 %v6144_v30  ;;  %5001 = vmatpush3.bf16.msra.mxu1 %v6230_v59  ;;  %v906_v0 = vld [vmem:[#allocation3] sm:$0xff]  ;;  %v908_v2 = vld [vmem:[#allocation3 + $0x10] sm:$0xff] }
 0x4c0   :  { %4973 = vmatprep.subr.bf16.mxu0 %v6155_v33  ;;  %5002 = vmatprep.subr.bf16.mxu1 %v5845_v7  ;;  %p899_p6 = scmp.ne.s32.totalorder %s898_s24, 0  ;;  %v907_v17 = vld [vmem:[#allocation3 + $0x8] sm:$0xff]  ;;  %p3612_p7 = scmp.ne.s32.totalorder %s3611_s26, 0 }
 0x4c1   :  { %vm5854_vm8 = vmmov (!%p3612_p7), 0  }
 0x4c2   :  { %s909_s25 = scalar_select %p899_p6, 1, 0 }
 0x4c3   :  { %4975 = vmatpush1.bf16.msra.mxu0 %v6177_v42  ;;  %5004 = vmatpush3.bf16.msra.mxu1 %v6264_v6 }
 0x4c4   :  { %4977 = vmatprep.subr.bf16.mxu0 %v6184_v44  ;;  %5005 = vmatprep.subr.bf16.mxu1 %v5845_v7  ;;  %v910_v45 = vstv %s909_s25 }
 0x4c5   :  { %vm6737_vm5 = vcmp.eq.s32.totalorder %v910_v45, 1 }
 0x4c6   :  { %v912_v12 = vsel %vm6737_vm5, %v903_v5, %v906_v0  ;;  %v913_v53 = vsel %vm6737_vm5, %v904_v14, %v907_v17  ;;  %v914_v0 = vsel %vm6737_vm5, %v905_v18, %v908_v2  ;;  %v1178_v18 = vld [vmem:[%s7987_s9] sm:$0xff] (!%p3612_p7) }
 0x4c7   :  { %4979 = vmatpush1.bf16.msra.mxu0 %v6208_v52  ;;  %5007 = vmatpush3.bf16.msra.mxu1 %v6298_v23 }
 0x4c8   :  { %4981 = vmatprep.subr.bf16.mxu0 %v6215_v54  ;;  %5008 = vmatprep.subr.bf16.mxu1 %v5845_v7 }
 0x4cb   :  { %4983 = vmatpush1.bf16.msra.mxu0 %v6242_v62  ;;  %5010 = vmatpush3.bf16.msra.mxu1 %v6326_v36 }
 0x4cc   :  { %4985 = vmatprep.subr.bf16.mxu0 %v6249_v1  ;;  %5011 = vmatprep.subr.bf16.mxu1 %v5845_v7 }
 0x4cf   :  { %4987 = vmatpush1.bf16.msra.mxu0 %v6276_v13  ;;  %5013 = vmatpush3.bf16.msra.mxu1 %v6343_v40 }
 0x4d0   :  { %4989 = vmatprep.subr.bf16.mxu0 %v6283_v15  ;;  %5014 = vmatprep.subr.bf16.mxu1 %v5845_v7 }
 0x4d3   :  { %4991 = vmatpush1.bf16.msra.mxu0 %v6310_v26  ;;  %5016 = vmatpush3.bf16.msra.mxu1 %v6362_v46 }
 0x4d4   :  { %4993 = vmatprep.subr.bf16.mxu0 %v6317_v28  ;;  %5017 = vmatprep.subr.bf16.mxu1 %v5845_v7 }
 0x4d7   :  { %4995 = vmatpush1.bf16.msra.mxu0 %v6338_v39  ;;  %5019 = vmatpush3.bf16.msra.mxu1 %v6377_v50 }
 0x4d8   :  { %5020 = vmatprep.subr.bf16.mxu0 %v5845_v7 }
 0x4da   :  { %980 = vmatmul.mubr.f32.vlgmr.msra.gmra.mrb[0].mxu0 %v6499_v48  ;;  %4210 = vmatmul.mubr.f32.vlgmr.msra.gmra.mrb[0].mxu1 %v6499_v48 }
 0x4db   :  { %5022 = vmatpush3.bf16.msra.mxu0 %v6397_v57  ;;  %4244 = vmatprep.mubr.msk.f32.mxu0 %vm5847_vm0, %v5846_v8 }
 0x4dc   :  { %5023 = vmatprep.subr.bf16.mxu0 %v5845_v7 }
 0x4df   :  { %5025 = vmatpush3.bf16.msra.mxu0 %v6407_v61 }
 0x4e0   :  { %5026 = vmatprep.subr.bf16.mxu0 %v5845_v7 }
 0x4e3   :  { %5028 = vmatpush3.bf16.msra.mxu0 %v6417_v3 }
 0x4e4   :  { %5029 = vmatprep.subr.bf16.mxu0 %v5845_v7 }
 0x4e7   :  { %5031 = vmatpush3.bf16.msra.mxu0 %v6427_v9 }
 0x4e8   :  { %5032 = vmatprep.subr.bf16.mxu0 %v5845_v7 }
 0x4eb   :  { %5034 = vmatpush3.bf16.msra.mxu0 %v6437_v16 }
 0x4ec   :  { %5035 = vmatprep.subr.bf16.mxu0 %v5845_v7 }
 0x4ef   :  { %5037 = vmatpush3.bf16.msra.mxu0 %v6447_v22 }
 0x4f0   :  { %5038 = vmatprep.subr.bf16.mxu0 %v5845_v7 }
 0x4f3   :  { %5040 = vmatpush3.bf16.msra.mxu0 %v6456_v27 }
 0x4f4   :  { %5041 = vmatprep.subr.bf16.mxu0 %v5845_v7 }
 0x4f7   :  { %5043 = vmatpush3.bf16.msra.mxu0 %v6466_v37 }
 0x5ad   :  { %v981_v29 = vpop.f32.mrb[0].mxu0  ;;  %v1052_v55 = vpop.f32.mrb[0].mxu1 }
 0x5ae   :  { %v1056_v24 = vadd.f32 %v981_v29, %v912_v12  ;;  %v983_v25 = vpop.f32.mrb[1].mxu0  ;;  %v4211_v31 = vpop.f32.mrb[1].mxu1  ;;  %v1070_v45 = vadd.f32 %v6494_v32, %v1052_v55 }
 0x5af   :  { %v1063_v43 = vadd.f32 %v983_v25, %v913_v53 }
 0x5b0   :  { %v3608_v35 = vmul.f32 -1.442695, %v1056_v24 }
 0x5b1   :  { %v3609_v47 = vmul.f32 -1.442695, %v1063_v43  ;;  %v6757_v43 = vand.u32 (!%p3612_p7), 127, %v96_v63 }
 0x5b2   :  { %5770 = vpow2.f32 %v3608_v35 }
 0x5b3   :  { %5772 = vpow2.f32 %v3609_v47 }
 0x5bc   :  { %v5771_v41 = vpop.eup %5770 }
 0x5bd   :  { %v1060_v58 = vadd.f32 1.0, %v5771_v41  ;;  %v5773_v10 = vpop.eup %5772 }
 0x5be   :  { %v1067_v60 = vadd.f32 1.0, %v5773_v10  ;;  %v1179_v10 = vld [vmem:[%s7987_s9 + $0x8] sm:$0xff] (!%p3612_p7) }
 0x5bf   :  { %5774 = vrcp.f32 %v1060_v58 }
 0x5c0   :  { %5776 = vrcp.f32 %v1067_v60  ;;  %v1182_v60 = vld [vmem:[%s7987_s9 + $0x20] sm:$0xff] (!%p3612_p7) }
 0x5c1   :  { %v5044_v2 = vpack.c.bf16 (!%p3612_p7), %v1182_v60, %v1179_v10  ;;  %v1191_v10 = vld [vmem:[%s7987_s9 + $0x68] sm:$0xff] (!%p3612_p7)  ;;  %v1194_v60 = vld [vmem:[%s7987_s9 + $0x80] sm:$0xff] (!%p3612_p7) }
 0x5c3   :  { %5045 = vmatprep.subr.bf16.mxu0 (!%p3612_p7), %v5044_v2  ;;  %v5052_v2 = vpack.c.bf16 (!%p3612_p7), %v1194_v60, %v1191_v10 }
 0x5c9   :  { %v5775_v5 = vpop.eup %5774 }
 0x5ca   :  { %v1071_v12 = vmul.f32 %v5775_v5, %v1070_v45  ;;  %v5777_v17 = vpop.eup %5776  ;;  %v5852_v45 = vmov (!%p3612_p7), 0.0|0.0   ;;  %v1181_v5 = vld [vmem:[%s7987_s9 + $0x18] sm:$0xff] (!%p3612_p7) }
 0x5cb   :  { %v1074_v29 = vsub.f32 1.0, %v5777_v17  ;;  %v1076_v25 = vmul.f32 %v5777_v17, %v6499_v48  ;;  %5076 = vmatprep.subr.bf16.mxu1 (!%p3612_p7), %v5852_v45 }
 0x5cc   :  { %v1072_v14 = vadd.f32 %v1071_v12, %v914_v0  ;;  %v1180_v0 = vld [vmem:[%s7987_s9 + $0x10] sm:$0xff] (!%p3612_p7)  ;;  %v1183_v12 = vld [vmem:[%s7987_s9 + $0x28] sm:$0xff] (!%p3612_p7) }
 0x5cd   :  { %v5077_v17 = vpack.c.bf16 (!%p3612_p7), %v1183_v12, %v1180_v0  ;;  %v1192_v0 = vld [vmem:[%s7987_s9 + $0x70] sm:$0xff] (!%p3612_p7)  ;;  %v1195_v12 = vld [vmem:[%s7987_s9 + $0x88] sm:$0xff] (!%p3612_p7) }
 0x5ce   :  { %5778 = vtanh.f32 %v1072_v14  ;;  %v5046_v14 = vpack.c.bf16 (!%p3612_p7), %v1181_v5, %v1178_v18  ;;  %v1190_v18 = vld [vmem:[%s7987_s9 + $0x60] sm:$0xff] (!%p3612_p7)  ;;  %v1193_v5 = vld [vmem:[%s7987_s9 + $0x78] sm:$0xff] (!%p3612_p7) }
 0x5cf   :  { %5078 = vmatpush3.bf16.msra.mxu1 (!%p3612_p7), %v5077_v17  ;;  %v1200_v17 = vld [vmem:[%s7987_s9 + $0xb0] sm:$0xff] (!%p3612_p7) }
 0x5d0   :  { %5079 = vmatprep.subr.bf16.mxu1 (!%p3612_p7), %v5852_v45 }
 0x5d8   :  { %v5779_v24 = vpop.eup %5778 }
 0x5d9   :  { %v1075_v53 = vmul.f32 %v5779_v24, %v1074_v29  ;;  %v1185_v29 = vld [vmem:[%s7987_s9 + $0x38] sm:$0xff] (!%p3612_p7)  ;;  %v1188_v24 = vld [vmem:[%s7987_s9 + $0x50] sm:$0xff] (!%p3612_p7) }
 0x5db   :  { %v6749_v31 = vadd.f32 %v1076_v25, %v1075_v53  ;;  %v1184_v53 = vld [vmem:[%s7987_s9 + $0x30] sm:$0xff] (!%p3612_p7)  ;;  %v5048_v25 = vpack.c.bf16 (!%p3612_p7), %v1188_v24, %v1185_v29  ;;  %v5054_v29 = vpack.c.bf16 (!%p3612_p7), %v1193_v5, %v1190_v18  ;;  %v5083_v24 = vpack.c.bf16 (!%p3612_p7), %v1195_v12, %v1192_v0  ;;  %v1202_v18 = vld [vmem:[%s7987_s9 + $0xc0] sm:$0xff] (!%p3612_p7)  ;;  %v1205_v5 = vld [vmem:[%s7987_s9 + $0xd8] sm:$0xff] (!%p3612_p7) }
 0x5dc   :  { %v1204_v0 = vld [vmem:[%s7987_s9 + $0xd0] sm:$0xff] (!%p3612_p7)  ;;  %v1207_v12 = vld [vmem:[%s7987_s9 + $0xe8] sm:$0xff] (!%p3612_p7) }
 0x5dd   :  { %4245 = vmatmul.mubr.f32.vlgmr.msra.gmra.mrb[2].mxu0 %v6749_v31 }
 0x5de   :  { %5047 = vmatpush1.bf16.msra.mxu0 (!%p3612_p7), %v5046_v14  ;;  %v1197_v14 = vld [vmem:[%s7987_s9 + $0x98] sm:$0xff] (!%p3612_p7) }
 0x5df   :  { %5049 = vmatprep.subr.bf16.mxu0 (!%p3612_p7), %v5048_v25  ;;  %v5056_v25 = vpack.c.bf16 (!%p3612_p7), %v1200_v17, %v1197_v14  ;;  %v1209_v14 = vld [vmem:[%s7987_s9 + $0xf8] sm:$0xff] (!%p3612_p7)  ;;  %v1212_v17 = vld [vmem:[%s7987_s9 + $0x110] sm:$0xff] (!%p3612_p7) }
 0x6ad   :  { %1154 = sbr.rel (%p3612_p7) target bundleno = 2370 (0x942), region = 45 }
 0x6b0   :  { %v1144_v55 = vpop.f32.mrb[2].mxu0 }
 0x6b1   :  { %v1145_v35 = vadd.f32 %v6505_v56, %v1144_v55  ;;  %v4246_v4 = vpop.f32.mrb[3].mxu0  ;;  %v1187_v55 = vld [vmem:[%s7987_s9 + $0x48] sm:$0xff] (!%p3612_p7) }
 0x6b2   :  { %v1189_v4 = vld [vmem:[%s7987_s9 + $0x58] sm:$0xff] (!%p3612_p7) }
 0x6b3   :  { %3610 = vst [vmem:[%s7988_s10 + $0x8] sm:$0xff] %v1145_v35  ;;  %1157 = vmax.xlane.f32.xlu0 (!%p3612_p7), %v1145_v35 }
 0x740   :  { %v1158_v48 = vpop.xlane.xlu0 %1157 }
 0x741   :  { %vm1159_vm6 = vcmp.eq.f32.partialorder %v1145_v35, %v1158_v48  ;;  %v1186_v35 = vld [vmem:[%s7987_s9 + $0x40] sm:$0xff]  ;;  %v5050_v48 = vpack.c.bf16 %v1187_v55, %v1184_v53  ;;  %v1196_v53 = vld [vmem:[%s7987_s9 + $0x90] sm:$0xff]  ;;  %v1199_v55 = vld [vmem:[%s7987_s9 + $0xa8] sm:$0xff] }
 0x742   :  { %v6760_v47 = vsel %vm1159_vm6, %v6757_v43, 128  ;;  %v5058_v10 = vpack.c.bf16 %v1199_v55, %v1196_v53  ;;  %v1208_v53 = vld [vmem:[%s7987_s9 + $0xf0] sm:$0xff]  ;;  %v1211_v55 = vld [vmem:[%s7987_s9 + $0x108] sm:$0xff] }
 0x743   :  { %v1162_v41 = vshra.s32 %v6760_v47, 16  ;;  %5051 = vmatpush1.bf16.msra.mxu0 %v5050_v48  ;;  %v1203_v48 = vld [vmem:[%s7987_s9 + $0xc8] sm:$0xff] }
 0x744   :  { %5053 = vmatprep.subr.bf16.mxu0 %v5052_v2 }
 0x745   :  { %v6763_v58 = vcvt.s32.f32 %v1162_v41  ;;  %v5080_v41 = vpack.c.bf16 %v1189_v4, %v1186_v35  ;;  %v1198_v35 = vld [vmem:[%s7987_s9 + $0xa0] sm:$0xff]  ;;  %v1201_v4 = vld [vmem:[%s7987_s9 + $0xb8] sm:$0xff] }
 0x746   :  { %v5086_v60 = vpack.c.bf16 %v1201_v4, %v1198_v35  ;;  %v1210_v35 = vld [vmem:[%s7987_s9 + $0x100] sm:$0xff]  ;;  %v1213_v4 = vld [vmem:[%s7987_s9 + $0x118] sm:$0xff] }
 0x747   :  { %1165 = vmin.xlane.f32.xlu0 %v6763_v58  ;;  %5081 = vmatpush3.bf16.msra.mxu1 %v5080_v41  ;;  %v1206_v41 = vld [vmem:[%s7987_s9 + $0xe0] sm:$0xff] }
 0x748   :  { %5082 = vmatprep.subr.bf16.mxu1 %v5852_v45  ;;  %5055 = vmatpush1.bf16.msra.mxu0 %v5054_v29  ;;  %v5060_v2 = vpack.c.bf16 %v1206_v41, %v1203_v48  ;;  %v5062_v29 = vpack.c.bf16 %v1205_v5, %v1202_v18  ;;  %v1215_v48 = vld [vmem:[%s7987_s9 + $0x128] sm:$0xff]  ;;  %v1218_v41 = vld [vmem:[%s7987_s9 + $0x140] sm:$0xff]  ;;  %v1217_v5 = vld [vmem:[%s7987_s9 + $0x138] sm:$0xff] }
 0x749   :  { %5057 = vmatprep.subr.bf16.mxu0 %v5056_v25  ;;  %v5064_v25 = vpack.c.bf16 %v1212_v17, %v1209_v14  ;;  %v1214_v18 = vld [vmem:[%s7987_s9 + $0x120] sm:$0xff] }
 0x74a   :  { %v5070_v14 = vpack.c.bf16 %v1217_v5, %v1214_v18 }
 0x74b   :  { %5084 = vmatpush3.bf16.msra.mxu1 %v5083_v24  ;;  %v5089_v24 = vpack.c.bf16 %v1207_v12, %v1204_v0  ;;  %v1216_v0 = vld [vmem:[%s7987_s9 + $0x130] sm:$0xff]  ;;  %v1219_v12 = vld [vmem:[%s7987_s9 + $0x148] sm:$0xff] }
 0x74c   :  { %5085 = vmatprep.subr.bf16.mxu1 %v5852_v45  ;;  %5059 = vmatpush1.bf16.msra.mxu0 %v5058_v10  ;;  %v5066_v10 = vpack.c.bf16 %v1211_v55, %v1208_v53  ;;  %v5095_v17 = vpack.c.bf16 %v1219_v12, %v1216_v0  ;;  %v1221_v55 = vld [vmem:[%s7987_s9 + $0x158] sm:$0xff] }
 0x74d   :  { %5061 = vmatprep.subr.bf16.mxu0 %v5060_v2  ;;  %v5068_v2 = vpack.c.bf16 %v1218_v41, %v1215_v48  ;;  %v1225_v41 = vld [vmem:[%s7987_s9 + $0x178] sm:$0xff] }
 0x74f   :  { %5087 = vmatpush3.bf16.msra.mxu1 %v5086_v60  ;;  %v5092_v60 = vpack.c.bf16 %v1213_v4, %v1210_v35  ;;  %v1224_v35 = vld [vmem:[%s7987_s9 + $0x170] sm:$0xff] }
 0x750   :  { %5088 = vmatprep.subr.bf16.mxu1 %v5852_v45  ;;  %5063 = vmatpush1.bf16.msra.mxu0 %v5062_v29  ;;  %v1161_v29 = vand.u32 65535, %v6760_v47  ;;  %v5072_v4 = vpack.c.bf16 %v1224_v35, %v1221_v55  ;;  %v1223_v47 = vld [vmem:[%s7987_s9 + $0x168] sm:$0xff] }
 0x751   :  { %5065 = vmatprep.subr.bf16.mxu0 %v5064_v25 }
 0x752   :  { %v1163_v53 = vcvt.s32.f32 %v1161_v29  ;;  %v1238_v29 = vrot.slane %v6006_v34, %v6471_v38 }
 0x753   :  { %5090 = vmatpush3.bf16.msra.mxu1 %v5089_v24 }
 0x754   :  { %5091 = vmatprep.subr.bf16.mxu1 %v5852_v45  ;;  %5067 = vmatpush1.bf16.msra.mxu0 %v5066_v10 }
 0x755   :  { %5069 = vmatprep.subr.bf16.mxu0 %v5068_v2 }
 0x757   :  { %5093 = vmatpush3.bf16.msra.mxu1 %v5092_v60  ;;  %v5853_v60 = vmov 0.0  }
 0x758   :  { %5094 = vmatprep.subr.bf16.mxu1 %v5852_v45  ;;  %5071 = vmatpush1.bf16.msra.mxu0 %v5070_v14  ;;  %v5855_v14 = vmov 1.0  }
 0x759   :  { %5073 = vmatprep.subr.bf16.mxu0 %v5072_v4  ;;  %1306 = vmatprep.mubr.f32.mxu0 %v5853_v60 }
 0x75a   :  { %4279 = vmatprep.mubr.msk.f32.mxu1 %vm5854_vm8, %v5853_v60 }
 0x75b   :  { %5096 = vmatpush3.bf16.msra.mxu1 %v5095_v17  ;;  %v1230_v17 = vrot.slane %v6006_v34, %v6114_v20 }
 0x75c   :  { %5097 = vmatprep.subr.bf16.mxu1 %v5852_v45  ;;  %v1220_v45 = vld [vmem:[%s7987_s9 + $0x150] sm:$0xff] }
 0x75d   :  { %v5074_v48 = vpack.c.bf16 %v1223_v47, %v1220_v45 }
 0x75f   :  { %5075 = vmatpush1.bf16.msra.mxu0 %v5074_v48 }
 0x7d4   :  { %v1166_v24 = vpop.xlane.xlu0 %1165 }
 0x7d5   :  { %vm1167_vm7 = vcmp.eq.f32.partialorder %v6763_v58, %v1166_v24  ;;  %v1222_v58 = vld [vmem:[%s7987_s9 + $0x160] sm:$0xff]  ;;  %v1172_v18 = vcvt.f32.s32 %v1166_v24 }
 0x7d6   :  { %v1168_v25 = vsel %vm1167_vm7, %v1163_v53, inf  ;;  %v5098_v10 = vpack.c.bf16 %v1225_v41, %v1222_v58  ;;  %v1234_v53 = vrot.slane %v6006_v34, %v6385_v51 }
 0x7d7   :  { %1169 = vmin.xlane.f32.xlu1 %v1168_v25  ;;  %v1173_v5 = vshll.u32 %v1172_v18, 16 }
 0x7d8   :  { %5099 = vmatpush3.bf16.msra.mxu1 %v5098_v10 }
 0x864   :  { %v1170_v2 = vpop.xlane.xlu1 %1169 }
 0x865   :  { %v1171_v0 = vcvt.f32.s32 %v1170_v2 }
 0x867   :  { %v1174_v12 = vadd.s32 %v1173_v5, %v1171_v0 }
 0x869   :  { %vm1175_vm9 = vcmp.eq.s32.totalorder %v6757_v43, %v1174_v12 }
 0x86a   :  { %3614 = vmatmul.mubr.msk.f32.vlgmr.msra.gmra.mrb[0].mxu0 %vm1175_vm9, %v5855_v14  ;;  %4280 = vmatmul.mubr.msk.f32.vlgmr.msra.gmra.mrb[0].mxu1 %vm1175_vm9, %v5855_v14 }
 0x93d   :  { %v1308_v25 = vpop.f32.mrb[0].mxu0  ;;  %v1379_v24 = vpop.f32.mrb[0].mxu1 }
 0x93e   :  { %v1309_v55 = vadd.f32 %v1308_v25, %v1230_v17  ;;  %v1380_v35 = vadd.f32 %v1379_v24, %v1238_v29  ;;  %v1310_v4 = vpop.f32.mrb[1].mxu0  ;;  %v4281_v45 = vpop.f32.mrb[1].mxu1 }
 0x93f   :  { %v1311_v47 = vadd.f32 %v1310_v4, %v1234_v53 }
 0x940   :  { %1383 = vst [vmem:[#allocation3] sm:$0xff] %v1309_v55  ;;  %1385 = vst [vmem:[#allocation3 + $0x10] sm:$0xff] %v1380_v35 }
 0x941   :  { %1384 = vst [vmem:[#allocation3 + $0x8] sm:$0xff] %v1311_v47 }
 0x942 PF:  { %5101 = vmatprep.subr.bf16.mxu0 %v6087_v11  ;;  %5132 = vmatprep.subr.bf16.mxu1 %v5845_v7  ;;  %s3616_s15 = sld [smem:[#allocation5 + $0x1]]  ;;  %v1391_v58 = vld [vmem:[#allocation2 + $0x30] sm:$0xff]  ;;  %v1392_v60 = vld [vmem:[#allocation2 + $0x38] sm:$0xff]  ;;  %v1393_v45 = vld [vmem:[#allocation2 + $0x40] sm:$0xff]  ;;  %s3620_s3 = sld [smem:[#allocation5 + $0x2]] }
 0x943   :  { %5103 = vmatpush1.bf16.msra.mxu0 %v6111_v19  ;;  %5134 = vmatpush3.bf16.msra.mxu1 %v6199_v49 }
 0x944   :  { %5105 = vmatprep.subr.bf16.mxu0 %v6117_v21  ;;  %5135 = vmatprep.subr.bf16.mxu1 %v5845_v7 }
 0x945   :  { %1467 = vmatprep.mubr.f32.mxu0 %v5846_v8  ;;  %4314 = vmatprep.mubr.msk.f32.mxu1 %vm5847_vm0, %v5846_v8 }
 0x947   :  { %5107 = vmatpush1.bf16.msra.mxu0 %v6144_v30  ;;  %5137 = vmatpush3.bf16.msra.mxu1 %v6230_v59  ;;  %v1394_v48 = vld [vmem:[#allocation3] sm:$0xff]  ;;  %v1396_v47 = vld [vmem:[#allocation3 + $0x10] sm:$0xff] }
 0x948   :  { %5109 = vmatprep.subr.bf16.mxu0 %v6155_v33  ;;  %5138 = vmatprep.subr.bf16.mxu1 %v5845_v7  ;;  %p1387_p8 = scmp.ne.s32.totalorder %s3616_s15, 0  ;;  %v1395_v18 = vld [vmem:[#allocation3 + $0x8] sm:$0xff]  ;;  %p3621_p9 = scmp.ne.s32.totalorder %s3620_s3, 0 }
 0x949   :  { %vm5858_vm13 = vmmov (!%p3621_p9), 0  }
 0x94a   :  { %s1397_s6 = scalar_select %p1387_p8, 1, 0 }
 0x94b   :  { %5111 = vmatpush1.bf16.msra.mxu0 %v6177_v42  ;;  %5140 = vmatpush3.bf16.msra.mxu1 %v6264_v6 }
 0x94c   :  { %5113 = vmatprep.subr.bf16.mxu0 %v6184_v44  ;;  %5141 = vmatprep.subr.bf16.mxu1 %v5845_v7  ;;  %v1398_v43 = vstv %s1397_s6 }
 0x94d   :  { %vm6982_vm10 = vcmp.eq.s32.totalorder %v1398_v43, 1 }
 0x94e   :  { %v1400_v10 = vsel %vm6982_vm10, %v1391_v58, %v1394_v48  ;;  %v1401_v12 = vsel %vm6982_vm10, %v1392_v60, %v1395_v18  ;;  %v1402_v48 = vsel %vm6982_vm10, %v1393_v45, %v1396_v47  ;;  %v1666_v45 = vld [vmem:[%s7987_s9] sm:$0xff] (!%p3621_p9) }
 0x94f   :  { %5115 = vmatpush1.bf16.msra.mxu0 %v6208_v52  ;;  %5143 = vmatpush3.bf16.msra.mxu1 %v6298_v23 }
 0x950   :  { %5117 = vmatprep.subr.bf16.mxu0 %v6215_v54  ;;  %5144 = vmatprep.subr.bf16.mxu1 %v5845_v7 }
 0x953   :  { %5119 = vmatpush1.bf16.msra.mxu0 %v6242_v62  ;;  %5146 = vmatpush3.bf16.msra.mxu1 %v6326_v36 }
 0x954   :  { %5121 = vmatprep.subr.bf16.mxu0 %v6249_v1  ;;  %5147 = vmatprep.subr.bf16.mxu1 %v5845_v7 }
 0x957   :  { %5123 = vmatpush1.bf16.msra.mxu0 %v6276_v13  ;;  %5149 = vmatpush3.bf16.msra.mxu1 %v6343_v40 }
 0x958   :  { %5125 = vmatprep.subr.bf16.mxu0 %v6283_v15  ;;  %5150 = vmatprep.subr.bf16.mxu1 %v5845_v7 }
 0x95b   :  { %5127 = vmatpush1.bf16.msra.mxu0 %v6310_v26  ;;  %5152 = vmatpush3.bf16.msra.mxu1 %v6362_v46 }
 0x95c   :  { %5129 = vmatprep.subr.bf16.mxu0 %v6317_v28  ;;  %5153 = vmatprep.subr.bf16.mxu1 %v5845_v7 }
 0x95f   :  { %5131 = vmatpush1.bf16.msra.mxu0 %v6338_v39  ;;  %5155 = vmatpush3.bf16.msra.mxu1 %v6377_v50 }
 0x960   :  { %5156 = vmatprep.subr.bf16.mxu0 %v5845_v7 }
 0x962   :  { %1468 = vmatmul.mubr.f32.vlgmr.msra.gmra.mrb[0].mxu0 %v6749_v31  ;;  %4315 = vmatmul.mubr.f32.vlgmr.msra.gmra.mrb[0].mxu1 %v6749_v31 }
 0x963   :  { %5158 = vmatpush3.bf16.msra.mxu0 %v6397_v57  ;;  %4349 = vmatprep.mubr.msk.f32.mxu0 %vm5847_vm0, %v5846_v8 }
 0x964   :  { %5159 = vmatprep.subr.bf16.mxu0 %v5845_v7 }
 0x967   :  { %5161 = vmatpush3.bf16.msra.mxu0 %v6407_v61 }
 0x968   :  { %5162 = vmatprep.subr.bf16.mxu0 %v5845_v7 }
 0x96b   :  { %5164 = vmatpush3.bf16.msra.mxu0 %v6417_v3 }
 0x96c   :  { %5165 = vmatprep.subr.bf16.mxu0 %v5845_v7 }
 0x96f   :  { %5167 = vmatpush3.bf16.msra.mxu0 %v6427_v9 }
 0x970   :  { %5168 = vmatprep.subr.bf16.mxu0 %v5845_v7 }
 0x973   :  { %5170 = vmatpush3.bf16.msra.mxu0 %v6437_v16 }
 0x974   :  { %5171 = vmatprep.subr.bf16.mxu0 %v5845_v7 }
 0x977   :  { %5173 = vmatpush3.bf16.msra.mxu0 %v6447_v22 }
 0x978   :  { %5174 = vmatprep.subr.bf16.mxu0 %v5845_v7 }
 0x97b   :  { %5176 = vmatpush3.bf16.msra.mxu0 %v6456_v27 }
 0x97c   :  { %5177 = vmatprep.subr.bf16.mxu0 %v5845_v7 }
 0x97f   :  { %5179 = vmatpush3.bf16.msra.mxu0 %v6466_v37 }
 0xa35   :  { %v1469_v2 = vpop.f32.mrb[0].mxu0  ;;  %v1540_v5 = vpop.f32.mrb[0].mxu1 }
 0xa36   :  { %v1544_v0 = vadd.f32 %v1469_v2, %v1400_v10  ;;  %v1471_v14 = vpop.f32.mrb[1].mxu0  ;;  %v4316_v17 = vpop.f32.mrb[1].mxu1  ;;  %v1558_v43 = vadd.f32 %v6494_v32, %v1540_v5 }
 0xa37   :  { %v1551_v53 = vadd.f32 %v1471_v14, %v1401_v12 }
 0xa38   :  { %v3617_v29 = vmul.f32 -1.442695, %v1544_v0 }
 0xa39   :  { %v3618_v25 = vmul.f32 -1.442695, %v1551_v53  ;;  %v7002_v53 = vand.u32 (!%p3621_p9), 127, %v96_v63 }
 0xa3a   :  { %5780 = vpow2.f32 %v3617_v29 }
 0xa3b   :  { %5782 = vpow2.f32 %v3618_v25 }
 0xa44   :  { %v5781_v24 = vpop.eup %5780 }
 0xa45   :  { %v1548_v55 = vadd.f32 1.0, %v5781_v24  ;;  %v5783_v35 = vpop.eup %5782 }
 0xa46   :  { %v1555_v4 = vadd.f32 1.0, %v5783_v35  ;;  %v1667_v35 = vld [vmem:[%s7987_s9 + $0x8] sm:$0xff] (!%p3621_p9) }
 0xa47   :  { %5784 = vrcp.f32 %v1548_v55 }
 0xa48   :  { %5786 = vrcp.f32 %v1555_v4  ;;  %v1670_v4 = vld [vmem:[%s7987_s9 + $0x20] sm:$0xff] (!%p3621_p9) }
 0xa49   :  { %v5180_v47 = vpack.c.bf16 (!%p3621_p9), %v1670_v4, %v1667_v35  ;;  %v1679_v35 = vld [vmem:[%s7987_s9 + $0x68] sm:$0xff] (!%p3621_p9)  ;;  %v1682_v4 = vld [vmem:[%s7987_s9 + $0x80] sm:$0xff] (!%p3621_p9) }
 0xa4b   :  { %5181 = vmatprep.subr.bf16.mxu0 (!%p3621_p9), %v5180_v47  ;;  %v5188_v47 = vpack.c.bf16 (!%p3621_p9), %v1682_v4, %v1679_v35 }
 0xa51   :  { %v5785_v58 = vpop.eup %5784 }
 0xa52   :  { %v1559_v10 = vmul.f32 %v5785_v58, %v1558_v43  ;;  %v5787_v18 = vpop.eup %5786  ;;  %v5856_v43 = vmov (!%p3621_p9), 0.0|0.0   ;;  %v1669_v58 = vld [vmem:[%s7987_s9 + $0x18] sm:$0xff] (!%p3621_p9) }
 0xa53   :  { %v1562_v2 = vsub.f32 1.0, %v5787_v18  ;;  %v1564_v14 = vmul.f32 %v5787_v18, %v6749_v31  ;;  %5212 = vmatprep.subr.bf16.mxu1 (!%p3621_p9), %v5856_v43 }
 0xa54   :  { %v1560_v60 = vadd.f32 %v1559_v10, %v1402_v48  ;;  %v1668_v48 = vld [vmem:[%s7987_s9 + $0x10] sm:$0xff] (!%p3621_p9)  ;;  %v1671_v10 = vld [vmem:[%s7987_s9 + $0x28] sm:$0xff] (!%p3621_p9) }
 0xa55   :  { %v5213_v18 = vpack.c.bf16 (!%p3621_p9), %v1671_v10, %v1668_v48  ;;  %v1680_v48 = vld [vmem:[%s7987_s9 + $0x70] sm:$0xff] (!%p3621_p9)  ;;  %v1683_v10 = vld [vmem:[%s7987_s9 + $0x88] sm:$0xff] (!%p3621_p9) }
 0xa56   :  { %5788 = vtanh.f32 %v1560_v60  ;;  %v5182_v60 = vpack.c.bf16 (!%p3621_p9), %v1669_v58, %v1666_v45  ;;  %v1678_v45 = vld [vmem:[%s7987_s9 + $0x60] sm:$0xff] (!%p3621_p9)  ;;  %v1681_v58 = vld [vmem:[%s7987_s9 + $0x78] sm:$0xff] (!%p3621_p9) }
 0xa57   :  { %5214 = vmatpush3.bf16.msra.mxu1 (!%p3621_p9), %v5213_v18  ;;  %v1688_v18 = vld [vmem:[%s7987_s9 + $0xb0] sm:$0xff] (!%p3621_p9) }
 0xa58   :  { %5215 = vmatprep.subr.bf16.mxu1 (!%p3621_p9), %v5856_v43 }
 0xa60   :  { %v5789_v0 = vpop.eup %5788 }
 0xa61   :  { %v1563_v12 = vmul.f32 %v5789_v0, %v1562_v2  ;;  %v1673_v2 = vld [vmem:[%s7987_s9 + $0x38] sm:$0xff] (!%p3621_p9)  ;;  %v1676_v0 = vld [vmem:[%s7987_s9 + $0x50] sm:$0xff] (!%p3621_p9) }
 0xa63   :  { %v6994_v17 = vadd.f32 %v1564_v14, %v1563_v12  ;;  %v1672_v12 = vld [vmem:[%s7987_s9 + $0x30] sm:$0xff] (!%p3621_p9)  ;;  %v5184_v14 = vpack.c.bf16 (!%p3621_p9), %v1676_v0, %v1673_v2  ;;  %v5190_v2 = vpack.c.bf16 (!%p3621_p9), %v1681_v58, %v1678_v45  ;;  %v5219_v0 = vpack.c.bf16 (!%p3621_p9), %v1683_v10, %v1680_v48  ;;  %v1690_v45 = vld [vmem:[%s7987_s9 + $0xc0] sm:$0xff] (!%p3621_p9)  ;;  %v1693_v58 = vld [vmem:[%s7987_s9 + $0xd8] sm:$0xff] (!%p3621_p9) }
 0xa64   :  { %v1692_v48 = vld [vmem:[%s7987_s9 + $0xd0] sm:$0xff] (!%p3621_p9)  ;;  %v1695_v10 = vld [vmem:[%s7987_s9 + $0xe8] sm:$0xff] (!%p3621_p9) }
 0xa65   :  { %4350 = vmatmul.mubr.f32.vlgmr.msra.gmra.mrb[2].mxu0 %v6994_v17 }
 0xa66   :  { %5183 = vmatpush1.bf16.msra.mxu0 (!%p3621_p9), %v5182_v60  ;;  %v1685_v60 = vld [vmem:[%s7987_s9 + $0x98] sm:$0xff] (!%p3621_p9) }
 0xa67   :  { %5185 = vmatprep.subr.bf16.mxu0 (!%p3621_p9), %v5184_v14  ;;  %v5192_v14 = vpack.c.bf16 (!%p3621_p9), %v1688_v18, %v1685_v60  ;;  %v1697_v60 = vld [vmem:[%s7987_s9 + $0xf8] sm:$0xff] (!%p3621_p9)  ;;  %v1700_v18 = vld [vmem:[%s7987_s9 + $0x110] sm:$0xff] (!%p3621_p9) }
 0xb35   :  { %1642 = sbr.rel (%p3621_p9) target bundleno = 3530 (0xdca), region = 49 }
 0xb38   :  { %v1632_v5 = vpop.f32.mrb[2].mxu0 }
 0xb39   :  { %v1633_v29 = vadd.f32 %v6505_v56, %v1632_v5  ;;  %v4351_v41 = vpop.f32.mrb[3].mxu0  ;;  %v1675_v5 = vld [vmem:[%s7987_s9 + $0x48] sm:$0xff] (!%p3621_p9) }
 0xb3a   :  { %v1677_v41 = vld [vmem:[%s7987_s9 + $0x58] sm:$0xff] (!%p3621_p9) }
 0xb3b   :  { %3619 = vst [vmem:[%s7988_s10 + $0x10] sm:$0xff] %v1633_v29  ;;  %1645 = vmax.xlane.f32.xlu0 (!%p3621_p9), %v1633_v29 }
 0xbc8   :  { %v1646_v31 = vpop.xlane.xlu0 %1645 }
 0xbc9   :  { %vm1647_vm11 = vcmp.eq.f32.partialorder %v1633_v29, %v1646_v31  ;;  %v1674_v29 = vld [vmem:[%s7987_s9 + $0x40] sm:$0xff]  ;;  %v5186_v31 = vpack.c.bf16 %v1675_v5, %v1672_v12  ;;  %v1684_v12 = vld [vmem:[%s7987_s9 + $0x90] sm:$0xff]  ;;  %v1687_v5 = vld [vmem:[%s7987_s9 + $0xa8] sm:$0xff] }
 0xbca   :  { %v7005_v25 = vsel %vm1647_vm11, %v7002_v53, 128  ;;  %v5194_v35 = vpack.c.bf16 %v1687_v5, %v1684_v12  ;;  %v1696_v12 = vld [vmem:[%s7987_s9 + $0xf0] sm:$0xff]  ;;  %v1699_v5 = vld [vmem:[%s7987_s9 + $0x108] sm:$0xff] }
 0xbcb   :  { %v1650_v24 = vshra.s32 %v7005_v25, 16  ;;  %5187 = vmatpush1.bf16.msra.mxu0 %v5186_v31  ;;  %v1691_v31 = vld [vmem:[%s7987_s9 + $0xc8] sm:$0xff] }
 0xbcc   :  { %5189 = vmatprep.subr.bf16.mxu0 %v5188_v47 }
 0xbcd   :  { %v7008_v55 = vcvt.s32.f32 %v1650_v24  ;;  %v5216_v24 = vpack.c.bf16 %v1677_v41, %v1674_v29  ;;  %v1686_v29 = vld [vmem:[%s7987_s9 + $0xa0] sm:$0xff]  ;;  %v1689_v41 = vld [vmem:[%s7987_s9 + $0xb8] sm:$0xff] }
 0xbce   :  { %v5222_v4 = vpack.c.bf16 %v1689_v41, %v1686_v29  ;;  %v1698_v29 = vld [vmem:[%s7987_s9 + $0x100] sm:$0xff]  ;;  %v1701_v41 = vld [vmem:[%s7987_s9 + $0x118] sm:$0xff] }
 0xbcf   :  { %1653 = vmin.xlane.f32.xlu0 %v7008_v55  ;;  %5217 = vmatpush3.bf16.msra.mxu1 %v5216_v24  ;;  %v1694_v24 = vld [vmem:[%s7987_s9 + $0xe0] sm:$0xff] }
 0xbd0   :  { %5218 = vmatprep.subr.bf16.mxu1 %v5856_v43  ;;  %5191 = vmatpush1.bf16.msra.mxu0 %v5190_v2  ;;  %v5196_v47 = vpack.c.bf16 %v1694_v24, %v1691_v31  ;;  %v5198_v2 = vpack.c.bf16 %v1693_v58, %v1690_v45  ;;  %v1703_v31 = vld [vmem:[%s7987_s9 + $0x128] sm:$0xff]  ;;  %v1706_v24 = vld [vmem:[%s7987_s9 + $0x140] sm:$0xff]  ;;  %v1705_v58 = vld [vmem:[%s7987_s9 + $0x138] sm:$0xff] }
 0xbd1   :  { %5193 = vmatprep.subr.bf16.mxu0 %v5192_v14  ;;  %v5200_v14 = vpack.c.bf16 %v1700_v18, %v1697_v60  ;;  %v1702_v45 = vld [vmem:[%s7987_s9 + $0x120] sm:$0xff] }
 0xbd2   :  { %v5206_v60 = vpack.c.bf16 %v1705_v58, %v1702_v45 }
 0xbd3   :  { %5220 = vmatpush3.bf16.msra.mxu1 %v5219_v0  ;;  %v5225_v0 = vpack.c.bf16 %v1695_v10, %v1692_v48  ;;  %v1704_v48 = vld [vmem:[%s7987_s9 + $0x130] sm:$0xff]  ;;  %v1707_v10 = vld [vmem:[%s7987_s9 + $0x148] sm:$0xff] }
 0xbd4   :  { %5221 = vmatprep.subr.bf16.mxu1 %v5856_v43  ;;  %5195 = vmatpush1.bf16.msra.mxu0 %v5194_v35  ;;  %v5202_v35 = vpack.c.bf16 %v1699_v5, %v1696_v12  ;;  %v5231_v18 = vpack.c.bf16 %v1707_v10, %v1704_v48  ;;  %v1709_v5 = vld [vmem:[%s7987_s9 + $0x158] sm:$0xff] }
 0xbd5   :  { %5197 = vmatprep.subr.bf16.mxu0 %v5196_v47  ;;  %v5204_v47 = vpack.c.bf16 %v1706_v24, %v1703_v31  ;;  %v1713_v24 = vld [vmem:[%s7987_s9 + $0x178] sm:$0xff] }
 0xbd7   :  { %5223 = vmatpush3.bf16.msra.mxu1 %v5222_v4  ;;  %v5228_v4 = vpack.c.bf16 %v1701_v41, %v1698_v29  ;;  %v1712_v29 = vld [vmem:[%s7987_s9 + $0x170] sm:$0xff] }
 0xbd8   :  { %5224 = vmatprep.subr.bf16.mxu1 %v5856_v43  ;;  %5199 = vmatpush1.bf16.msra.mxu0 %v5198_v2  ;;  %v1649_v2 = vand.u32 65535, %v7005_v25  ;;  %v5208_v41 = vpack.c.bf16 %v1712_v29, %v1709_v5  ;;  %v1711_v25 = vld [vmem:[%s7987_s9 + $0x168] sm:$0xff] }
 0xbd9   :  { %5201 = vmatprep.subr.bf16.mxu0 %v5200_v14 }
 0xbda   :  { %v1651_v12 = vcvt.s32.f32 %v1649_v2  ;;  %v1726_v2 = vrot.slane %v6006_v34, %v6471_v38 }
 0xbdb   :  { %5226 = vmatpush3.bf16.msra.mxu1 %v5225_v0 }
 0xbdc   :  { %5227 = vmatprep.subr.bf16.mxu1 %v5856_v43  ;;  %5203 = vmatpush1.bf16.msra.mxu0 %v5202_v35 }
 0xbdd   :  { %5205 = vmatprep.subr.bf16.mxu0 %v5204_v47 }
 0xbdf   :  { %5229 = vmatpush3.bf16.msra.mxu1 %v5228_v4  ;;  %v5857_v4 = vmov 0.0  }
 0xbe0   :  { %5230 = vmatprep.subr.bf16.mxu1 %v5856_v43  ;;  %5207 = vmatpush1.bf16.msra.mxu0 %v5206_v60  ;;  %v5859_v60 = vmov 1.0  }
 0xbe1   :  { %5209 = vmatprep.subr.bf16.mxu0 %v5208_v41  ;;  %1794 = vmatprep.mubr.f32.mxu0 %v5857_v4 }
 0xbe2   :  { %4384 = vmatprep.mubr.msk.f32.mxu1 %vm5858_vm13, %v5857_v4 }
 0xbe3   :  { %5232 = vmatpush3.bf16.msra.mxu1 %v5231_v18  ;;  %v1718_v18 = vrot.slane %v6006_v34, %v6114_v20 }
 0xbe4   :  { %5233 = vmatprep.subr.bf16.mxu1 %v5856_v43  ;;  %v1708_v43 = vld [vmem:[%s7987_s9 + $0x150] sm:$0xff] }
 0xbe5   :  { %v5210_v31 = vpack.c.bf16 %v1711_v25, %v1708_v43 }
 0xbe7   :  { %5211 = vmatpush1.bf16.msra.mxu0 %v5210_v31 }
 0xc5c   :  { %v1654_v0 = vpop.xlane.xlu0 %1653 }
 0xc5d   :  { %vm1655_vm12 = vcmp.eq.f32.partialorder %v7008_v55, %v1654_v0  ;;  %v1710_v55 = vld [vmem:[%s7987_s9 + $0x160] sm:$0xff]  ;;  %v1660_v45 = vcvt.f32.s32 %v1654_v0 }
 0xc5e   :  { %v1656_v14 = vsel %vm1655_vm12, %v1651_v12, inf  ;;  %v5234_v35 = vpack.c.bf16 %v1713_v24, %v1710_v55  ;;  %v1722_v12 = vrot.slane %v6006_v34, %v6385_v51 }
 0xc5f   :  { %1657 = vmin.xlane.f32.xlu1 %v1656_v14  ;;  %v1661_v58 = vshll.u32 %v1660_v45, 16 }
 0xc60   :  { %5235 = vmatpush3.bf16.msra.mxu1 %v5234_v35 }
 0xcec   :  { %v1658_v47 = vpop.xlane.xlu1 %1657 }
 0xced   :  { %v1659_v48 = vcvt.f32.s32 %v1658_v47 }
 0xcef   :  { %v1662_v10 = vadd.s32 %v1661_v58, %v1659_v48 }
 0xcf1   :  { %vm1663_vm14 = vcmp.eq.s32.totalorder %v7002_v53, %v1662_v10 }
 0xcf2   :  { %3623 = vmatmul.mubr.msk.f32.vlgmr.msra.gmra.mrb[0].mxu0 %vm1663_vm14, %v5859_v60  ;;  %4385 = vmatmul.mubr.msk.f32.vlgmr.msra.gmra.mrb[0].mxu1 %vm1663_vm14, %v5859_v60 }
 0xdc5   :  { %v1796_v14 = vpop.f32.mrb[0].mxu0  ;;  %v1867_v0 = vpop.f32.mrb[0].mxu1 }
 0xdc6   :  { %v1797_v5 = vadd.f32 %v1796_v14, %v1718_v18  ;;  %v1868_v29 = vadd.f32 %v1867_v0, %v1726_v2  ;;  %v1798_v41 = vpop.f32.mrb[1].mxu0  ;;  %v4386_v43 = vpop.f32.mrb[1].mxu1 }
 0xdc7   :  { %v1799_v25 = vadd.f32 %v1798_v41, %v1722_v12 }
 0xdc8   :  { %1871 = vst [vmem:[#allocation3] sm:$0xff] %v1797_v5  ;;  %1873 = vst [vmem:[#allocation3 + $0x10] sm:$0xff] %v1868_v29 }
 0xdc9   :  { %1872 = vst [vmem:[#allocation3 + $0x8] sm:$0xff] %v1799_v25 }
 0xdca PF:  { %5237 = vmatprep.subr.bf16.mxu0 %v6087_v11  ;;  %5268 = vmatprep.subr.bf16.mxu1 %v5845_v7  ;;  %s3625_s23 = sld [smem:[#allocation5 + $0x2]]  ;;  %v1879_v55 = vld [vmem:[#allocation2 + $0x48] sm:$0xff]  ;;  %v1880_v4 = vld [vmem:[#allocation2 + $0x50] sm:$0xff]  ;;  %v1881_v43 = vld [vmem:[#allocation2 + $0x58] sm:$0xff]  ;;  %s3629_s25 = sld [smem:[#allocation5 + $0x3]] }
 0xdcb   :  { %5239 = vmatpush1.bf16.msra.mxu0 %v6111_v19  ;;  %5270 = vmatpush3.bf16.msra.mxu1 %v6199_v49 }
 0xdcc   :  { %5241 = vmatprep.subr.bf16.mxu0 %v6117_v21  ;;  %5271 = vmatprep.subr.bf16.mxu1 %v5845_v7 }
 0xdcd   :  { %1955 = vmatprep.mubr.f32.mxu0 %v5846_v8  ;;  %4419 = vmatprep.mubr.msk.f32.mxu1 %vm5847_vm0, %v5846_v8 }
 0xdcf   :  { %5243 = vmatpush1.bf16.msra.mxu0 %v6144_v30  ;;  %5273 = vmatpush3.bf16.msra.mxu1 %v6230_v59  ;;  %v1882_v31 = vld [vmem:[#allocation3] sm:$0xff]  ;;  %v1884_v25 = vld [vmem:[#allocation3 + $0x10] sm:$0xff] }
 0xdd0   :  { %5245 = vmatprep.subr.bf16.mxu0 %v6155_v33  ;;  %5274 = vmatprep.subr.bf16.mxu1 %v5845_v7  ;;  %p1875_p10 = scmp.ne.s32.totalorder %s3625_s23, 0  ;;  %v1883_v45 = vld [vmem:[#allocation3 + $0x8] sm:$0xff]  ;;  %p3630_p11 = scmp.ne.s32.totalorder %s3629_s25, 0 }
 0xdd1   :  { %vm5862_vm3 = vmmov (!%p3630_p11), 0  }
 0xdd2   :  { %s1885_s24 = scalar_select %p1875_p10, 1, 0 }
 0xdd3   :  { %5247 = vmatpush1.bf16.msra.mxu0 %v6177_v42  ;;  %5276 = vmatpush3.bf16.msra.mxu1 %v6264_v6 }
 0xdd4   :  { %5249 = vmatprep.subr.bf16.mxu0 %v6184_v44  ;;  %5277 = vmatprep.subr.bf16.mxu1 %v5845_v7  ;;  %v1886_v53 = vstv %s1885_s24 }
 0xdd5   :  { %vm7227_vm15 = vcmp.eq.s32.totalorder %v1886_v53, 1 }
 0xdd6   :  { %v1888_v35 = vsel %vm7227_vm15, %v1879_v55, %v1882_v31  ;;  %v1889_v10 = vsel %vm7227_vm15, %v1880_v4, %v1883_v45  ;;  %v1890_v31 = vsel %vm7227_vm15, %v1881_v43, %v1884_v25  ;;  %v2154_v43 = vld [vmem:[%s7987_s9] sm:$0xff] (!%p3630_p11) }
 0xdd7   :  { %5251 = vmatpush1.bf16.msra.mxu0 %v6208_v52  ;;  %5279 = vmatpush3.bf16.msra.mxu1 %v6298_v23 }
 0xdd8   :  { %5253 = vmatprep.subr.bf16.mxu0 %v6215_v54  ;;  %5280 = vmatprep.subr.bf16.mxu1 %v5845_v7 }
 0xddb   :  { %5255 = vmatpush1.bf16.msra.mxu0 %v6242_v62  ;;  %5282 = vmatpush3.bf16.msra.mxu1 %v6326_v36 }
 0xddc   :  { %5257 = vmatprep.subr.bf16.mxu0 %v6249_v1  ;;  %5283 = vmatprep.subr.bf16.mxu1 %v5845_v7 }
 0xddf   :  { %5259 = vmatpush1.bf16.msra.mxu0 %v6276_v13  ;;  %5285 = vmatpush3.bf16.msra.mxu1 %v6343_v40 }
 0xde0   :  { %5261 = vmatprep.subr.bf16.mxu0 %v6283_v15  ;;  %5286 = vmatprep.subr.bf16.mxu1 %v5845_v7 }
 0xde3   :  { %5263 = vmatpush1.bf16.msra.mxu0 %v6310_v26  ;;  %5288 = vmatpush3.bf16.msra.mxu1 %v6362_v46 }
 0xde4   :  { %5265 = vmatprep.subr.bf16.mxu0 %v6317_v28  ;;  %5289 = vmatprep.subr.bf16.mxu1 %v5845_v7 }
 0xde7   :  { %5267 = vmatpush1.bf16.msra.mxu0 %v6338_v39  ;;  %5291 = vmatpush3.bf16.msra.mxu1 %v6377_v50 }
 0xde8   :  { %5292 = vmatprep.subr.bf16.mxu0 %v5845_v7 }
 0xdea   :  { %1956 = vmatmul.mubr.f32.vlgmr.msra.gmra.mrb[0].mxu0 %v6994_v17  ;;  %4420 = vmatmul.mubr.f32.vlgmr.msra.gmra.mrb[0].mxu1 %v6994_v17 }
 0xdeb   :  { %5294 = vmatpush3.bf16.msra.mxu0 %v6397_v57  ;;  %4454 = vmatprep.mubr.msk.f32.mxu0 %vm5847_vm0, %v5846_v8 }
 0xdec   :  { %5295 = vmatprep.subr.bf16.mxu0 %v5845_v7 }
 0xdef   :  { %5297 = vmatpush3.bf16.msra.mxu0 %v6407_v61 }
 0xdf0   :  { %5298 = vmatprep.subr.bf16.mxu0 %v5845_v7 }
 0xdf3   :  { %5300 = vmatpush3.bf16.msra.mxu0 %v6417_v3 }
 0xdf4   :  { %5301 = vmatprep.subr.bf16.mxu0 %v5845_v7 }
 0xdf7   :  { %5303 = vmatpush3.bf16.msra.mxu0 %v6427_v9 }
 0xdf8   :  { %5304 = vmatprep.subr.bf16.mxu0 %v5845_v7 }
 0xdfb   :  { %5306 = vmatpush3.bf16.msra.mxu0 %v6437_v16 }
 0xdfc   :  { %5307 = vmatprep.subr.bf16.mxu0 %v5845_v7 }
 0xdff   :  { %5309 = vmatpush3.bf16.msra.mxu0 %v6447_v22 }
 0xe00   :  { %5310 = vmatprep.subr.bf16.mxu0 %v5845_v7 }
 0xe03   :  { %5312 = vmatpush3.bf16.msra.mxu0 %v6456_v27 }
 0xe04   :  { %5313 = vmatprep.subr.bf16.mxu0 %v5845_v7 }
 0xe07   :  { %5315 = vmatpush3.bf16.msra.mxu0 %v6466_v37 }
 0xebd   :  { %v1957_v47 = vpop.f32.mrb[0].mxu0  ;;  %v2028_v58 = vpop.f32.mrb[0].mxu1 }
 0xebe   :  { %v2032_v48 = vadd.f32 %v1957_v47, %v1888_v35  ;;  %v1959_v60 = vpop.f32.mrb[1].mxu0  ;;  %v4421_v18 = vpop.f32.mrb[1].mxu1  ;;  %v2046_v53 = vadd.f32 %v6494_v32, %v2028_v58 }
 0xebf   :  { %v2039_v12 = vadd.f32 %v1959_v60, %v1889_v10 }
 0xec0   :  { %v3626_v2 = vmul.f32 -1.442695, %v2032_v48 }
 0xec1   :  { %v3627_v14 = vmul.f32 -1.442695, %v2039_v12  ;;  %v7247_v12 = vand.u32 (!%p3630_p11), 127, %v96_v63 }
 0xec2   :  { %5790 = vpow2.f32 %v3626_v2 }
 0xec3   :  { %5792 = vpow2.f32 %v3627_v14 }
 0xecc   :  { %v5791_v0 = vpop.eup %5790 }
 0xecd   :  { %v2036_v5 = vadd.f32 1.0, %v5791_v0  ;;  %v5793_v29 = vpop.eup %5792 }
 0xece   :  { %v2043_v41 = vadd.f32 1.0, %v5793_v29  ;;  %v2155_v29 = vld [vmem:[%s7987_s9 + $0x8] sm:$0xff] (!%p3630_p11) }
 0xecf   :  { %5794 = vrcp.f32 %v2036_v5 }
 0xed0   :  { %5796 = vrcp.f32 %v2043_v41  ;;  %v2158_v41 = vld [vmem:[%s7987_s9 + $0x20] sm:$0xff] (!%p3630_p11) }
 0xed1   :  { %v5316_v25 = vpack.c.bf16 (!%p3630_p11), %v2158_v41, %v2155_v29  ;;  %v2167_v29 = vld [vmem:[%s7987_s9 + $0x68] sm:$0xff] (!%p3630_p11)  ;;  %v2170_v41 = vld [vmem:[%s7987_s9 + $0x80] sm:$0xff] (!%p3630_p11) }
 0xed3   :  { %5317 = vmatprep.subr.bf16.mxu0 (!%p3630_p11), %v5316_v25  ;;  %v5324_v25 = vpack.c.bf16 (!%p3630_p11), %v2170_v41, %v2167_v29 }
 0xed9   :  { %v5795_v55 = vpop.eup %5794 }
 0xeda   :  { %v2047_v35 = vmul.f32 %v5795_v55, %v2046_v53  ;;  %v5797_v45 = vpop.eup %5796  ;;  %v5860_v53 = vmov (!%p3630_p11), 0.0|0.0   ;;  %v2157_v55 = vld [vmem:[%s7987_s9 + $0x18] sm:$0xff] (!%p3630_p11) }
 0xedb   :  { %v2050_v47 = vsub.f32 1.0, %v5797_v45  ;;  %v2052_v60 = vmul.f32 %v5797_v45, %v6994_v17  ;;  %5348 = vmatprep.subr.bf16.mxu1 (!%p3630_p11), %v5860_v53 }
 0xedc   :  { %v2048_v4 = vadd.f32 %v2047_v35, %v1890_v31  ;;  %v2156_v31 = vld [vmem:[%s7987_s9 + $0x10] sm:$0xff] (!%p3630_p11)  ;;  %v2159_v35 = vld [vmem:[%s7987_s9 + $0x28] sm:$0xff] (!%p3630_p11) }
 0xedd   :  { %v5349_v45 = vpack.c.bf16 (!%p3630_p11), %v2159_v35, %v2156_v31  ;;  %v2168_v31 = vld [vmem:[%s7987_s9 + $0x70] sm:$0xff] (!%p3630_p11)  ;;  %v2171_v35 = vld [vmem:[%s7987_s9 + $0x88] sm:$0xff] (!%p3630_p11) }
 0xede   :  { %5798 = vtanh.f32 %v2048_v4  ;;  %v5318_v4 = vpack.c.bf16 (!%p3630_p11), %v2157_v55, %v2154_v43  ;;  %v2166_v43 = vld [vmem:[%s7987_s9 + $0x60] sm:$0xff] (!%p3630_p11)  ;;  %v2169_v55 = vld [vmem:[%s7987_s9 + $0x78] sm:$0xff] (!%p3630_p11) }
 0xedf   :  { %5350 = vmatpush3.bf16.msra.mxu1 (!%p3630_p11), %v5349_v45  ;;  %v2176_v45 = vld [vmem:[%s7987_s9 + $0xb0] sm:$0xff] (!%p3630_p11) }
 0xee0   :  { %5351 = vmatprep.subr.bf16.mxu1 (!%p3630_p11), %v5860_v53 }
 0xee8   :  { %v5799_v48 = vpop.eup %5798 }
 0xee9   :  { %v2051_v10 = vmul.f32 %v5799_v48, %v2050_v47  ;;  %v2161_v47 = vld [vmem:[%s7987_s9 + $0x38] sm:$0xff] (!%p3630_p11)  ;;  %v2164_v48 = vld [vmem:[%s7987_s9 + $0x50] sm:$0xff] (!%p3630_p11) }
 0xeeb   :  { %v7239_v18 = vadd.f32 %v2052_v60, %v2051_v10  ;;  %v2160_v10 = vld [vmem:[%s7987_s9 + $0x30] sm:$0xff] (!%p3630_p11)  ;;  %v5320_v60 = vpack.c.bf16 (!%p3630_p11), %v2164_v48, %v2161_v47  ;;  %v5326_v47 = vpack.c.bf16 (!%p3630_p11), %v2169_v55, %v2166_v43  ;;  %v5355_v48 = vpack.c.bf16 (!%p3630_p11), %v2171_v35, %v2168_v31  ;;  %v2178_v43 = vld [vmem:[%s7987_s9 + $0xc0] sm:$0xff] (!%p3630_p11)  ;;  %v2181_v55 = vld [vmem:[%s7987_s9 + $0xd8] sm:$0xff] (!%p3630_p11) }
 0xeec   :  { %v2180_v31 = vld [vmem:[%s7987_s9 + $0xd0] sm:$0xff] (!%p3630_p11)  ;;  %v2183_v35 = vld [vmem:[%s7987_s9 + $0xe8] sm:$0xff] (!%p3630_p11) }
 0xeed   :  { %4455 = vmatmul.mubr.f32.vlgmr.msra.gmra.mrb[2].mxu0 %v7239_v18 }
 0xeee   :  { %5319 = vmatpush1.bf16.msra.mxu0 (!%p3630_p11), %v5318_v4  ;;  %v2173_v4 = vld [vmem:[%s7987_s9 + $0x98] sm:$0xff] (!%p3630_p11) }
 0xeef   :  { %5321 = vmatprep.subr.bf16.mxu0 (!%p3630_p11), %v5320_v60  ;;  %v5328_v60 = vpack.c.bf16 (!%p3630_p11), %v2176_v45, %v2173_v4  ;;  %v2185_v4 = vld [vmem:[%s7987_s9 + $0xf8] sm:$0xff] (!%p3630_p11)  ;;  %v2188_v45 = vld [vmem:[%s7987_s9 + $0x110] sm:$0xff] (!%p3630_p11) }
 0xfbd   :  { %2130 = sbr.rel (%p3630_p11) target bundleno = 4690 (0x1252), region = 53 }
 0xfc0   :  { %v2120_v58 = vpop.f32.mrb[2].mxu0 }
 0xfc1   :  { %v2121_v2 = vadd.f32 %v6505_v56, %v2120_v58  ;;  %v4456_v24 = vpop.f32.mrb[3].mxu0  ;;  %v2163_v58 = vld [vmem:[%s7987_s9 + $0x48] sm:$0xff] (!%p3630_p11) }
 0xfc2   :  { %v2165_v24 = vld [vmem:[%s7987_s9 + $0x58] sm:$0xff] (!%p3630_p11) }
 0xfc3   :  { %3628 = vst [vmem:[%s7988_s10 + $0x18] sm:$0xff] %v2121_v2  ;;  %2133 = vmax.xlane.f32.xlu0 (!%p3630_p11), %v2121_v2 }
0x1050   :  { %v2134_v17 = vpop.xlane.xlu0 %2133 }
0x1051   :  { %vm2135_vm1 = vcmp.eq.f32.partialorder %v2121_v2, %v2134_v17  ;;  %v2162_v2 = vld [vmem:[%s7987_s9 + $0x40] sm:$0xff]  ;;  %v5322_v17 = vpack.c.bf16 %v2163_v58, %v2160_v10  ;;  %v2172_v10 = vld [vmem:[%s7987_s9 + $0x90] sm:$0xff]  ;;  %v2175_v58 = vld [vmem:[%s7987_s9 + $0xa8] sm:$0xff] }
0x1052   :  { %v7250_v14 = vsel %vm2135_vm1, %v7247_v12, 128  ;;  %v5330_v29 = vpack.c.bf16 %v2175_v58, %v2172_v10  ;;  %v2184_v10 = vld [vmem:[%s7987_s9 + $0xf0] sm:$0xff]  ;;  %v2187_v58 = vld [vmem:[%s7987_s9 + $0x108] sm:$0xff] }
0x1053   :  { %v2138_v0 = vshra.s32 %v7250_v14, 16  ;;  %5323 = vmatpush1.bf16.msra.mxu0 %v5322_v17  ;;  %v2179_v17 = vld [vmem:[%s7987_s9 + $0xc8] sm:$0xff] }
0x1054   :  { %5325 = vmatprep.subr.bf16.mxu0 %v5324_v25 }
0x1055   :  { %v7253_v5 = vcvt.s32.f32 %v2138_v0  ;;  %v5352_v0 = vpack.c.bf16 %v2165_v24, %v2162_v2  ;;  %v2174_v2 = vld [vmem:[%s7987_s9 + $0xa0] sm:$0xff]  ;;  %v2177_v24 = vld [vmem:[%s7987_s9 + $0xb8] sm:$0xff] }
0x1056   :  { %v5358_v41 = vpack.c.bf16 %v2177_v24, %v2174_v2  ;;  %v2186_v2 = vld [vmem:[%s7987_s9 + $0x100] sm:$0xff]  ;;  %v2189_v24 = vld [vmem:[%s7987_s9 + $0x118] sm:$0xff] }
0x1057   :  { %2141 = vmin.xlane.f32.xlu0 %v7253_v5  ;;  %5353 = vmatpush3.bf16.msra.mxu1 %v5352_v0  ;;  %v2182_v0 = vld [vmem:[%s7987_s9 + $0xe0] sm:$0xff] }
0x1058   :  { %5354 = vmatprep.subr.bf16.mxu1 %v5860_v53  ;;  %5327 = vmatpush1.bf16.msra.mxu0 %v5326_v47  ;;  %v5332_v25 = vpack.c.bf16 %v2182_v0, %v2179_v17  ;;  %v5334_v47 = vpack.c.bf16 %v2181_v55, %v2178_v43  ;;  %v2191_v17 = vld [vmem:[%s7987_s9 + $0x128] sm:$0xff]  ;;  %v2194_v0 = vld [vmem:[%s7987_s9 + $0x140] sm:$0xff]  ;;  %v2193_v55 = vld [vmem:[%s7987_s9 + $0x138] sm:$0xff] }
0x1059   :  { %5329 = vmatprep.subr.bf16.mxu0 %v5328_v60  ;;  %v5336_v60 = vpack.c.bf16 %v2188_v45, %v2185_v4  ;;  %v2190_v43 = vld [vmem:[%s7987_s9 + $0x120] sm:$0xff] }
0x105a   :  { %v5342_v4 = vpack.c.bf16 %v2193_v55, %v2190_v43 }
0x105b   :  { %5356 = vmatpush3.bf16.msra.mxu1 %v5355_v48  ;;  %v5361_v48 = vpack.c.bf16 %v2183_v35, %v2180_v31  ;;  %v2192_v31 = vld [vmem:[%s7987_s9 + $0x130] sm:$0xff]  ;;  %v2195_v35 = vld [vmem:[%s7987_s9 + $0x148] sm:$0xff] }
0x105c   :  { %5357 = vmatprep.subr.bf16.mxu1 %v5860_v53  ;;  %5331 = vmatpush1.bf16.msra.mxu0 %v5330_v29  ;;  %v5338_v29 = vpack.c.bf16 %v2187_v58, %v2184_v10  ;;  %v5367_v45 = vpack.c.bf16 %v2195_v35, %v2192_v31  ;;  %v2197_v58 = vld [vmem:[%s7987_s9 + $0x158] sm:$0xff] }
0x105d   :  { %5333 = vmatprep.subr.bf16.mxu0 %v5332_v25  ;;  %v5340_v25 = vpack.c.bf16 %v2194_v0, %v2191_v17  ;;  %v2201_v0 = vld [vmem:[%s7987_s9 + $0x178] sm:$0xff] }
0x105f   :  { %5359 = vmatpush3.bf16.msra.mxu1 %v5358_v41  ;;  %v5364_v41 = vpack.c.bf16 %v2189_v24, %v2186_v2  ;;  %v2200_v2 = vld [vmem:[%s7987_s9 + $0x170] sm:$0xff] }
0x1060   :  { %5360 = vmatprep.subr.bf16.mxu1 %v5860_v53  ;;  %5335 = vmatpush1.bf16.msra.mxu0 %v5334_v47  ;;  %v2137_v47 = vand.u32 65535, %v7250_v14  ;;  %v5344_v24 = vpack.c.bf16 %v2200_v2, %v2197_v58  ;;  %v2199_v14 = vld [vmem:[%s7987_s9 + $0x168] sm:$0xff] }
0x1061   :  { %5337 = vmatprep.subr.bf16.mxu0 %v5336_v60 }
0x1062   :  { %v2139_v10 = vcvt.s32.f32 %v2137_v47  ;;  %v2214_v47 = vrot.slane %v6006_v34, %v6471_v38 }
0x1063   :  { %5362 = vmatpush3.bf16.msra.mxu1 %v5361_v48 }
0x1064   :  { %5363 = vmatprep.subr.bf16.mxu1 %v5860_v53  ;;  %5339 = vmatpush1.bf16.msra.mxu0 %v5338_v29 }
0x1065   :  { %5341 = vmatprep.subr.bf16.mxu0 %v5340_v25 }
0x1067   :  { %5365 = vmatpush3.bf16.msra.mxu1 %v5364_v41  ;;  %v5861_v41 = vmov 0.0  }
0x1068   :  { %5366 = vmatprep.subr.bf16.mxu1 %v5860_v53  ;;  %5343 = vmatpush1.bf16.msra.mxu0 %v5342_v4  ;;  %v5863_v4 = vmov 1.0  }
0x1069   :  { %5345 = vmatprep.subr.bf16.mxu0 %v5344_v24  ;;  %2282 = vmatprep.mubr.f32.mxu0 %v5861_v41 }
0x106a   :  { %4489 = vmatprep.mubr.msk.f32.mxu1 %vm5862_vm3, %v5861_v41 }
0x106b   :  { %5368 = vmatpush3.bf16.msra.mxu1 %v5367_v45  ;;  %v2206_v45 = vrot.slane %v6006_v34, %v6114_v20 }
0x106c   :  { %5369 = vmatprep.subr.bf16.mxu1 %v5860_v53  ;;  %v2196_v53 = vld [vmem:[%s7987_s9 + $0x150] sm:$0xff] }
0x106d   :  { %v5346_v17 = vpack.c.bf16 %v2199_v14, %v2196_v53 }
0x106f   :  { %5347 = vmatpush1.bf16.msra.mxu0 %v5346_v17 }
0x10e4   :  { %v2142_v48 = vpop.xlane.xlu0 %2141 }
0x10e5   :  { %vm2143_vm2 = vcmp.eq.f32.partialorder %v7253_v5, %v2142_v48  ;;  %v2198_v5 = vld [vmem:[%s7987_s9 + $0x160] sm:$0xff]  ;;  %v2148_v43 = vcvt.f32.s32 %v2142_v48 }
0x10e6   :  { %v2144_v60 = vsel %vm2143_vm2, %v2139_v10, inf  ;;  %v5370_v29 = vpack.c.bf16 %v2201_v0, %v2198_v5  ;;  %v2210_v10 = vrot.slane %v6006_v34, %v6385_v51 }
0x10e7   :  { %2145 = vmin.xlane.f32.xlu1 %v2144_v60  ;;  %v2149_v55 = vshll.u32 %v2148_v43, 16 }
0x10e8   :  { %5371 = vmatpush3.bf16.msra.mxu1 %v5370_v29 }
0x1174   :  { %v2146_v25 = vpop.xlane.xlu1 %2145 }
0x1175   :  { %v2147_v31 = vcvt.f32.s32 %v2146_v25 }
0x1177   :  { %v2150_v35 = vadd.s32 %v2149_v55, %v2147_v31 }
0x1179   :  { %vm2151_vm4 = vcmp.eq.s32.totalorder %v7247_v12, %v2150_v35 }
0x117a   :  { %3632 = vmatmul.mubr.msk.f32.vlgmr.msra.gmra.mrb[0].mxu0 %vm2151_vm4, %v5863_v4  ;;  %4490 = vmatmul.mubr.msk.f32.vlgmr.msra.gmra.mrb[0].mxu1 %vm2151_vm4, %v5863_v4 }
0x124d   :  { %v2284_v60 = vpop.f32.mrb[0].mxu0  ;;  %v2355_v48 = vpop.f32.mrb[0].mxu1 }
0x124e   :  { %v2285_v58 = vadd.f32 %v2284_v60, %v2206_v45  ;;  %v2356_v2 = vadd.f32 %v2355_v48, %v2214_v47  ;;  %v2286_v24 = vpop.f32.mrb[1].mxu0  ;;  %v4491_v53 = vpop.f32.mrb[1].mxu1 }
0x124f   :  { %v2287_v14 = vadd.f32 %v2286_v24, %v2210_v10 }
0x1250   :  { %2359 = vst [vmem:[#allocation3] sm:$0xff] %v2285_v58  ;;  %2361 = vst [vmem:[#allocation3 + $0x10] sm:$0xff] %v2356_v2 }
0x1251   :  { %2360 = vst [vmem:[#allocation3 + $0x8] sm:$0xff] %v2287_v14 }
0x1252 PF:  { %5373 = vmatprep.subr.bf16.mxu0 %v6087_v11  ;;  %5404 = vmatprep.subr.bf16.mxu1 %v5845_v7  ;;  %s3634_s7 = sld [smem:[#allocation5 + $0x3]]  ;;  %v2367_v5 = vld [vmem:[#allocation2 + $0x60] sm:$0xff]  ;;  %v2368_v41 = vld [vmem:[#allocation2 + $0x68] sm:$0xff]  ;;  %v2369_v53 = vld [vmem:[#allocation2 + $0x70] sm:$0xff]  ;;  %s3638_s6 = sld [smem:[#allocation5 + $0x4]] }
0x1253   :  { %5375 = vmatpush1.bf16.msra.mxu0 %v6111_v19  ;;  %5406 = vmatpush3.bf16.msra.mxu1 %v6199_v49 }
0x1254   :  { %5377 = vmatprep.subr.bf16.mxu0 %v6117_v21  ;;  %5407 = vmatprep.subr.bf16.mxu1 %v5845_v7 }
0x1255   :  { %2443 = vmatprep.mubr.f32.mxu0 %v5846_v8  ;;  %4524 = vmatprep.mubr.msk.f32.mxu1 %vm5847_vm0, %v5846_v8 }
0x1257   :  { %5379 = vmatpush1.bf16.msra.mxu0 %v6144_v30  ;;  %5409 = vmatpush3.bf16.msra.mxu1 %v6230_v59  ;;  %v2370_v17 = vld [vmem:[#allocation3] sm:$0xff]  ;;  %v2372_v14 = vld [vmem:[#allocation3 + $0x10] sm:$0xff] }
0x1258   :  { %5381 = vmatprep.subr.bf16.mxu0 %v6155_v33  ;;  %5410 = vmatprep.subr.bf16.mxu1 %v5845_v7  ;;  %p2363_p12 = scmp.ne.s32.totalorder %s3634_s7, 0  ;;  %v2371_v43 = vld [vmem:[#allocation3 + $0x8] sm:$0xff]  ;;  %p3639_p13 = scmp.ne.s32.totalorder %s3638_s6, 0 }
0x1259   :  { %vm5866_vm8 = vmmov (!%p3639_p13), 0  }
0x125a   :  { %s2373_s15 = scalar_select %p2363_p12, 1, 0 }
0x125b   :  { %5383 = vmatpush1.bf16.msra.mxu0 %v6177_v42  ;;  %5412 = vmatpush3.bf16.msra.mxu1 %v6264_v6 }
0x125c   :  { %5385 = vmatprep.subr.bf16.mxu0 %v6184_v44  ;;  %5413 = vmatprep.subr.bf16.mxu1 %v5845_v7  ;;  %v2374_v12 = vstv %s2373_s15 }
0x125d   :  { %vm7472_vm5 = vcmp.eq.s32.totalorder %v2374_v12, 1 }
0x125e   :  { %v2376_v29 = vsel %vm7472_vm5, %v2367_v5, %v2370_v17  ;;  %v2377_v35 = vsel %vm7472_vm5, %v2368_v41, %v2371_v43  ;;  %v2378_v17 = vsel %vm7472_vm5, %v2369_v53, %v2372_v14  ;;  %v2642_v53 = vld [vmem:[%s7987_s9] sm:$0xff] (!%p3639_p13) }
0x125f   :  { %5387 = vmatpush1.bf16.msra.mxu0 %v6208_v52  ;;  %5415 = vmatpush3.bf16.msra.mxu1 %v6298_v23 }
0x1260   :  { %5389 = vmatprep.subr.bf16.mxu0 %v6215_v54  ;;  %5416 = vmatprep.subr.bf16.mxu1 %v5845_v7 }
0x1263   :  { %5391 = vmatpush1.bf16.msra.mxu0 %v6242_v62  ;;  %5418 = vmatpush3.bf16.msra.mxu1 %v6326_v36 }
0x1264   :  { %5393 = vmatprep.subr.bf16.mxu0 %v6249_v1  ;;  %5419 = vmatprep.subr.bf16.mxu1 %v5845_v7 }
0x1267   :  { %5395 = vmatpush1.bf16.msra.mxu0 %v6276_v13  ;;  %5421 = vmatpush3.bf16.msra.mxu1 %v6343_v40 }
0x1268   :  { %5397 = vmatprep.subr.bf16.mxu0 %v6283_v15  ;;  %5422 = vmatprep.subr.bf16.mxu1 %v5845_v7 }
0x126b   :  { %5399 = vmatpush1.bf16.msra.mxu0 %v6310_v26  ;;  %5424 = vmatpush3.bf16.msra.mxu1 %v6362_v46 }
0x126c   :  { %5401 = vmatprep.subr.bf16.mxu0 %v6317_v28  ;;  %5425 = vmatprep.subr.bf16.mxu1 %v5845_v7 }
0x126f   :  { %5403 = vmatpush1.bf16.msra.mxu0 %v6338_v39  ;;  %5427 = vmatpush3.bf16.msra.mxu1 %v6377_v50 }
0x1270   :  { %5428 = vmatprep.subr.bf16.mxu0 %v5845_v7 }
0x1272   :  { %2444 = vmatmul.mubr.f32.vlgmr.msra.gmra.mrb[0].mxu0 %v7239_v18  ;;  %4525 = vmatmul.mubr.f32.vlgmr.msra.gmra.mrb[0].mxu1 %v7239_v18 }
0x1273   :  { %5430 = vmatpush3.bf16.msra.mxu0 %v6397_v57  ;;  %4559 = vmatprep.mubr.msk.f32.mxu0 %vm5847_vm0, %v5846_v8 }
0x1274   :  { %5431 = vmatprep.subr.bf16.mxu0 %v5845_v7 }
0x1277   :  { %5433 = vmatpush3.bf16.msra.mxu0 %v6407_v61 }
0x1278   :  { %5434 = vmatprep.subr.bf16.mxu0 %v5845_v7 }
0x127b   :  { %5436 = vmatpush3.bf16.msra.mxu0 %v6417_v3 }
0x127c   :  { %5437 = vmatprep.subr.bf16.mxu0 %v5845_v7 }
0x127f   :  { %5439 = vmatpush3.bf16.msra.mxu0 %v6427_v9 }
0x1280   :  { %5440 = vmatprep.subr.bf16.mxu0 %v5845_v7 }
0x1283   :  { %5442 = vmatpush3.bf16.msra.mxu0 %v6437_v16 }
0x1284   :  { %5443 = vmatprep.subr.bf16.mxu0 %v5845_v7 }
0x1287   :  { %5445 = vmatpush3.bf16.msra.mxu0 %v6447_v22 }
0x1288   :  { %5446 = vmatprep.subr.bf16.mxu0 %v5845_v7 }
0x128b   :  { %5448 = vmatpush3.bf16.msra.mxu0 %v6456_v27 }
0x128c   :  { %5449 = vmatprep.subr.bf16.mxu0 %v5845_v7 }
0x128f   :  { %5451 = vmatpush3.bf16.msra.mxu0 %v6466_v37 }
0x1345   :  { %v2445_v25 = vpop.f32.mrb[0].mxu0  ;;  %v2516_v55 = vpop.f32.mrb[0].mxu1 }
0x1346   :  { %v2520_v31 = vadd.f32 %v2445_v25, %v2376_v29  ;;  %v2447_v4 = vpop.f32.mrb[1].mxu0  ;;  %v4526_v45 = vpop.f32.mrb[1].mxu1  ;;  %v2534_v12 = vadd.f32 %v6494_v32, %v2516_v55 }
0x1347   :  { %v2527_v10 = vadd.f32 %v2447_v4, %v2377_v35 }
0x1348   :  { %v3635_v47 = vmul.f32 -1.442695, %v2520_v31 }
0x1349   :  { %v3636_v60 = vmul.f32 -1.442695, %v2527_v10  ;;  %v7492_v10 = vand.u32 (!%p3639_p13), 127, %v96_v63 }
0x134a   :  { %5800 = vpow2.f32 %v3635_v47 }
0x134b   :  { %5802 = vpow2.f32 %v3636_v60 }
0x1354   :  { %v5801_v48 = vpop.eup %5800 }
0x1355   :  { %v2524_v58 = vadd.f32 1.0, %v5801_v48  ;;  %v5803_v2 = vpop.eup %5802 }
0x1356   :  { %v2531_v24 = vadd.f32 1.0, %v5803_v2  ;;  %v2643_v2 = vld [vmem:[%s7987_s9 + $0x8] sm:$0xff] (!%p3639_p13) }
0x1357   :  { %5804 = vrcp.f32 %v2524_v58 }
0x1358   :  { %5806 = vrcp.f32 %v2531_v24  ;;  %v2646_v24 = vld [vmem:[%s7987_s9 + $0x20] sm:$0xff] (!%p3639_p13) }
0x1359   :  { %v5452_v14 = vpack.c.bf16 (!%p3639_p13), %v2646_v24, %v2643_v2  ;;  %v2655_v2 = vld [vmem:[%s7987_s9 + $0x68] sm:$0xff] (!%p3639_p13)  ;;  %v2658_v24 = vld [vmem:[%s7987_s9 + $0x80] sm:$0xff] (!%p3639_p13) }
0x135b   :  { %5453 = vmatprep.subr.bf16.mxu0 (!%p3639_p13), %v5452_v14  ;;  %v5460_v14 = vpack.c.bf16 (!%p3639_p13), %v2658_v24, %v2655_v2 }
0x1361   :  { %v5805_v5 = vpop.eup %5804 }
0x1362   :  { %v2535_v29 = vmul.f32 %v5805_v5, %v2534_v12  ;;  %v5807_v43 = vpop.eup %5806  ;;  %v5864_v12 = vmov (!%p3639_p13), 0.0|0.0   ;;  %v2645_v5 = vld [vmem:[%s7987_s9 + $0x18] sm:$0xff] (!%p3639_p13) }
0x1363   :  { %v2538_v25 = vsub.f32 1.0, %v5807_v43  ;;  %v2540_v4 = vmul.f32 %v5807_v43, %v7239_v18  ;;  %5484 = vmatprep.subr.bf16.mxu1 (!%p3639_p13), %v5864_v12 }
0x1364   :  { %v2536_v41 = vadd.f32 %v2535_v29, %v2378_v17  ;;  %v2644_v17 = vld [vmem:[%s7987_s9 + $0x10] sm:$0xff] (!%p3639_p13)  ;;  %v2647_v29 = vld [vmem:[%s7987_s9 + $0x28] sm:$0xff] (!%p3639_p13) }
0x1365   :  { %v5485_v43 = vpack.c.bf16 (!%p3639_p13), %v2647_v29, %v2644_v17  ;;  %v2656_v17 = vld [vmem:[%s7987_s9 + $0x70] sm:$0xff] (!%p3639_p13)  ;;  %v2659_v29 = vld [vmem:[%s7987_s9 + $0x88] sm:$0xff] (!%p3639_p13) }
0x1366   :  { %5808 = vtanh.f32 %v2536_v41  ;;  %v5454_v41 = vpack.c.bf16 (!%p3639_p13), %v2645_v5, %v2642_v53  ;;  %v2654_v53 = vld [vmem:[%s7987_s9 + $0x60] sm:$0xff] (!%p3639_p13)  ;;  %v2657_v5 = vld [vmem:[%s7987_s9 + $0x78] sm:$0xff] (!%p3639_p13) }
0x1367   :  { %5486 = vmatpush3.bf16.msra.mxu1 (!%p3639_p13), %v5485_v43  ;;  %v2664_v43 = vld [vmem:[%s7987_s9 + $0xb0] sm:$0xff] (!%p3639_p13) }
0x1368   :  { %5487 = vmatprep.subr.bf16.mxu1 (!%p3639_p13), %v5864_v12 }
0x1370   :  { %v5809_v31 = vpop.eup %5808 }
0x1371   :  { %v2539_v35 = vmul.f32 %v5809_v31, %v2538_v25  ;;  %v2649_v25 = vld [vmem:[%s7987_s9 + $0x38] sm:$0xff] (!%p3639_p13)  ;;  %v2652_v31 = vld [vmem:[%s7987_s9 + $0x50] sm:$0xff] (!%p3639_p13) }
0x1373   :  { %v7484_v45 = vadd.f32 %v2540_v4, %v2539_v35  ;;  %v2648_v35 = vld [vmem:[%s7987_s9 + $0x30] sm:$0xff] (!%p3639_p13)  ;;  %v5456_v4 = vpack.c.bf16 (!%p3639_p13), %v2652_v31, %v2649_v25  ;;  %v5462_v25 = vpack.c.bf16 (!%p3639_p13), %v2657_v5, %v2654_v53  ;;  %v5491_v31 = vpack.c.bf16 (!%p3639_p13), %v2659_v29, %v2656_v17  ;;  %v2666_v53 = vld [vmem:[%s7987_s9 + $0xc0] sm:$0xff] (!%p3639_p13)  ;;  %v2669_v5 = vld [vmem:[%s7987_s9 + $0xd8] sm:$0xff] (!%p3639_p13) }
0x1374   :  { %v2668_v17 = vld [vmem:[%s7987_s9 + $0xd0] sm:$0xff] (!%p3639_p13)  ;;  %v2671_v29 = vld [vmem:[%s7987_s9 + $0xe8] sm:$0xff] (!%p3639_p13) }
0x1375   :  { %4560 = vmatmul.mubr.f32.vlgmr.msra.gmra.mrb[2].mxu0 %v7484_v45 }
0x1376   :  { %5455 = vmatpush1.bf16.msra.mxu0 (!%p3639_p13), %v5454_v41  ;;  %v2661_v41 = vld [vmem:[%s7987_s9 + $0x98] sm:$0xff] (!%p3639_p13) }
0x1377   :  { %5457 = vmatprep.subr.bf16.mxu0 (!%p3639_p13), %v5456_v4  ;;  %v5464_v4 = vpack.c.bf16 (!%p3639_p13), %v2664_v43, %v2661_v41  ;;  %v2673_v41 = vld [vmem:[%s7987_s9 + $0xf8] sm:$0xff] (!%p3639_p13)  ;;  %v2676_v43 = vld [vmem:[%s7987_s9 + $0x110] sm:$0xff] (!%p3639_p13) }
0x1445   :  { %2618 = sbr.rel (%p3639_p13) target bundleno = 5850 (0x16da), region = 57 }
0x1448   :  { %v2608_v55 = vpop.f32.mrb[2].mxu0 }
0x1449   :  { %v2609_v47 = vadd.f32 %v6505_v56, %v2608_v55  ;;  %v4561_v0 = vpop.f32.mrb[3].mxu0  ;;  %v2651_v55 = vld [vmem:[%s7987_s9 + $0x48] sm:$0xff] (!%p3639_p13) }
0x144a   :  { %v2653_v0 = vld [vmem:[%s7987_s9 + $0x58] sm:$0xff] (!%p3639_p13) }
0x144b   :  { %3637 = vst [vmem:[%s7988_s10 + $0x20] sm:$0xff] %v2609_v47  ;;  %2621 = vmax.xlane.f32.xlu0 (!%p3639_p13), %v2609_v47 }
0x14d8   :  { %v2622_v18 = vpop.xlane.xlu0 %2621 }
0x14d9   :  { %vm2623_vm6 = vcmp.eq.f32.partialorder %v2609_v47, %v2622_v18  ;;  %v2650_v47 = vld [vmem:[%s7987_s9 + $0x40] sm:$0xff]  ;;  %v5458_v18 = vpack.c.bf16 %v2651_v55, %v2648_v35  ;;  %v2660_v35 = vld [vmem:[%s7987_s9 + $0x90] sm:$0xff]  ;;  %v2663_v55 = vld [vmem:[%s7987_s9 + $0xa8] sm:$0xff] }
0x14da   :  { %v7495_v60 = vsel %vm2623_vm6, %v7492_v10, 128  ;;  %v5466_v2 = vpack.c.bf16 %v2663_v55, %v2660_v35  ;;  %v2672_v35 = vld [vmem:[%s7987_s9 + $0xf0] sm:$0xff]  ;;  %v2675_v55 = vld [vmem:[%s7987_s9 + $0x108] sm:$0xff] }
0x14db   :  { %v2626_v48 = vshra.s32 %v7495_v60, 16  ;;  %5459 = vmatpush1.bf16.msra.mxu0 %v5458_v18  ;;  %v2667_v18 = vld [vmem:[%s7987_s9 + $0xc8] sm:$0xff] }
0x14dc   :  { %5461 = vmatprep.subr.bf16.mxu0 %v5460_v14 }
0x14dd   :  { %v7498_v58 = vcvt.s32.f32 %v2626_v48  ;;  %v5488_v48 = vpack.c.bf16 %v2653_v0, %v2650_v47  ;;  %v2662_v47 = vld [vmem:[%s7987_s9 + $0xa0] sm:$0xff]  ;;  %v2665_v0 = vld [vmem:[%s7987_s9 + $0xb8] sm:$0xff] }
0x14de   :  { %v5494_v24 = vpack.c.bf16 %v2665_v0, %v2662_v47  ;;  %v2674_v47 = vld [vmem:[%s7987_s9 + $0x100] sm:$0xff]  ;;  %v2677_v0 = vld [vmem:[%s7987_s9 + $0x118] sm:$0xff] }
0x14df   :  { %2629 = vmin.xlane.f32.xlu0 %v7498_v58  ;;  %5489 = vmatpush3.bf16.msra.mxu1 %v5488_v48  ;;  %v2670_v48 = vld [vmem:[%s7987_s9 + $0xe0] sm:$0xff] }
0x14e0   :  { %5490 = vmatprep.subr.bf16.mxu1 %v5864_v12  ;;  %5463 = vmatpush1.bf16.msra.mxu0 %v5462_v25  ;;  %v5468_v14 = vpack.c.bf16 %v2670_v48, %v2667_v18  ;;  %v5470_v25 = vpack.c.bf16 %v2669_v5, %v2666_v53  ;;  %v2679_v18 = vld [vmem:[%s7987_s9 + $0x128] sm:$0xff]  ;;  %v2682_v48 = vld [vmem:[%s7987_s9 + $0x140] sm:$0xff]  ;;  %v2681_v5 = vld [vmem:[%s7987_s9 + $0x138] sm:$0xff] }
0x14e1   :  { %5465 = vmatprep.subr.bf16.mxu0 %v5464_v4  ;;  %v5472_v4 = vpack.c.bf16 %v2676_v43, %v2673_v41  ;;  %v2678_v53 = vld [vmem:[%s7987_s9 + $0x120] sm:$0xff] }
0x14e2   :  { %v5478_v41 = vpack.c.bf16 %v2681_v5, %v2678_v53 }
0x14e3   :  { %5492 = vmatpush3.bf16.msra.mxu1 %v5491_v31  ;;  %v5497_v31 = vpack.c.bf16 %v2671_v29, %v2668_v17  ;;  %v2680_v17 = vld [vmem:[%s7987_s9 + $0x130] sm:$0xff]  ;;  %v2683_v29 = vld [vmem:[%s7987_s9 + $0x148] sm:$0xff] }
0x14e4   :  { %5493 = vmatprep.subr.bf16.mxu1 %v5864_v12  ;;  %5467 = vmatpush1.bf16.msra.mxu0 %v5466_v2  ;;  %v5474_v2 = vpack.c.bf16 %v2675_v55, %v2672_v35  ;;  %v5503_v43 = vpack.c.bf16 %v2683_v29, %v2680_v17  ;;  %v2685_v55 = vld [vmem:[%s7987_s9 + $0x158] sm:$0xff] }
0x14e5   :  { %5469 = vmatprep.subr.bf16.mxu0 %v5468_v14  ;;  %v5476_v14 = vpack.c.bf16 %v2682_v48, %v2679_v18  ;;  %v2689_v48 = vld [vmem:[%s7987_s9 + $0x178] sm:$0xff] }
0x14e7   :  { %5495 = vmatpush3.bf16.msra.mxu1 %v5494_v24  ;;  %v5500_v24 = vpack.c.bf16 %v2677_v0, %v2674_v47  ;;  %v2688_v47 = vld [vmem:[%s7987_s9 + $0x170] sm:$0xff] }
0x14e8   :  { %5496 = vmatprep.subr.bf16.mxu1 %v5864_v12  ;;  %5471 = vmatpush1.bf16.msra.mxu0 %v5470_v25  ;;  %v2625_v25 = vand.u32 65535, %v7495_v60  ;;  %v5480_v0 = vpack.c.bf16 %v2688_v47, %v2685_v55  ;;  %v2687_v60 = vld [vmem:[%s7987_s9 + $0x168] sm:$0xff] }
0x14e9   :  { %5473 = vmatprep.subr.bf16.mxu0 %v5472_v4 }
0x14ea   :  { %v2627_v35 = vcvt.s32.f32 %v2625_v25  ;;  %v2702_v25 = vrot.slane %v6006_v34, %v6471_v38 }
0x14eb   :  { %5498 = vmatpush3.bf16.msra.mxu1 %v5497_v31 }
0x14ec   :  { %5499 = vmatprep.subr.bf16.mxu1 %v5864_v12  ;;  %5475 = vmatpush1.bf16.msra.mxu0 %v5474_v2 }
0x14ed   :  { %5477 = vmatprep.subr.bf16.mxu0 %v5476_v14 }
0x14ef   :  { %5501 = vmatpush3.bf16.msra.mxu1 %v5500_v24  ;;  %v5865_v24 = vmov 0.0  }
0x14f0   :  { %5502 = vmatprep.subr.bf16.mxu1 %v5864_v12  ;;  %5479 = vmatpush1.bf16.msra.mxu0 %v5478_v41  ;;  %v5867_v41 = vmov 1.0  }
0x14f1   :  { %5481 = vmatprep.subr.bf16.mxu0 %v5480_v0  ;;  %2770 = vmatprep.mubr.f32.mxu0 %v5865_v24 }
0x14f2   :  { %4594 = vmatprep.mubr.msk.f32.mxu1 %vm5866_vm8, %v5865_v24 }
0x14f3   :  { %5504 = vmatpush3.bf16.msra.mxu1 %v5503_v43  ;;  %v2694_v43 = vrot.slane %v6006_v34, %v6114_v20 }
0x14f4   :  { %5505 = vmatprep.subr.bf16.mxu1 %v5864_v12  ;;  %v2684_v12 = vld [vmem:[%s7987_s9 + $0x150] sm:$0xff] }
0x14f5   :  { %v5482_v18 = vpack.c.bf16 %v2687_v60, %v2684_v12 }
0x14f7   :  { %5483 = vmatpush1.bf16.msra.mxu0 %v5482_v18 }
0x156c   :  { %v2630_v31 = vpop.xlane.xlu0 %2629 }
0x156d   :  { %vm2631_vm7 = vcmp.eq.f32.partialorder %v7498_v58, %v2630_v31  ;;  %v2686_v58 = vld [vmem:[%s7987_s9 + $0x160] sm:$0xff]  ;;  %v2636_v53 = vcvt.f32.s32 %v2630_v31 }
0x156e   :  { %v2632_v4 = vsel %vm2631_vm7, %v2627_v35, inf  ;;  %v5506_v2 = vpack.c.bf16 %v2689_v48, %v2686_v58  ;;  %v2698_v35 = vrot.slane %v6006_v34, %v6385_v51 }
0x156f   :  { %2633 = vmin.xlane.f32.xlu1 %v2632_v4  ;;  %v2637_v5 = vshll.u32 %v2636_v53, 16 }
0x1570   :  { %5507 = vmatpush3.bf16.msra.mxu1 %v5506_v2 }
0x15fc   :  { %v2634_v14 = vpop.xlane.xlu1 %2633 }
0x15fd   :  { %v2635_v17 = vcvt.f32.s32 %v2634_v14 }
0x15ff   :  { %v2638_v29 = vadd.s32 %v2637_v5, %v2635_v17 }
0x1601   :  { %vm2639_vm9 = vcmp.eq.s32.totalorder %v7492_v10, %v2638_v29 }
0x1602   :  { %3641 = vmatmul.mubr.msk.f32.vlgmr.msra.gmra.mrb[0].mxu0 %vm2639_vm9, %v5867_v41  ;;  %4595 = vmatmul.mubr.msk.f32.vlgmr.msra.gmra.mrb[0].mxu1 %vm2639_vm9, %v5867_v41 }
0x16d5   :  { %v2772_v4 = vpop.f32.mrb[0].mxu0  ;;  %v2843_v31 = vpop.f32.mrb[0].mxu1 }
0x16d6   :  { %v2773_v55 = vadd.f32 %v2772_v4, %v2694_v43  ;;  %v2844_v47 = vadd.f32 %v2843_v31, %v2702_v25  ;;  %v2774_v0 = vpop.f32.mrb[1].mxu0  ;;  %v4596_v12 = vpop.f32.mrb[1].mxu1 }
0x16d7   :  { %v2775_v60 = vadd.f32 %v2774_v0, %v2698_v35 }
0x16d8   :  { %2847 = vst [vmem:[#allocation3] sm:$0xff] %v2773_v55  ;;  %2849 = vst [vmem:[#allocation3 + $0x10] sm:$0xff] %v2844_v47 }
0x16d9   :  { %2848 = vst [vmem:[#allocation3 + $0x8] sm:$0xff] %v2775_v60 }
0x16da PF:  { %5509 = vmatprep.subr.bf16.mxu0 %v6087_v11  ;;  %5540 = vmatprep.subr.bf16.mxu1 %v5845_v7  ;;  %s3643_s22 = sld [smem:[#allocation5 + $0x4]]  ;;  %v2855_v58 = vld [vmem:[#allocation2 + $0x78] sm:$0xff]  ;;  %v2856_v24 = vld [vmem:[#allocation2 + $0x80] sm:$0xff]  ;;  %v2857_v12 = vld [vmem:[#allocation2 + $0x88] sm:$0xff]  ;;  %s3647_s24 = sld [smem:[#allocation5 + $0x5]] }
0x16db   :  { %5511 = vmatpush1.bf16.msra.mxu0 %v6111_v19  ;;  %5542 = vmatpush3.bf16.msra.mxu1 %v6199_v49 }
0x16dc   :  { %5513 = vmatprep.subr.bf16.mxu0 %v6117_v21  ;;  %5543 = vmatprep.subr.bf16.mxu1 %v5845_v7 }
0x16dd   :  { %2931 = vmatprep.mubr.f32.mxu0 %v5846_v8  ;;  %4629 = vmatprep.mubr.msk.f32.mxu1 %vm5847_vm0, %v5846_v8 }
0x16df   :  { %5515 = vmatpush1.bf16.msra.mxu0 %v6144_v30  ;;  %5545 = vmatpush3.bf16.msra.mxu1 %v6230_v59  ;;  %v2858_v18 = vld [vmem:[#allocation3] sm:$0xff]  ;;  %v2860_v60 = vld [vmem:[#allocation3 + $0x10] sm:$0xff] }
0x16e0   :  { %5517 = vmatprep.subr.bf16.mxu0 %v6155_v33  ;;  %5546 = vmatprep.subr.bf16.mxu1 %v5845_v7  ;;  %p2851_p0 = scmp.ne.s32.totalorder %s3643_s22, 0  ;;  %v2859_v53 = vld [vmem:[#allocation3 + $0x8] sm:$0xff]  ;;  %p3648_p1 = scmp.ne.s32.totalorder %s3647_s24, 0 }
0x16e1   :  { %vm5870_vm13 = vmmov (!%p3648_p1), 0  }
0x16e2   :  { %s2861_s23 = scalar_select %p2851_p0, 1, 0 }
0x16e3   :  { %5519 = vmatpush1.bf16.msra.mxu0 %v6177_v42  ;;  %5548 = vmatpush3.bf16.msra.mxu1 %v6264_v6 }
0x16e4   :  { %5521 = vmatprep.subr.bf16.mxu0 %v6184_v44  ;;  %5549 = vmatprep.subr.bf16.mxu1 %v5845_v7  ;;  %v2862_v10 = vstv %s2861_s23 }
0x16e5   :  { %vm7717_vm10 = vcmp.eq.s32.totalorder %v2862_v10, 1 }
0x16e6   :  { %v2864_v2 = vsel %vm7717_vm10, %v2855_v58, %v2858_v18  ;;  %v2865_v29 = vsel %vm7717_vm10, %v2856_v24, %v2859_v53  ;;  %v2866_v18 = vsel %vm7717_vm10, %v2857_v12, %v2860_v60  ;;  %v5868_v60 = vmov (!%p3648_p1), 0.0|0.0  }
0x16e7   :  { %5523 = vmatpush1.bf16.msra.mxu0 %v6208_v52  ;;  %5551 = vmatpush3.bf16.msra.mxu1 %v6298_v23 }
0x16e8   :  { %5525 = vmatprep.subr.bf16.mxu0 %v6215_v54  ;;  %5552 = vmatprep.subr.bf16.mxu1 %v5845_v7 }
0x16eb   :  { %5527 = vmatpush1.bf16.msra.mxu0 %v6242_v62  ;;  %5554 = vmatpush3.bf16.msra.mxu1 %v6326_v36 }
0x16ec   :  { %5529 = vmatprep.subr.bf16.mxu0 %v6249_v1  ;;  %5555 = vmatprep.subr.bf16.mxu1 %v5845_v7 }
0x16ef   :  { %5531 = vmatpush1.bf16.msra.mxu0 %v6276_v13  ;;  %5557 = vmatpush3.bf16.msra.mxu1 %v6343_v40 }
0x16f0   :  { %5533 = vmatprep.subr.bf16.mxu0 %v6283_v15  ;;  %5558 = vmatprep.subr.bf16.mxu1 %v5845_v7 }
0x16f3   :  { %5535 = vmatpush1.bf16.msra.mxu0 %v6310_v26  ;;  %5560 = vmatpush3.bf16.msra.mxu1 %v6362_v46 }
0x16f4   :  { %5537 = vmatprep.subr.bf16.mxu0 %v6317_v28  ;;  %5561 = vmatprep.subr.bf16.mxu1 %v5845_v7 }
0x16f7   :  { %5539 = vmatpush1.bf16.msra.mxu0 %v6338_v39  ;;  %5563 = vmatpush3.bf16.msra.mxu1 %v6377_v50 }
0x16f8   :  { %5564 = vmatprep.subr.bf16.mxu0 %v5845_v7  ;;  %5620 = vmatprep.subr.bf16.mxu1 (!%p3648_p1), %v5868_v60 }
0x16fa   :  { %2932 = vmatmul.mubr.f32.vlgmr.msra.gmra.mrb[0].mxu0 %v7484_v45  ;;  %4630 = vmatmul.mubr.f32.vlgmr.msra.gmra.mrb[0].mxu1 %v7484_v45 }
0x16fb   :  { %5566 = vmatpush3.bf16.msra.mxu0 %v6397_v57  ;;  %4664 = vmatprep.mubr.msk.f32.mxu0 %vm5847_vm0, %v5846_v8 }
0x16fc   :  { %5567 = vmatprep.subr.bf16.mxu0 %v5845_v7 }
0x16ff   :  { %5569 = vmatpush3.bf16.msra.mxu0 %v6407_v61 }
0x1700   :  { %5570 = vmatprep.subr.bf16.mxu0 %v5845_v7 }
0x1703   :  { %5572 = vmatpush3.bf16.msra.mxu0 %v6417_v3 }
0x1704   :  { %5573 = vmatprep.subr.bf16.mxu0 %v5845_v7 }
0x1707   :  { %5575 = vmatpush3.bf16.msra.mxu0 %v6427_v9 }
0x1708   :  { %5576 = vmatprep.subr.bf16.mxu0 %v5845_v7 }
0x170b   :  { %5578 = vmatpush3.bf16.msra.mxu0 %v6437_v16 }
0x170c   :  { %5579 = vmatprep.subr.bf16.mxu0 %v5845_v7 }
0x170f   :  { %5581 = vmatpush3.bf16.msra.mxu0 %v6447_v22 }
0x1710   :  { %5582 = vmatprep.subr.bf16.mxu0 %v5845_v7 }
0x1713   :  { %5584 = vmatpush3.bf16.msra.mxu0 %v6456_v27 }
0x1714   :  { %5585 = vmatprep.subr.bf16.mxu0 %v5845_v7 }
0x1717   :  { %5587 = vmatpush3.bf16.msra.mxu0 %v6466_v37 }
0x17cd   :  { %v2933_v14 = vpop.f32.mrb[0].mxu0  ;;  %v3004_v5 = vpop.f32.mrb[0].mxu1 }
0x17ce   :  { %v3008_v17 = vadd.f32 %v2933_v14, %v2864_v2  ;;  %v2935_v41 = vpop.f32.mrb[1].mxu0  ;;  %v4631_v43 = vpop.f32.mrb[1].mxu1  ;;  %v3022_v10 = vadd.f32 %v6494_v32, %v3004_v5 }
0x17cf   :  { %v3015_v35 = vadd.f32 %v2935_v41, %v2865_v29 }
0x17d0   :  { %v3644_v25 = vmul.f32 -1.442695, %v3008_v17 }
0x17d1   :  { %v3645_v4 = vmul.f32 -1.442695, %v3015_v35  ;;  %v7737_v35 = vand.u32 (!%p3648_p1), 127, %v96_v63  ;;  %v3134_v63 = vld [vmem:[%s7987_s9 + $0x20] sm:$0xff] (!%p3648_p1) }
0x17d2   :  { %5810 = vpow2.f32 %v3644_v25 }
0x17d3   :  { %5812 = vpow2.f32 %v3645_v4 }
0x17dc   :  { %v5811_v31 = vpop.eup %5810 }
0x17dd   :  { %v3012_v55 = vadd.f32 1.0, %v5811_v31  ;;  %v5813_v47 = vpop.eup %5812 }
0x17de   :  { %v3019_v0 = vadd.f32 1.0, %v5813_v47  ;;  %v3131_v47 = vld [vmem:[%s7987_s9 + $0x8] sm:$0xff] (!%p3648_p1) }
0x17df   :  { %5814 = vrcp.f32 %v3012_v55  ;;  %v5588_v12 = vpack.c.bf16 (!%p3648_p1), %v3134_v63, %v3131_v47  ;;  %v3146_v47 = vld [vmem:[%s7987_s9 + $0x80] sm:$0xff] (!%p3648_p1) }
0x17e0   :  { %5816 = vrcp.f32 %v3019_v0  ;;  %v3130_v0 = vld [vmem:[%s7987_s9] sm:$0xff] (!%p3648_p1) }
0x17e1   :  { %5589 = vmatprep.subr.bf16.mxu0 (!%p3648_p1), %v5588_v12  ;;  %v3142_v63 = vld [vmem:[%s7987_s9 + $0x60] sm:$0xff] (!%p3648_p1)  ;;  %v3145_v12 = vld [vmem:[%s7987_s9 + $0x78] sm:$0xff] (!%p3648_p1) }
0x17e9   :  { %v5815_v58 = vpop.eup %5814 }
0x17ea   :  { %v3023_v2 = vmul.f32 %v5815_v58, %v3022_v10  ;;  %v5817_v53 = vpop.eup %5816  ;;  %v3133_v10 = vld [vmem:[%s7987_s9 + $0x18] sm:$0xff] (!%p3648_p1)  ;;  %v3132_v58 = vld [vmem:[%s7987_s9 + $0x10] sm:$0xff] (!%p3648_p1) }
0x17eb   :  { %v3026_v14 = vsub.f32 1.0, %v5817_v53  ;;  %v3028_v41 = vmul.f32 %v5817_v53, %v7484_v45  ;;  %v3137_v53 = vld [vmem:[%s7987_s9 + $0x38] sm:$0xff] (!%p3648_p1) }
0x17ec   :  { %v3024_v24 = vadd.f32 %v3023_v2, %v2866_v18  ;;  %v3135_v18 = vld [vmem:[%s7987_s9 + $0x28] sm:$0xff] (!%p3648_p1)  ;;  %v5590_v2 = vpack.c.bf16 (!%p3648_p1), %v3133_v10, %v3130_v0  ;;  %v3144_v10 = vld [vmem:[%s7987_s9 + $0x70] sm:$0xff] (!%p3648_p1) }
0x17ee   :  { %5818 = vtanh.f32 %v3024_v24  ;;  %v5621_v24 = vpack.c.bf16 (!%p3648_p1), %v3135_v18, %v3132_v58  ;;  %v3147_v58 = vld [vmem:[%s7987_s9 + $0x88] sm:$0xff] (!%p3648_p1)  ;;  %v3149_v18 = vld [vmem:[%s7987_s9 + $0x98] sm:$0xff] (!%p3648_p1) }
0x17f0   :  { %5622 = vmatpush3.bf16.msra.mxu1 (!%p3648_p1), %v5621_v24  ;;  %v5598_v24 = vpack.c.bf16 (!%p3648_p1), %v3145_v12, %v3142_v63  ;;  %v3156_v12 = vld [vmem:[%s7987_s9 + $0xd0] sm:$0xff] (!%p3648_p1) }
0x17f1   :  { %5623 = vmatprep.subr.bf16.mxu1 (!%p3648_p1), %v5868_v60 }
0x17f8   :  { %v5819_v17 = vpop.eup %5818 }
0x17f9   :  { %v3027_v29 = vmul.f32 %v5819_v17, %v3026_v14  ;;  %v3140_v14 = vld [vmem:[%s7987_s9 + $0x50] sm:$0xff] (!%p3648_p1) }
0x17fa   :  { %v3136_v17 = vld [vmem:[%s7987_s9 + $0x30] sm:$0xff] (!%p3648_p1) }
0x17fb   :  { %v7729_v43 = vadd.f32 %v3028_v41, %v3027_v29  ;;  %v5592_v29 = vpack.c.bf16 (!%p3648_p1), %v3140_v14, %v3137_v53  ;;  %v3139_v41 = vld [vmem:[%s7987_s9 + $0x48] sm:$0xff] (!%p3648_p1)  ;;  %v5627_v53 = vpack.c.bf16 (!%p3648_p1), %v3147_v58, %v3144_v10  ;;  %v3148_v14 = vld [vmem:[%s7987_s9 + $0x90] sm:$0xff] (!%p3648_p1)  ;;  %v3161_v58 = vld [vmem:[%s7987_s9 + $0xf8] sm:$0xff] (!%p3648_p1) }
0x17fc   :  { %v3159_v10 = vld [vmem:[%s7987_s9 + $0xe8] sm:$0xff] (!%p3648_p1) }
0x17fd   :  { %4665 = vmatmul.mubr.f32.vlgmr.msra.gmra.mrb[2].mxu0 %v7729_v43 }
0x17fe   :  { %5591 = vmatpush1.bf16.msra.mxu0 (!%p3648_p1), %v5590_v2  ;;  %v3152_v2 = vld [vmem:[%s7987_s9 + $0xb0] sm:$0xff] (!%p3648_p1) }
0x17ff   :  { %5593 = vmatprep.subr.bf16.mxu0 (!%p3648_p1), %v5592_v29  ;;  %v3151_v29 = vld [vmem:[%s7987_s9 + $0xa8] sm:$0xff] (!%p3648_p1) }
0x18cd   :  { %3106 = sbr.rel (%p3648_p1) target bundleno = 7010 (0x1b62), region = 61 }
0x18d0   :  { %v3096_v5 = vpop.f32.mrb[2].mxu0 }
0x18d1   :  { %v3097_v25 = vadd.f32 %v6505_v56, %v3096_v5  ;;  %v4666_v48 = vpop.f32.mrb[3].mxu0  ;;  %v3138_v5 = vld [vmem:[%s7987_s9 + $0x40] sm:$0xff] (!%p3648_p1) }
0x18d2   :  { %v5594_v48 = vpack.c.bf16 (!%p3648_p1), %v3139_v41, %v3136_v17  ;;  %v5600_v17 = vpack.c.bf16 (!%p3648_p1), %v3152_v2, %v3149_v18  ;;  %v3150_v41 = vld [vmem:[%s7987_s9 + $0xa0] sm:$0xff] (!%p3648_p1)  ;;  %v3164_v18 = vld [vmem:[%s7987_s9 + $0x110] sm:$0xff] (!%p3648_p1) }
0x18d3   :  { %3646 = vst [vmem:[%s7988_s10 + $0x28] sm:$0xff] %v3097_v25  ;;  %3109 = vmax.xlane.f32.xlu0 (!%p3648_p1), %v3097_v25 }
0x18d4   :  { %5595 = vmatpush1.bf16.msra.mxu0 %v5594_v48  ;;  %v3158_v48 = vld [vmem:[%s7987_s9 + $0xe0] sm:$0xff] }
0x1960   :  { %v3110_v45 = vpop.xlane.xlu0 %3109 }
0x1961   :  { %vm3111_vm11 = vcmp.eq.f32.partialorder %v3097_v25, %v3110_v45  ;;  %v3141_v25 = vld [vmem:[%s7987_s9 + $0x58] sm:$0xff] }
0x1962   :  { %v7740_v4 = vsel %vm3111_vm11, %v7737_v35, 128  ;;  %v5624_v45 = vpack.c.bf16 %v3141_v25, %v3138_v5  ;;  %v3153_v5 = vld [vmem:[%s7987_s9 + $0xb8] sm:$0xff]  ;;  %v3155_v25 = vld [vmem:[%s7987_s9 + $0xc8] sm:$0xff] }
0x1963   :  { %v3114_v31 = vshra.s32 %v7740_v4, 16  ;;  %v5604_v63 = vpack.c.bf16 %v3158_v48, %v3155_v25  ;;  %v3170_v25 = vld [vmem:[%s7987_s9 + $0x140] sm:$0xff] }
0x1964   :  { %5625 = vmatpush3.bf16.msra.mxu1 %v5624_v45  ;;  %v5602_v45 = vpack.c.bf16 %v3151_v29, %v3148_v14  ;;  %v5608_v14 = vpack.c.bf16 %v3164_v18, %v3161_v58  ;;  %v3162_v29 = vld [vmem:[%s7987_s9 + $0x100] sm:$0xff]  ;;  %v3113_v18 = vand.u32 65535, %v7740_v4  ;;  %v3175_v4 = vld [vmem:[%s7987_s9 + $0x168] sm:$0xff] }
0x1965   :  { %v7743_v55 = vcvt.s32.f32 %v3114_v31  ;;  %v3143_v31 = vld [vmem:[%s7987_s9 + $0x68] sm:$0xff]  ;;  %5626 = vmatprep.subr.bf16.mxu1 %v5868_v60 }
0x1966   :  { %v5596_v0 = vpack.c.bf16 %v3146_v47, %v3143_v31  ;;  %v5630_v31 = vpack.c.bf16 %v3153_v5, %v3150_v41  ;;  %v3154_v47 = vld [vmem:[%s7987_s9 + $0xc0] sm:$0xff]  ;;  %v3165_v41 = vld [vmem:[%s7987_s9 + $0x118] sm:$0xff]  ;;  %v3167_v5 = vld [vmem:[%s7987_s9 + $0x128] sm:$0xff] }
0x1967   :  { %3117 = vmin.xlane.f32.xlu0 %v7743_v55 }
0x1968   :  { %5597 = vmatprep.subr.bf16.mxu0 %v5596_v0  ;;  %5628 = vmatpush3.bf16.msra.mxu1 %v5627_v53  ;;  %v3157_v0 = vld [vmem:[%s7987_s9 + $0xd8] sm:$0xff]  ;;  %v3160_v53 = vld [vmem:[%s7987_s9 + $0xf0] sm:$0xff] }
0x1969   :  { %5599 = vmatpush1.bf16.msra.mxu0 %v5598_v24  ;;  %5629 = vmatprep.subr.bf16.mxu1 %v5868_v60  ;;  %v5606_v2 = vpack.c.bf16 %v3157_v0, %v3154_v47  ;;  %v5633_v24 = vpack.c.bf16 %v3159_v10, %v3156_v12  ;;  %v5612_v47 = vpack.c.bf16 %v3170_v25, %v3167_v5  ;;  %v3168_v0 = vld [vmem:[%s7987_s9 + $0x130] sm:$0xff]  ;;  %v3171_v12 = vld [vmem:[%s7987_s9 + $0x148] sm:$0xff]  ;;  %v3177_v5 = vld [vmem:[%s7987_s9 + $0x178] sm:$0xff] }
0x196a   :  { %5601 = vmatprep.subr.bf16.mxu0 %v5600_v17  ;;  %v3163_v17 = vld [vmem:[%s7987_s9 + $0x108] sm:$0xff]  ;;  %v5639_v58 = vpack.c.bf16 %v3171_v12, %v3168_v0  ;;  %v5871_v12 = vmov 1.0  }
0x196b   :  { %v5610_v48 = vpack.c.bf16 %v3163_v17, %v3160_v53  ;;  %v3176_v17 = vld [vmem:[%s7987_s9 + $0x170] sm:$0xff] }
0x196c   :  { %5631 = vmatpush3.bf16.msra.mxu1 %v5630_v31  ;;  %v3166_v31 = vld [vmem:[%s7987_s9 + $0x120] sm:$0xff] }
0x196d   :  { %5603 = vmatpush1.bf16.msra.mxu0 %v5602_v45  ;;  %5632 = vmatprep.subr.bf16.mxu1 %v5868_v60  ;;  %v5636_v45 = vpack.c.bf16 %v3165_v41, %v3162_v29 }
0x196e   :  { %5605 = vmatprep.subr.bf16.mxu0 %v5604_v63  ;;  %v3169_v63 = vld [vmem:[%s7987_s9 + $0x138] sm:$0xff] }
0x196f   :  { %v5614_v10 = vpack.c.bf16 %v3169_v63, %v3166_v31 }
0x1970   :  { %5634 = vmatpush3.bf16.msra.mxu1 %v5633_v24  ;;  %v3115_v24 = vcvt.s32.f32 %v3113_v18  ;;  %v3186_v18 = vrot.slane %v6006_v34, %v6385_v51 }
0x1971   :  { %5607 = vmatpush1.bf16.msra.mxu0 %v5606_v2  ;;  %5635 = vmatprep.subr.bf16.mxu1 %v5868_v60 }
0x1972   :  { %5609 = vmatprep.subr.bf16.mxu0 %v5608_v14  ;;  %v3173_v14 = vld [vmem:[%s7987_s9 + $0x158] sm:$0xff] }
0x1973   :  { %v5616_v29 = vpack.c.bf16 %v3176_v17, %v3173_v14 }
0x1974   :  { %5637 = vmatpush3.bf16.msra.mxu1 %v5636_v45 }
0x1975   :  { %5611 = vmatpush1.bf16.msra.mxu0 %v5610_v48  ;;  %5638 = vmatprep.subr.bf16.mxu1 %v5868_v60  ;;  %v5869_v48 = vmov 0.0  }
0x1976   :  { %5613 = vmatprep.subr.bf16.mxu0 %v5612_v47  ;;  %3258 = vmatprep.mubr.f32.mxu0 %v5869_v48 }
0x1977   :  { %4699 = vmatprep.mubr.msk.f32.mxu1 %vm5870_vm13, %v5869_v48 }
0x1978   :  { %5640 = vmatpush3.bf16.msra.mxu1 %v5639_v58  ;;  %v3190_v58 = vrot.slane %v6006_v34, %v6471_v38 }
0x1979   :  { %5615 = vmatpush1.bf16.msra.mxu0 %v5614_v10  ;;  %5641 = vmatprep.subr.bf16.mxu1 %v5868_v60  ;;  %v3172_v60 = vld [vmem:[%s7987_s9 + $0x150] sm:$0xff]  ;;  %v3182_v10 = vrot.slane %v6006_v34, %v6114_v20 }
0x197a   :  { %v5618_v41 = vpack.c.bf16 %v3175_v4, %v3172_v60  ;;  %5617 = vmatprep.subr.bf16.mxu0 %v5616_v29 }
0x197d   :  { %5619 = vmatpush1.bf16.msra.mxu0 %v5618_v41 }
0x19f4   :  { %v3118_v2 = vpop.xlane.xlu0 %3117 }
0x19f5   :  { %vm3119_vm12 = vcmp.eq.f32.partialorder %v7743_v55, %v3118_v2  ;;  %v3174_v55 = vld [vmem:[%s7987_s9 + $0x160] sm:$0xff]  ;;  %v3124_v45 = vcvt.f32.s32 %v3118_v2 }
0x19f6   :  { %v3120_v53 = vsel %vm3119_vm12, %v3115_v24, inf  ;;  %v5642_v25 = vpack.c.bf16 %v3177_v5, %v3174_v55 }
0x19f7   :  { %3121 = vmin.xlane.f32.xlu1 %v3120_v53  ;;  %v3125_v47 = vshll.u32 %v3124_v45, 16 }
0x19f8   :  { %5643 = vmatpush3.bf16.msra.mxu1 %v5642_v25 }
0x1a84   :  { %v3122_v31 = vpop.xlane.xlu1 %3121 }
0x1a85   :  { %v3123_v63 = vcvt.f32.s32 %v3122_v31 }
0x1a87   :  { %v3126_v0 = vadd.s32 %v3125_v47, %v3123_v63 }
0x1a89   :  { %vm3127_vm14 = vcmp.eq.s32.totalorder %v7737_v35, %v3126_v0 }
0x1a8a   :  { %3650 = vmatmul.mubr.msk.f32.vlgmr.msra.gmra.mrb[0].mxu0 %vm3127_vm14, %v5871_v12  ;;  %4700 = vmatmul.mubr.msk.f32.vlgmr.msra.gmra.mrb[0].mxu1 %vm3127_vm14, %v5871_v12 }
0x1b5d   :  { %v3260_v24 = vpop.f32.mrb[0].mxu0  ;;  %v3331_v2 = vpop.f32.mrb[0].mxu1 }
0x1b5e   :  { %v3261_v53 = vadd.f32 %v3260_v24, %v3182_v10  ;;  %v3332_v14 = vadd.f32 %v3331_v2, %v3190_v58  ;;  %v3262_v17 = vpop.f32.mrb[1].mxu0  ;;  %v4701_v29 = vpop.f32.mrb[1].mxu1 }
0x1b5f   :  { %v3263_v60 = vadd.f32 %v3262_v17, %v3186_v18 }
0x1b60   :  { %3335 = vst [vmem:[#allocation3] sm:$0xff] %v3261_v53  ;;  %3337 = vst [vmem:[#allocation3 + $0x10] sm:$0xff] %v3332_v14 }
0x1b61   :  { %3336 = vst [vmem:[#allocation3 + $0x8] sm:$0xff] %v3263_v60 }
0x1b62 PF:  { %5645 = vmatprep.subr.bf16.mxu0 %v6087_v11  ;;  %5676 = vmatprep.subr.bf16.mxu1 %v5845_v7  ;;  %s3652_s9 = sld [smem:[#allocation5 + $0x5]]  ;;  %v3343_v34 = vld [vmem:[#allocation2 + $0x90] sm:$0xff] }
0x1b63   :  { %5647 = vmatpush1.bf16.msra.mxu0 %v6111_v19  ;;  %5678 = vmatpush3.bf16.msra.mxu1 %v6199_v49 }
0x1b64   :  { %5649 = vmatprep.subr.bf16.mxu0 %v6117_v21  ;;  %5679 = vmatprep.subr.bf16.mxu1 %v5845_v7  ;;  %v3344_v21 = vld [vmem:[#allocation2 + $0x98] sm:$0xff] }
0x1b65   :  { %3419 = vmatprep.mubr.f32.mxu0 %v5846_v8  ;;  %4734 = vmatprep.mubr.msk.f32.mxu1 %vm5847_vm0, %v5846_v8 }
0x1b67   :  { %5651 = vmatpush1.bf16.msra.mxu0 %v6144_v30  ;;  %5681 = vmatpush3.bf16.msra.mxu1 %v6230_v59  ;;  %v3346_v11 = vld [vmem:[#allocation3] sm:$0xff] }
0x1b68   :  { %5653 = vmatprep.subr.bf16.mxu0 %v6155_v33  ;;  %5682 = vmatprep.subr.bf16.mxu1 %v5845_v7  ;;  %p3339_p2 = scmp.ne.s32.totalorder %s3652_s9, 0  ;;  %v3347_v30 = vld [vmem:[#allocation3 + $0x8] sm:$0xff] }
0x1b6a   :  { %s3349_s14 = scalar_select %p3339_p2, 1, 0 }
0x1b6b   :  { %5655 = vmatpush1.bf16.msra.mxu0 %v6177_v42  ;;  %5684 = vmatpush3.bf16.msra.mxu1 %v6264_v6 }
0x1b6c   :  { %5657 = vmatprep.subr.bf16.mxu0 %v6184_v44  ;;  %5685 = vmatprep.subr.bf16.mxu1 %v5845_v7 }
0x1b6f   :  { %5659 = vmatpush1.bf16.msra.mxu0 %v6208_v52  ;;  %5687 = vmatpush3.bf16.msra.mxu1 %v6298_v23  ;;  %v3345_v23 = vld [vmem:[#allocation2 + $0xa0] sm:$0xff] }
0x1b70   :  { %5661 = vmatprep.subr.bf16.mxu0 %v6215_v54  ;;  %5688 = vmatprep.subr.bf16.mxu1 %v5845_v7 }
0x1b73   :  { %5663 = vmatpush1.bf16.msra.mxu0 %v6242_v62  ;;  %5690 = vmatpush3.bf16.msra.mxu1 %v6326_v36 }
0x1b74   :  { %5665 = vmatprep.subr.bf16.mxu0 %v6249_v1  ;;  %5691 = vmatprep.subr.bf16.mxu1 %v5845_v7 }
0x1b77   :  { %5667 = vmatpush1.bf16.msra.mxu0 %v6276_v13  ;;  %5693 = vmatpush3.bf16.msra.mxu1 %v6343_v40 }
0x1b78   :  { %5669 = vmatprep.subr.bf16.mxu0 %v6283_v15  ;;  %5694 = vmatprep.subr.bf16.mxu1 %v5845_v7 }
0x1b7b   :  { %5671 = vmatpush1.bf16.msra.mxu0 %v6310_v26  ;;  %5696 = vmatpush3.bf16.msra.mxu1 %v6362_v46  ;;  %v3348_v26 = vld [vmem:[#allocation3 + $0x10] sm:$0xff] }
0x1b7c   :  { %5673 = vmatprep.subr.bf16.mxu0 %v6317_v28  ;;  %5697 = vmatprep.subr.bf16.mxu1 %v5845_v7 }
0x1b7f   :  { %5675 = vmatpush1.bf16.msra.mxu0 %v6338_v39  ;;  %5699 = vmatpush3.bf16.msra.mxu1 %v6377_v50 }
0x1b80   :  { %5700 = vmatprep.subr.bf16.mxu0 %v5845_v7 }
0x1b82   :  { %3420 = vmatmul.mubr.f32.vlgmr.msra.gmra.mrb[0].mxu0 %v7729_v43  ;;  %4735 = vmatmul.mubr.f32.vlgmr.msra.gmra.mrb[0].mxu1 %v7729_v43 }
0x1b83   :  { %5702 = vmatpush3.bf16.msra.mxu0 %v6397_v57  ;;  %4769 = vmatprep.mubr.msk.f32.mxu0 %vm5847_vm0, %v5846_v8  ;;  %v3350_v8 = vstv %s3349_s14 }
0x1b84   :  { %5703 = vmatprep.subr.bf16.mxu0 %v5845_v7  ;;  %vm7962_vm0 = vcmp.eq.s32.totalorder %v3350_v8, 1 }
0x1b85   :  { %v3352_v20 = vsel %vm7962_vm0, %v3343_v34, %v3346_v11  ;;  %v3353_v44 = vsel %vm7962_vm0, %v3344_v21, %v3347_v30  ;;  %v3354_v39 = vsel %vm7962_vm0, %v3345_v23, %v3348_v26 }
0x1b87   :  { %5705 = vmatpush3.bf16.msra.mxu0 %v6407_v61 }
0x1b88   :  { %5706 = vmatprep.subr.bf16.mxu0 %v5845_v7 }
0x1b8b   :  { %5708 = vmatpush3.bf16.msra.mxu0 %v6417_v3 }
0x1b8c   :  { %5709 = vmatprep.subr.bf16.mxu0 %v5845_v7 }
0x1b8f   :  { %5711 = vmatpush3.bf16.msra.mxu0 %v6427_v9 }
0x1b90   :  { %5712 = vmatprep.subr.bf16.mxu0 %v5845_v7 }
0x1b93   :  { %5714 = vmatpush3.bf16.msra.mxu0 %v6437_v16 }
0x1b94   :  { %5715 = vmatprep.subr.bf16.mxu0 %v5845_v7 }
0x1b97   :  { %5717 = vmatpush3.bf16.msra.mxu0 %v6447_v22 }
0x1b98   :  { %5718 = vmatprep.subr.bf16.mxu0 %v5845_v7 }
0x1b9b   :  { %5720 = vmatpush3.bf16.msra.mxu0 %v6456_v27 }
0x1b9c   :  { %5721 = vmatprep.subr.bf16.mxu0 %v5845_v7 }
0x1b9f   :  { %5723 = vmatpush3.bf16.msra.mxu0 %v6466_v37 }
0x1c55   :  { %v3421_v33 = vpop.f32.mrb[0].mxu0  ;;  %v3492_v42 = vpop.f32.mrb[0].mxu1 }
0x1c56   :  { %v3496_v7 = vadd.f32 %v3421_v33, %v3352_v20  ;;  %v3423_v49 = vpop.f32.mrb[1].mxu0  ;;  %v4736_v52 = vpop.f32.mrb[1].mxu1  ;;  %v3510_v28 = vadd.f32 %v6494_v32, %v3492_v42 }
0x1c57   :  { %v3503_v59 = vadd.f32 %v3423_v49, %v3353_v44 }
0x1c58   :  { %v3653_v54 = vmul.f32 -1.442695, %v3496_v7 }
0x1c59   :  { %v3654_v62 = vmul.f32 -1.442695, %v3503_v59 }
0x1c5a   :  { %5820 = vpow2.f32 %v3653_v54 }
0x1c5b   :  { %5822 = vpow2.f32 %v3654_v62 }
0x1c64   :  { %v5821_v1 = vpop.eup %5820 }
0x1c65   :  { %v3500_v6 = vadd.f32 1.0, %v5821_v1  ;;  %v5823_v13 = vpop.eup %5822 }
0x1c66   :  { %v3507_v15 = vadd.f32 1.0, %v5823_v13 }
0x1c67   :  { %5824 = vrcp.f32 %v3500_v6 }
0x1c68   :  { %5826 = vrcp.f32 %v3507_v15 }
0x1c71   :  { %v5825_v36 = vpop.eup %5824 }
0x1c72   :  { %v3511_v40 = vmul.f32 %v5825_v36, %v3510_v28  ;;  %v5827_v50 = vpop.eup %5826 }
0x1c73   :  { %v3514_v51 = vsub.f32 1.0, %v5827_v50  ;;  %v3516_v3 = vmul.f32 %v5827_v50, %v7729_v43 }
0x1c74   :  { %v3512_v46 = vadd.f32 %v3511_v40, %v3354_v39 }
0x1c76   :  { %5828 = vtanh.f32 %v3512_v46 }
0x1c80   :  { %v5829_v57 = vpop.eup %5828 }
0x1c81   :  { %v3515_v61 = vmul.f32 %v5829_v57, %v3514_v51 }
0x1c83   :  { %v3517_v9 = vadd.f32 %v3516_v3, %v3515_v61 }
0x1c85   :  { %4770 = vmatmul.mubr.f32.vlgmr.msra.gmra.mrb[2].mxu0 %v3517_v9 }
0x1d58   :  { %v3584_v16 = vpop.f32.mrb[2].mxu0 }
0x1d59   :  { %v3585_v22 = vadd.f32 %v6505_v56, %v3584_v16  ;;  %v4771_v27 = vpop.f32.mrb[3].mxu0 }
0x1d5b   :  { %3655 = vst [vmem:[%s7988_s10 + $0x30] sm:$0xff] %v3585_v22 }

</bundles_post_ra>
